<compile_context>
chip_gen: v6e
topology: v6e:2x2x1
jax: 0.10.0
libtpu: 0.0.40
codegen_flags: <defaults>
</compile_context>

<pallas_src>
import functools

import jax
import jax.numpy as jnp
from jax import lax
from jax.experimental import pallas as pl
from jax.experimental.pallas import tpu as pltpu

NUM_LAYERS = 2


# ----------------------------------------------------------------------------
# Fused bidirectional LSTM layer kernel (chunk-streamed, input proj fused).
# ----------------------------------------------------------------------------
def _make_bilstm_kernel(n_in, chunk, batch, hidden, num_chunks, final):
    C, B, H = chunk, batch, hidden

    def kernel(*refs):
        it = iter(refs)
        # ---- inputs ----
        xf_refs = [next(it) for _ in range(n_in)]      # (C*B, D_i) fwd chunk
        xb_refs = [next(it) for _ in range(n_in)]      # (C*B, D_i) bwd chunk
        wihf = [next(it) for _ in range(n_in)]         # (D_i, 4H) bf16
        wihb = [next(it) for _ in range(n_in)]         # (D_i, 4H) bf16
        whhf_ref = next(it)                            # (H, 4H) bf16
        whhb_ref = next(it)                            # (H, 4H) bf16
        bf_ref = next(it)                              # (1, 4H) f32 (b_ih+b_hh)
        bb_ref = next(it)                              # (1, 4H) f32
        if final:
            fcwf_ref = next(it)                        # (H, H) bf16 (fc_w rows :H)
            fcwb_ref = next(it)                        # (H, H) bf16 (fc_w rows H:)
            fcb_ref = next(it)                         # (1, H) f32
        # ---- outputs ----
        outf_ref = next(it)                            # (C*B, H)
        outb_ref = next(it)                            # (C*B, H)
        if final:
            hc_ref = next(it)                          # (2, B, H) f32
        # ---- scratch (persists across grid steps) ----
        hf_s, cf_s, hb_s, cb_s = (next(it) for _ in range(4))   # (B, H) f32
        xpf_s = next(it)                               # (C*B, 4H) f32
        xpb_s = next(it)                               # (C*B, 4H) f32
        stf_s = next(it)                               # (C*B, H) f32 staging
        stb_s = next(it)                               # (C*B, H) f32 staging

        k = pl.program_id(0)

        @pl.when(k == 0)
        def _init():
            z = jnp.zeros((B, H), jnp.float32)
            hf_s[...] = z
            cf_s[...] = z
            hb_s[...] = z
            cb_s[...] = z

        # --- fused input projection for the whole chunk (bf16 MXU, f32 acc) ---
        xpf = bf_ref[...]
        xpb = bb_ref[...]
        for i in range(n_in):
            xpf = xpf + jnp.dot(xf_refs[i][...].astype(jnp.bfloat16), wihf[i][...],
                                preferred_element_type=jnp.float32)
            xpb = xpb + jnp.dot(xb_refs[i][...].astype(jnp.bfloat16), wihb[i][...],
                                preferred_element_type=jnp.float32)
        xpf_s[...] = xpf
        xpb_s[...] = xpb

        whh_f = whhf_ref[...]       # loop-invariant, hoisted loads
        whh_b = whhb_ref[...]

        def gates_to_hc(g, c_prev):
            # PyTorch gate order i, f, g, o; slices lane-aligned when H%128==0.
            i_g = jax.nn.sigmoid(g[:, 0 * H:1 * H])
            f_g = jax.nn.sigmoid(g[:, 1 * H:2 * H])
            g_g = jnp.tanh(g[:, 2 * H:3 * H])
            o_g = jax.nn.sigmoid(g[:, 3 * H:4 * H])
            c_new = f_g * c_prev + i_g * g_g
            return o_g * jnp.tanh(c_new), c_new

        def body(j, carry):
            h_f, c_f, h_b, c_b = carry
            rf = pl.multiple_of(j * B, B)              # fwd local time j
            rb = pl.multiple_of((C - 1 - j) * B, B)    # bwd local time C-1-j
            g_f = xpf_s[pl.ds(rf, B), :] + jnp.dot(
                h_f.astype(jnp.bfloat16), whh_f, preferred_element_type=jnp.float32)
            g_b = xpb_s[pl.ds(rb, B), :] + jnp.dot(
                h_b.astype(jnp.bfloat16), whh_b, preferred_element_type=jnp.float32)
            h_f, c_f = gates_to_hc(g_f, c_f)
            h_b, c_b = gates_to_hc(g_b, c_b)
            stf_s[pl.ds(rf, B), :] = h_f
            stb_s[pl.ds(rb, B), :] = h_b
            return (h_f, c_f, h_b, c_b)

        carry0 = (hf_s[...], cf_s[...], hb_s[...], cb_s[...])
        h_f, c_f, h_b, c_b = lax.fori_loop(0, C, body, carry0,
                                           unroll=min(C, 4))
        hf_s[...] = h_f
        cf_s[...] = c_f
        hb_s[...] = h_b
        cb_s[...] = c_b

        # Bulk lane-dense writeback of the finished chunk.
        outf_ref[...] = stf_s[...].astype(outf_ref.dtype)
        outb_ref[...] = stb_s[...].astype(outb_ref.dtype)

        if final:
            # Fused encoder fc on the final states of both directions:
            #   hidden = [h_f|h_b] @ fc_w + fc_b ; cell = [c_f|c_b] @ fc_w + fc_b
            @pl.when(k == num_chunks - 1)
            def _fc():
                fcw_f = fcwf_ref[...]
                fcw_b = fcwb_ref[...]
                fcb = fcb_ref[...]
                hid = (jnp.dot(h_f.astype(jnp.bfloat16), fcw_f,
                               preferred_element_type=jnp.float32)
                       + jnp.dot(h_b.astype(jnp.bfloat16), fcw_b,
                                 preferred_element_type=jnp.float32) + fcb)
                cel = (jnp.dot(c_f.astype(jnp.bfloat16), fcw_f,
                               preferred_element_type=jnp.float32)
                       + jnp.dot(c_b.astype(jnp.bfloat16), fcw_b,
                                 preferred_element_type=jnp.float32) + fcb)
                hc_ref[0] = hid
                hc_ref[1] = cel

    return kernel


def bilstm_layer(xs, fwd, bwd, *, chunk, out_dtype=jnp.float32, fc=None):
    """One bidirectional LSTM layer as a single chunk-streamed pallas_call.

    xs  : tuple of (S, B, D_i) arrays; their feature concat is the layer input
          (layer 1 passes the previous layer's fwd/bwd halves separately).
    fwd / bwd : dict(w_ih=tuple[(D_i, 4H)], w_hh=(H, 4H), b=(1, 4H) = b_ih+b_hh)
    fc  : optional (fc_w (2H, H), fc_b (1, H)) fused into the last grid step.

    Returns (out_f (S,B,H), out_b (S,B,H)[, hc (2,B,H) = [fc(h), fc(c)]]).
    """
    S, B, _ = xs[0].shape
    H = fwd["w_hh"].shape[0]
    C = chunk
    assert S % C == 0, "seq length must be divisible by the time chunk"
    assert B % 8 == 0, "batch must be a multiple of 8 (sublane tile)"
    nc = S // C
    n_in = len(xs)
    final = fc is not None
    bf16 = lambda a: a.astype(jnp.bfloat16)

    # Time-flattened (S*B, D) views: free XLA reshapes, give lane-dense 2-D
    # blocks and aligned per-step sublane slices inside the kernel.
    xs2 = [x.reshape(S * B, x.shape[-1]) for x in xs]

    operands, in_specs = [], []
    for x in xs2:                                  # forward-chunk views
        operands.append(x)
        in_specs.append(pl.BlockSpec((C * B, x.shape[-1]), lambda k: (k, 0)))
    for x in xs2:                                  # backward-chunk views
        operands.append(x)
        in_specs.append(pl.BlockSpec((C * B, x.shape[-1]),
                                     lambda k: (nc - 1 - k, 0)))

    def resident(a):                               # whole array, VMEM-resident
        return pl.BlockSpec(a.shape, lambda *_: (0,) * a.ndim)

    for w in fwd["w_ih"]:
        operands.append(bf16(w)); in_specs.append(resident(w))
    for w in bwd["w_ih"]:
        operands.append(bf16(w)); in_specs.append(resident(w))
    for a in (bf16(fwd["w_hh"]), bf16(bwd["w_hh"]), fwd["b"], bwd["b"]):
        operands.append(a); in_specs.append(resident(a))
    if final:
        fc_w, fc_b = fc
        for a in (bf16(fc_w[:H]), bf16(fc_w[H:]), fc_b):
            operands.append(a); in_specs.append(resident(a))

    out_shape = [jax.ShapeDtypeStruct((S * B, H), out_dtype),
                 jax.ShapeDtypeStruct((S * B, H), out_dtype)]
    out_specs = [pl.BlockSpec((C * B, H), lambda k: (k, 0)),
                 pl.BlockSpec((C * B, H), lambda k: (nc - 1 - k, 0))]
    if final:
        out_shape.append(jax.ShapeDtypeStruct((2, B, H), jnp.float32))
        out_specs.append(pl.BlockSpec((2, B, H), lambda k: (0, 0, 0)))

    scratch = ([pltpu.VMEM((B, H), jnp.float32) for _ in range(4)]        # h/c
               + [pltpu.VMEM((C * B, 4 * H), jnp.float32) for _ in range(2)]  # xp
               + [pltpu.VMEM((C * B, H), jnp.float32) for _ in range(2)])     # stage

    outs = pl.pallas_call(
        _make_bilstm_kernel(n_in, C, B, H, nc, final),
        grid=(nc,),
        in_specs=in_specs,
        out_specs=tuple(out_specs),
        out_shape=tuple(out_shape),
        scratch_shapes=scratch,
        compiler_params=pltpu.CompilerParams(
            # Recurrence carries state across chunks -> sequential grid axis.
            dimension_semantics=("arbitrary",),
            vmem_limit_bytes=32 * 1024 * 1024),
    )(*operands)

    out_f = outs[0].reshape(S, B, H)
    out_b = outs[1].reshape(S, B, H)
    if final:
        return out_f, out_b, outs[2]
    return out_f, out_b


# ----------------------------------------------------------------------------
# Encoder forward (mirrors the PyTorch module, eval mode).
# ----------------------------------------------------------------------------
def encoder_forward(params, x_tokens, *, chunk=4):
    # Embedding lookup (XLA gather); dropout(p=0.5) -> identity in eval mode.
    emb = jnp.take(params["embedding"], x_tokens, axis=0)          # (S, B, E)

    # Layer 0: inter-layer activations kept bf16 (halves HBM traffic).
    out0_f, out0_b = bilstm_layer((emb,), params["l0_f"], params["l0_b"],
                                  chunk=chunk, out_dtype=jnp.bfloat16)
    # inter-layer LSTM dropout -> identity in eval mode.

    # Layer 1 (final): consumes fwd/bwd halves separately via a row-split W_ih
    # (no concat HBM pass); the encoder fc is fused into its last grid step.
    out1_f, out1_b, hc = bilstm_layer(
        (out0_f, out0_b), params["l1_f"], params["l1_b"], chunk=chunk,
        out_dtype=jnp.float32, fc=(params["fc_w"], params["fc_b"]))

    outputs = jnp.concatenate([out1_f, out1_b], axis=-1)           # (S, B, 2H)
    hidden = jnp.broadcast_to(hc[0][None], (NUM_LAYERS,) + hc[0].shape)
    cell = jnp.broadcast_to(hc[1][None], (NUM_LAYERS,) + hc[1].shape)
    return outputs, hidden, cell


# ----------------------------------------------------------------------------
# Deterministic parameter init (matches the kernel's layout expectations).
# ----------------------------------------------------------------------------
def init_params(key, vocab, emb_dim, hidden):
    keys = iter(jax.random.split(key, 24))
    bound = 1.0 / (hidden ** 0.5)

    def uniform(shape):
        return jax.random.uniform(next(keys), shape, minval=-bound,
                                  maxval=bound, dtype=jnp.float32)

    def lstm_dir(in_splits):
        return {"w_ih": tuple(uniform((d, 4 * hidden)) for d in in_splits),
                "w_hh": uniform((hidden, 4 * hidden)),
                "b": uniform((1, 4 * hidden))}      # combined b_ih + b_hh

    return {
        "embedding": jax.random.normal(next(keys), (vocab, emb_dim),
                                       dtype=jnp.float32) * 0.1,
        "l0_f": lstm_dir((emb_dim,)),
        "l0_b": lstm_dir((emb_dim,)),
        "l1_f": lstm_dir((hidden, hidden)),          # split to match (out_f, out_b)
        "l1_b": lstm_dir((hidden, hidden)),
        "fc_w": uniform((2 * hidden, hidden)),
        "fc_b": uniform((1, hidden)),
    }


if __name__ == "__main__":
    SEQ, BATCH = 8, 8                 # batch multiple of 8 -> dense sublanes
    VOCAB, EMB, HIDDEN = 32, 128, 128  # H multiple of 128 -> lane-aligned gates
    CHUNK = 4                          # grid=(2,): exercises chunk streaming

    key = jax.random.PRNGKey(0)
    k_params, k_tokens = jax.random.split(key)
    params = init_params(k_params, VOCAB, EMB, HIDDEN)
    x = jax.random.randint(k_tokens, (SEQ, BATCH), 0, VOCAB, dtype=jnp.int32)

    fwd = jax.jit(functools.partial(encoder_forward, chunk=CHUNK))
    outputs, hidden, cell = fwd(params, x)
    jax.block_until_ready((outputs, hidden, cell))

    assert outputs.shape == (SEQ, BATCH, 2 * HIDDEN)
    assert hidden.shape == (NUM_LAYERS, BATCH, HIDDEN)
    assert cell.shape == (NUM_LAYERS, BATCH, HIDDEN)
    assert bool(jnp.all(jnp.isfinite(outputs)))
    assert bool(jnp.all(jnp.isfinite(hidden)))
    assert bool(jnp.all(jnp.isfinite(cell)))
    print("KERNEL_OK")
</pallas_src>

<mosaic_0001>
module attributes {stable_mosaic.version = 11 : i64} {
  func.func @kernel(%arg0: i32, %arg1: memref<32x128xbf16, #tpu.memory_space<vmem>>, %arg2: memref<32x128xbf16, #tpu.memory_space<vmem>>, %arg3: memref<32x128xbf16, #tpu.memory_space<vmem>>, %arg4: memref<32x128xbf16, #tpu.memory_space<vmem>>, %arg5: memref<128x512xbf16, #tpu.memory_space<vmem>>, %arg6: memref<128x512xbf16, #tpu.memory_space<vmem>>, %arg7: memref<128x512xbf16, #tpu.memory_space<vmem>>, %arg8: memref<128x512xbf16, #tpu.memory_space<vmem>>, %arg9: memref<128x512xbf16, #tpu.memory_space<vmem>>, %arg10: memref<128x512xbf16, #tpu.memory_space<vmem>>, %arg11: memref<1x512xf32, #tpu.memory_space<vmem>>, %arg12: memref<1x512xf32, #tpu.memory_space<vmem>>, %arg13: memref<128x128xbf16, #tpu.memory_space<vmem>>, %arg14: memref<128x128xbf16, #tpu.memory_space<vmem>>, %arg15: memref<1x128xf32, #tpu.memory_space<vmem>>, %arg16: memref<32x128xf32, #tpu.memory_space<vmem>>, %arg17: memref<32x128xf32, #tpu.memory_space<vmem>>, %arg18: memref<2x8x128xf32, #tpu.memory_space<vmem>>, %arg19: memref<8x128xf32, #tpu.memory_space<vmem>>, %arg20: memref<8x128xf32, #tpu.memory_space<vmem>>, %arg21: memref<8x128xf32, #tpu.memory_space<vmem>>, %arg22: memref<8x128xf32, #tpu.memory_space<vmem>>, %arg23: memref<32x512xf32, #tpu.memory_space<vmem>>, %arg24: memref<32x512xf32, #tpu.memory_space<vmem>>, %arg25: memref<32x128xf32, #tpu.memory_space<vmem>>, %arg26: memref<32x128xf32, #tpu.memory_space<vmem>>) attributes {dimension_semantics = [#tpu.dimension_semantics<arbitrary>], iteration_bounds = array<i64: 2>, scalar_prefetch = 0 : i64, scratch_operands = 8 : i64, tpu.core_type = #tpu.core_type<tc>, window_params = [{transform_indices = @transform_0, window_bounds = array<i64: 32, 128>}, {transform_indices = @transform_1, window_bounds = array<i64: 32, 128>}, {transform_indices = @transform_2, window_bounds = array<i64: 32, 128>}, {transform_indices = @transform_3, window_bounds = array<i64: 32, 128>}, {pipeline_mode = #tpu.pipeline_mode<synchronous>, transform_indices = @transform_4, window_bounds = array<i64: 128, 512>}, {pipeline_mode = #tpu.pipeline_mode<synchronous>, transform_indices = @transform_5, window_bounds = array<i64: 128, 512>}, {pipeline_mode = #tpu.pipeline_mode<synchronous>, transform_indices = @transform_6, window_bounds = array<i64: 128, 512>}, {pipeline_mode = #tpu.pipeline_mode<synchronous>, transform_indices = @transform_7, window_bounds = array<i64: 128, 512>}, {pipeline_mode = #tpu.pipeline_mode<synchronous>, transform_indices = @transform_8, window_bounds = array<i64: 128, 512>}, {pipeline_mode = #tpu.pipeline_mode<synchronous>, transform_indices = @transform_9, window_bounds = array<i64: 128, 512>}, {pipeline_mode = #tpu.pipeline_mode<synchronous>, transform_indices = @transform_10, window_bounds = array<i64: 1, 512>}, {pipeline_mode = #tpu.pipeline_mode<synchronous>, transform_indices = @transform_11, window_bounds = array<i64: 1, 512>}, {pipeline_mode = #tpu.pipeline_mode<synchronous>, transform_indices = @transform_12, window_bounds = array<i64: 128, 128>}, {pipeline_mode = #tpu.pipeline_mode<synchronous>, transform_indices = @transform_13, window_bounds = array<i64: 128, 128>}, {pipeline_mode = #tpu.pipeline_mode<synchronous>, transform_indices = @transform_14, window_bounds = array<i64: 1, 128>}, {transform_indices = @transform_15, window_bounds = array<i64: 32, 128>}, {transform_indices = @transform_16, window_bounds = array<i64: 32, 128>}, {pipeline_mode = #tpu.pipeline_mode<synchronous>, transform_indices = @transform_17, window_bounds = array<i64: 2, 8, 128>}]} {
    %c0_i32 = arith.constant 0 : i32
    %0 = arith.cmpi eq, %arg0, %c0_i32 : i32
    %1 = arith.extui %0 : i1 to i32
    %c0_i32_0 = arith.constant 0 : i32
    %2 = arith.cmpi ne, %1, %c0_i32_0 : i32
    scf.if %2 {
      %cst_117 = arith.constant 0.000000e+00 : f32
      %318 = vector.broadcast %cst_117 : f32 to vector<8x128xf32>
      %c0_118 = arith.constant 0 : index
      %c0_119 = arith.constant 0 : index
      %319 = vector.load %arg19[%c0_118, %c0_119] : memref<8x128xf32, #tpu.memory_space<vmem>>, vector<8x128xf32>
      tpu.vector_store %arg19[%c0_118, %c0_119], %318 {strides = array<i32>} : memref<8x128xf32, #tpu.memory_space<vmem>>, vector<8x128xf32>,
      %c0_120 = arith.constant 0 : index
      %c0_121 = arith.constant 0 : index
      %320 = vector.load %arg20[%c0_120, %c0_121] : memref<8x128xf32, #tpu.memory_space<vmem>>, vector<8x128xf32>
      tpu.vector_store %arg20[%c0_120, %c0_121], %318 {strides = array<i32>} : memref<8x128xf32, #tpu.memory_space<vmem>>, vector<8x128xf32>,
      %c0_122 = arith.constant 0 : index
      %c0_123 = arith.constant 0 : index
      %321 = vector.load %arg21[%c0_122, %c0_123] : memref<8x128xf32, #tpu.memory_space<vmem>>, vector<8x128xf32>
      tpu.vector_store %arg21[%c0_122, %c0_123], %318 {strides = array<i32>} : memref<8x128xf32, #tpu.memory_space<vmem>>, vector<8x128xf32>,
      %c0_124 = arith.constant 0 : index
      %c0_125 = arith.constant 0 : index
      %322 = vector.load %arg22[%c0_124, %c0_125] : memref<8x128xf32, #tpu.memory_space<vmem>>, vector<8x128xf32>
      tpu.vector_store %arg22[%c0_124, %c0_125], %318 {strides = array<i32>} : memref<8x128xf32, #tpu.memory_space<vmem>>, vector<8x128xf32>,
    } else {
    }
    %c0 = arith.constant 0 : index
    %c0_1 = arith.constant 0 : index
    %3 = vector.load %arg11[%c0, %c0_1] : memref<1x512xf32, #tpu.memory_space<vmem>>, vector<1x512xf32>
    %c0_2 = arith.constant 0 : index
    %c0_3 = arith.constant 0 : index
    %4 = vector.load %arg12[%c0_2, %c0_3] : memref<1x512xf32, #tpu.memory_space<vmem>>, vector<1x512xf32>
    %c0_4 = arith.constant 0 : index
    %c0_5 = arith.constant 0 : index
    %5 = vector.load %arg1[%c0_4, %c0_5] : memref<32x128xbf16, #tpu.memory_space<vmem>>, vector<32x128xbf16>
    %c0_6 = arith.constant 0 : index
    %c0_7 = arith.constant 0 : index
    %6 = vector.load %arg5[%c0_6, %c0_7] : memref<128x512xbf16, #tpu.memory_space<vmem>>, vector<128x512xbf16>
    %cst = arith.constant dense<0.000000e+00> : vector<32x512xf32>
    %7 = tpu.matmul %5, %6, %cst {dimension_numbers = #tpu.dot_dimension_numbers<[1], [0], [0], [1], [0, 0, 1, 1], [], []>} : vector<32x128xbf16>, vector<128x512xbf16>, vector<32x512xf32> -> vector<32x512xf32>
    %8 = vector.broadcast %3 : vector<1x512xf32> to vector<32x512xf32>
    %9 = arith.addf %8, %7 : vector<32x512xf32>
    %c0_8 = arith.constant 0 : index
    %c0_9 = arith.constant 0 : index
    %10 = vector.load %arg3[%c0_8, %c0_9] : memref<32x128xbf16, #tpu.memory_space<vmem>>, vector<32x128xbf16>
    %c0_10 = arith.constant 0 : index
    %c0_11 = arith.constant 0 : index
    %11 = vector.load %arg7[%c0_10, %c0_11] : memref<128x512xbf16, #tpu.memory_space<vmem>>, vector<128x512xbf16>
    %cst_12 = arith.constant dense<0.000000e+00> : vector<32x512xf32>
    %12 = tpu.matmul %10, %11, %cst_12 {dimension_numbers = #tpu.dot_dimension_numbers<[1], [0], [0], [1], [0, 0, 1, 1], [], []>} : vector<32x128xbf16>, vector<128x512xbf16>, vector<32x512xf32> -> vector<32x512xf32>
    %13 = vector.broadcast %4 : vector<1x512xf32> to vector<32x512xf32>
    %14 = arith.addf %13, %12 : vector<32x512xf32>
    %c0_13 = arith.constant 0 : index
    %c0_14 = arith.constant 0 : index
    %15 = vector.load %arg2[%c0_13, %c0_14] : memref<32x128xbf16, #tpu.memory_space<vmem>>, vector<32x128xbf16>
    %c0_15 = arith.constant 0 : index
    %c0_16 = arith.constant 0 : index
    %16 = vector.load %arg6[%c0_15, %c0_16] : memref<128x512xbf16, #tpu.memory_space<vmem>>, vector<128x512xbf16>
    %cst_17 = arith.constant dense<0.000000e+00> : vector<32x512xf32>
    %17 = tpu.matmul %15, %16, %cst_17 {dimension_numbers = #tpu.dot_dimension_numbers<[1], [0], [0], [1], [0, 0, 1, 1], [], []>} : vector<32x128xbf16>, vector<128x512xbf16>, vector<32x512xf32> -> vector<32x512xf32>
    %18 = arith.addf %9, %17 : vector<32x512xf32>
    %c0_18 = arith.constant 0 : index
    %c0_19 = arith.constant 0 : index
    %19 = vector.load %arg4[%c0_18, %c0_19] : memref<32x128xbf16, #tpu.memory_space<vmem>>, vector<32x128xbf16>
    %c0_20 = arith.constant 0 : index
    %c0_21 = arith.constant 0 : index
    %20 = vector.load %arg8[%c0_20, %c0_21] : memref<128x512xbf16, #tpu.memory_space<vmem>>, vector<128x512xbf16>
    %cst_22 = arith.constant dense<0.000000e+00> : vector<32x512xf32>
    %21 = tpu.matmul %19, %20, %cst_22 {dimension_numbers = #tpu.dot_dimension_numbers<[1], [0], [0], [1], [0, 0, 1, 1], [], []>} : vector<32x128xbf16>, vector<128x512xbf16>, vector<32x512xf32> -> vector<32x512xf32>
    %22 = arith.addf %14, %21 : vector<32x512xf32>
    %c0_23 = arith.constant 0 : index
    %c0_24 = arith.constant 0 : index
    %23 = vector.load %arg23[%c0_23, %c0_24] : memref<32x512xf32, #tpu.memory_space<vmem>>, vector<32x512xf32>
    tpu.vector_store %arg23[%c0_23, %c0_24], %18 {strides = array<i32>} : memref<32x512xf32, #tpu.memory_space<vmem>>, vector<32x512xf32>,
    %c0_25 = arith.constant 0 : index
    %c0_26 = arith.constant 0 : index
    %24 = vector.load %arg24[%c0_25, %c0_26] : memref<32x512xf32, #tpu.memory_space<vmem>>, vector<32x512xf32>
    tpu.vector_store %arg24[%c0_25, %c0_26], %22 {strides = array<i32>} : memref<32x512xf32, #tpu.memory_space<vmem>>, vector<32x512xf32>,
    %c0_27 = arith.constant 0 : index
    %c0_28 = arith.constant 0 : index
    %25 = vector.load %arg9[%c0_27, %c0_28] : memref<128x512xbf16, #tpu.memory_space<vmem>>, vector<128x512xbf16>
    %c0_29 = arith.constant 0 : index
    %c0_30 = arith.constant 0 : index
    %26 = vector.load %arg10[%c0_29, %c0_30] : memref<128x512xbf16, #tpu.memory_space<vmem>>, vector<128x512xbf16>
    %c0_31 = arith.constant 0 : index
    %c0_32 = arith.constant 0 : index
    %27 = vector.load %arg19[%c0_31, %c0_32] : memref<8x128xf32, #tpu.memory_space<vmem>>, vector<8x128xf32>
    %c0_33 = arith.constant 0 : index
    %c0_34 = arith.constant 0 : index
    %28 = vector.load %arg20[%c0_33, %c0_34] : memref<8x128xf32, #tpu.memory_space<vmem>>, vector<8x128xf32>
    %c0_35 = arith.constant 0 : index
    %c0_36 = arith.constant 0 : index
    %29 = vector.load %arg21[%c0_35, %c0_36] : memref<8x128xf32, #tpu.memory_space<vmem>>, vector<8x128xf32>
    %c0_37 = arith.constant 0 : index
    %c0_38 = arith.constant 0 : index
    %30 = vector.load %arg22[%c0_37, %c0_38] : memref<8x128xf32, #tpu.memory_space<vmem>>, vector<8x128xf32>
    %c0_i32_39 = arith.constant 0 : i32
    %c8_i32 = arith.constant 8 : i32
    %31 = arith.muli %c0_i32_39, %c8_i32 : i32
    %32 = tpu.assume_multiple %31, 8 : i32
    %c3_i32 = arith.constant 3 : i32
    %33 = arith.subi %c3_i32, %c0_i32_39 : i32
    %c8_i32_40 = arith.constant 8 : i32
    %34 = arith.muli %33, %c8_i32_40 : i32
    %35 = tpu.assume_multiple %34, 8 : i32
    %36 = arith.index_cast %32 : i32 to index
    %c0_41 = arith.constant 0 : index
    %37 = vector.load %arg23[%36, %c0_41] : memref<32x512xf32, #tpu.memory_space<vmem>>, vector<8x512xf32>
    %38 = arith.truncf %27 : vector<8x128xf32> to vector<8x128xbf16>
    %cst_42 = arith.constant dense<0.000000e+00> : vector<8x512xf32>
    %39 = tpu.matmul %38, %25, %cst_42 {dimension_numbers = #tpu.dot_dimension_numbers<[1], [0], [0], [1], [0, 0, 1, 1], [], []>} : vector<8x128xbf16>, vector<128x512xbf16>, vector<8x512xf32> -> vector<8x512xf32>
    %40 = arith.addf %37, %39 : vector<8x512xf32>
    %41 = arith.index_cast %35 : i32 to index
    %c0_43 = arith.constant 0 : index
    %42 = vector.load %arg24[%41, %c0_43] : memref<32x512xf32, #tpu.memory_space<vmem>>, vector<8x512xf32>
    %43 = arith.truncf %29 : vector<8x128xf32> to vector<8x128xbf16>
    %cst_44 = arith.constant dense<0.000000e+00> : vector<8x512xf32>
    %44 = tpu.matmul %43, %26, %cst_44 {dimension_numbers = #tpu.dot_dimension_numbers<[1], [0], [0], [1], [0, 0, 1, 1], [], []>} : vector<8x128xbf16>, vector<128x512xbf16>, vector<8x512xf32> -> vector<8x512xf32>
    %45 = arith.addf %42, %44 : vector<8x512xf32>
    %46 = vector.extract_strided_slice %40 {offsets = [0, 0], sizes = [8, 128], strides = [1, 1]} : vector<8x512xf32> to vector<8x128xf32>
    %47 = arith.negf %46 : vector<8x128xf32>
    %48 = math.exp %47 : vector<8x128xf32>
    %cst_45 = arith.constant 1.000000e+00 : f32
    %49 = vector.broadcast %cst_45 : f32 to vector<8x128xf32>
    %50 = arith.addf %49, %48 : vector<8x128xf32>
    %51 = arith.divf %49, %50 : vector<8x128xf32>
    %52 = vector.extract_strided_slice %40 {offsets = [0, 128], sizes = [8, 128], strides = [1, 1]} : vector<8x512xf32> to vector<8x128xf32>
    %53 = arith.negf %52 : vector<8x128xf32>
    %54 = math.exp %53 : vector<8x128xf32>
    %cst_46 = arith.constant 1.000000e+00 : f32
    %55 = vector.broadcast %cst_46 : f32 to vector<8x128xf32>
    %56 = arith.addf %55, %54 : vector<8x128xf32>
    %57 = arith.divf %55, %56 : vector<8x128xf32>
    %58 = vector.extract_strided_slice %40 {offsets = [0, 256], sizes = [8, 128], strides = [1, 1]} : vector<8x512xf32> to vector<8x128xf32>
    %59 = math.tanh %58 : vector<8x128xf32>
    %60 = vector.extract_strided_slice %40 {offsets = [0, 384], sizes = [8, 128], strides = [1, 1]} : vector<8x512xf32> to vector<8x128xf32>
    %61 = arith.negf %60 : vector<8x128xf32>
    %62 = math.exp %61 : vector<8x128xf32>
    %cst_47 = arith.constant 1.000000e+00 : f32
    %63 = vector.broadcast %cst_47 : f32 to vector<8x128xf32>
    %64 = arith.addf %63, %62 : vector<8x128xf32>
    %65 = arith.divf %63, %64 : vector<8x128xf32>
    %66 = arith.mulf %57, %28 : vector<8x128xf32>
    %67 = arith.mulf %51, %59 : vector<8x128xf32>
    %68 = arith.addf %66, %67 : vector<8x128xf32>
    %69 = math.tanh %68 : vector<8x128xf32>
    %70 = arith.mulf %65, %69 : vector<8x128xf32>
    %71 = vector.extract_strided_slice %45 {offsets = [0, 0], sizes = [8, 128], strides = [1, 1]} : vector<8x512xf32> to vector<8x128xf32>
    %72 = arith.negf %71 : vector<8x128xf32>
    %73 = math.exp %72 : vector<8x128xf32>
    %cst_48 = arith.constant 1.000000e+00 : f32
    %74 = vector.broadcast %cst_48 : f32 to vector<8x128xf32>
    %75 = arith.addf %74, %73 : vector<8x128xf32>
    %76 = arith.divf %74, %75 : vector<8x128xf32>
    %77 = vector.extract_strided_slice %45 {offsets = [0, 128], sizes = [8, 128], strides = [1, 1]} : vector<8x512xf32> to vector<8x128xf32>
    %78 = arith.negf %77 : vector<8x128xf32>
    %79 = math.exp %78 : vector<8x128xf32>
    %cst_49 = arith.constant 1.000000e+00 : f32
    %80 = vector.broadcast %cst_49 : f32 to vector<8x128xf32>
    %81 = arith.addf %80, %79 : vector<8x128xf32>
    %82 = arith.divf %80, %81 : vector<8x128xf32>
    %83 = vector.extract_strided_slice %45 {offsets = [0, 256], sizes = [8, 128], strides = [1, 1]} : vector<8x512xf32> to vector<8x128xf32>
    %84 = math.tanh %83 : vector<8x128xf32>
    %85 = vector.extract_strided_slice %45 {offsets = [0, 384], sizes = [8, 128], strides = [1, 1]} : vector<8x512xf32> to vector<8x128xf32>
    %86 = arith.negf %85 : vector<8x128xf32>
    %87 = math.exp %86 : vector<8x128xf32>
    %cst_50 = arith.constant 1.000000e+00 : f32
    %88 = vector.broadcast %cst_50 : f32 to vector<8x128xf32>
    %89 = arith.addf %88, %87 : vector<8x128xf32>
    %90 = arith.divf %88, %89 : vector<8x128xf32>
    %91 = arith.mulf %82, %30 : vector<8x128xf32>
    %92 = arith.mulf %76, %84 : vector<8x128xf32>
    %93 = arith.addf %91, %92 : vector<8x128xf32>
    %94 = math.tanh %93 : vector<8x128xf32>
    %95 = arith.mulf %90, %94 : vector<8x128xf32>
    %96 = arith.index_cast %32 : i32 to index
    %c0_51 = arith.constant 0 : index
    %97 = vector.load %arg25[%96, %c0_51] : memref<32x128xf32, #tpu.memory_space<vmem>>, vector<8x128xf32>
    tpu.vector_store %arg25[%96, %c0_51], %70 {strides = array<i32>} : memref<32x128xf32, #tpu.memory_space<vmem>>, vector<8x128xf32>,
    %98 = arith.index_cast %35 : i32 to index
    %c0_52 = arith.constant 0 : index
    %99 = vector.load %arg26[%98, %c0_52] : memref<32x128xf32, #tpu.memory_space<vmem>>, vector<8x128xf32>
    tpu.vector_store %arg26[%98, %c0_52], %95 {strides = array<i32>} : memref<32x128xf32, #tpu.memory_space<vmem>>, vector<8x128xf32>,
    %c1_i32 = arith.constant 1 : i32
    %c8_i32_53 = arith.constant 8 : i32
    %100 = arith.muli %c1_i32, %c8_i32_53 : i32
    %101 = tpu.assume_multiple %100, 8 : i32
    %c3_i32_54 = arith.constant 3 : i32
    %102 = arith.subi %c3_i32_54, %c1_i32 : i32
    %c8_i32_55 = arith.constant 8 : i32
    %103 = arith.muli %102, %c8_i32_55 : i32
    %104 = tpu.assume_multiple %103, 8 : i32
    %105 = arith.index_cast %101 : i32 to index
    %c0_56 = arith.constant 0 : index
    %106 = vector.load %arg23[%105, %c0_56] : memref<32x512xf32, #tpu.memory_space<vmem>>, vector<8x512xf32>
    %107 = arith.truncf %70 : vector<8x128xf32> to vector<8x128xbf16>
    %cst_57 = arith.constant dense<0.000000e+00> : vector<8x512xf32>
    %108 = tpu.matmul %107, %25, %cst_57 {dimension_numbers = #tpu.dot_dimension_numbers<[1], [0], [0], [1], [0, 0, 1, 1], [], []>} : vector<8x128xbf16>, vector<128x512xbf16>, vector<8x512xf32> -> vector<8x512xf32>
    %109 = arith.addf %106, %108 : vector<8x512xf32>
    %110 = arith.index_cast %104 : i32 to index
    %c0_58 = arith.constant 0 : index
    %111 = vector.load %arg24[%110, %c0_58] : memref<32x512xf32, #tpu.memory_space<vmem>>, vector<8x512xf32>
    %112 = arith.truncf %95 : vector<8x128xf32> to vector<8x128xbf16>
    %cst_59 = arith.constant dense<0.000000e+00> : vector<8x512xf32>
    %113 = tpu.matmul %112, %26, %cst_59 {dimension_numbers = #tpu.dot_dimension_numbers<[1], [0], [0], [1], [0, 0, 1, 1], [], []>} : vector<8x128xbf16>, vector<128x512xbf16>, vector<8x512xf32> -> vector<8x512xf32>
    %114 = arith.addf %111, %113 : vector<8x512xf32>
    %115 = vector.extract_strided_slice %109 {offsets = [0, 0], sizes = [8, 128], strides = [1, 1]} : vector<8x512xf32> to vector<8x128xf32>
    %116 = arith.negf %115 : vector<8x128xf32>
    %117 = math.exp %116 : vector<8x128xf32>
    %cst_60 = arith.constant 1.000000e+00 : f32
    %118 = vector.broadcast %cst_60 : f32 to vector<8x128xf32>
    %119 = arith.addf %118, %117 : vector<8x128xf32>
    %120 = arith.divf %118, %119 : vector<8x128xf32>
    %121 = vector.extract_strided_slice %109 {offsets = [0, 128], sizes = [8, 128], strides = [1, 1]} : vector<8x512xf32> to vector<8x128xf32>
    %122 = arith.negf %121 : vector<8x128xf32>
    %123 = math.exp %122 : vector<8x128xf32>
    %cst_61 = arith.constant 1.000000e+00 : f32
    %124 = vector.broadcast %cst_61 : f32 to vector<8x128xf32>
    %125 = arith.addf %124, %123 : vector<8x128xf32>
    %126 = arith.divf %124, %125 : vector<8x128xf32>
    %127 = vector.extract_strided_slice %109 {offsets = [0, 256], sizes = [8, 128], strides = [1, 1]} : vector<8x512xf32> to vector<8x128xf32>
    %128 = math.tanh %127 : vector<8x128xf32>
    %129 = vector.extract_strided_slice %109 {offsets = [0, 384], sizes = [8, 128], strides = [1, 1]} : vector<8x512xf32> to vector<8x128xf32>
    %130 = arith.negf %129 : vector<8x128xf32>
    %131 = math.exp %130 : vector<8x128xf32>
    %cst_62 = arith.constant 1.000000e+00 : f32
    %132 = vector.broadcast %cst_62 : f32 to vector<8x128xf32>
    %133 = arith.addf %132, %131 : vector<8x128xf32>
    %134 = arith.divf %132, %133 : vector<8x128xf32>
    %135 = arith.mulf %126, %68 : vector<8x128xf32>
    %136 = arith.mulf %120, %128 : vector<8x128xf32>
    %137 = arith.addf %135, %136 : vector<8x128xf32>
    %138 = math.tanh %137 : vector<8x128xf32>
    %139 = arith.mulf %134, %138 : vector<8x128xf32>
    %140 = vector.extract_strided_slice %114 {offsets = [0, 0], sizes = [8, 128], strides = [1, 1]} : vector<8x512xf32> to vector<8x128xf32>
    %141 = arith.negf %140 : vector<8x128xf32>
    %142 = math.exp %141 : vector<8x128xf32>
    %cst_63 = arith.constant 1.000000e+00 : f32
    %143 = vector.broadcast %cst_63 : f32 to vector<8x128xf32>
    %144 = arith.addf %143, %142 : vector<8x128xf32>
    %145 = arith.divf %143, %144 : vector<8x128xf32>
    %146 = vector.extract_strided_slice %114 {offsets = [0, 128], sizes = [8, 128], strides = [1, 1]} : vector<8x512xf32> to vector<8x128xf32>
    %147 = arith.negf %146 : vector<8x128xf32>
    %148 = math.exp %147 : vector<8x128xf32>
    %cst_64 = arith.constant 1.000000e+00 : f32
    %149 = vector.broadcast %cst_64 : f32 to vector<8x128xf32>
    %150 = arith.addf %149, %148 : vector<8x128xf32>
    %151 = arith.divf %149, %150 : vector<8x128xf32>
    %152 = vector.extract_strided_slice %114 {offsets = [0, 256], sizes = [8, 128], strides = [1, 1]} : vector<8x512xf32> to vector<8x128xf32>
    %153 = math.tanh %152 : vector<8x128xf32>
    %154 = vector.extract_strided_slice %114 {offsets = [0, 384], sizes = [8, 128], strides = [1, 1]} : vector<8x512xf32> to vector<8x128xf32>
    %155 = arith.negf %154 : vector<8x128xf32>
    %156 = math.exp %155 : vector<8x128xf32>
    %cst_65 = arith.constant 1.000000e+00 : f32
    %157 = vector.broadcast %cst_65 : f32 to vector<8x128xf32>
    %158 = arith.addf %157, %156 : vector<8x128xf32>
    %159 = arith.divf %157, %158 : vector<8x128xf32>
    %160 = arith.mulf %151, %93 : vector<8x128xf32>
    %161 = arith.mulf %145, %153 : vector<8x128xf32>
    %162 = arith.addf %160, %161 : vector<8x128xf32>
    %163 = math.tanh %162 : vector<8x128xf32>
    %164 = arith.mulf %159, %163 : vector<8x128xf32>
    %165 = arith.index_cast %101 : i32 to index
    %c0_66 = arith.constant 0 : index
    %166 = vector.load %arg25[%165, %c0_66] : memref<32x128xf32, #tpu.memory_space<vmem>>, vector<8x128xf32>
    tpu.vector_store %arg25[%165, %c0_66], %139 {strides = array<i32>} : memref<32x128xf32, #tpu.memory_space<vmem>>, vector<8x128xf32>,
    %167 = arith.index_cast %104 : i32 to index
    %c0_67 = arith.constant 0 : index
    %168 = vector.load %arg26[%167, %c0_67] : memref<32x128xf32, #tpu.memory_space<vmem>>, vector<8x128xf32>
    tpu.vector_store %arg26[%167, %c0_67], %164 {strides = array<i32>} : memref<32x128xf32, #tpu.memory_space<vmem>>, vector<8x128xf32>,
    %c2_i32 = arith.constant 2 : i32
    %c8_i32_68 = arith.constant 8 : i32
    %169 = arith.muli %c2_i32, %c8_i32_68 : i32
    %170 = tpu.assume_multiple %169, 8 : i32
    %c3_i32_69 = arith.constant 3 : i32
    %171 = arith.subi %c3_i32_69, %c2_i32 : i32
    %c8_i32_70 = arith.constant 8 : i32
    %172 = arith.muli %171, %c8_i32_70 : i32
    %173 = tpu.assume_multiple %172, 8 : i32
    %174 = arith.index_cast %170 : i32 to index
    %c0_71 = arith.constant 0 : index
    %175 = vector.load %arg23[%174, %c0_71] : memref<32x512xf32, #tpu.memory_space<vmem>>, vector<8x512xf32>
    %176 = arith.truncf %139 : vector<8x128xf32> to vector<8x128xbf16>
    %cst_72 = arith.constant dense<0.000000e+00> : vector<8x512xf32>
    %177 = tpu.matmul %176, %25, %cst_72 {dimension_numbers = #tpu.dot_dimension_numbers<[1], [0], [0], [1], [0, 0, 1, 1], [], []>} : vector<8x128xbf16>, vector<128x512xbf16>, vector<8x512xf32> -> vector<8x512xf32>
    %178 = arith.addf %175, %177 : vector<8x512xf32>
    %179 = arith.index_cast %173 : i32 to index
    %c0_73 = arith.constant 0 : index
    %180 = vector.load %arg24[%179, %c0_73] : memref<32x512xf32, #tpu.memory_space<vmem>>, vector<8x512xf32>
    %181 = arith.truncf %164 : vector<8x128xf32> to vector<8x128xbf16>
    %cst_74 = arith.constant dense<0.000000e+00> : vector<8x512xf32>
    %182 = tpu.matmul %181, %26, %cst_74 {dimension_numbers = #tpu.dot_dimension_numbers<[1], [0], [0], [1], [0, 0, 1, 1], [], []>} : vector<8x128xbf16>, vector<128x512xbf16>, vector<8x512xf32> -> vector<8x512xf32>
    %183 = arith.addf %180, %182 : vector<8x512xf32>
    %184 = vector.extract_strided_slice %178 {offsets = [0, 0], sizes = [8, 128], strides = [1, 1]} : vector<8x512xf32> to vector<8x128xf32>
    %185 = arith.negf %184 : vector<8x128xf32>
    %186 = math.exp %185 : vector<8x128xf32>
    %cst_75 = arith.constant 1.000000e+00 : f32
    %187 = vector.broadcast %cst_75 : f32 to vector<8x128xf32>
    %188 = arith.addf %187, %186 : vector<8x128xf32>
    %189 = arith.divf %187, %188 : vector<8x128xf32>
    %190 = vector.extract_strided_slice %178 {offsets = [0, 128], sizes = [8, 128], strides = [1, 1]} : vector<8x512xf32> to vector<8x128xf32>
    %191 = arith.negf %190 : vector<8x128xf32>
    %192 = math.exp %191 : vector<8x128xf32>
    %cst_76 = arith.constant 1.000000e+00 : f32
    %193 = vector.broadcast %cst_76 : f32 to vector<8x128xf32>
    %194 = arith.addf %193, %192 : vector<8x128xf32>
    %195 = arith.divf %193, %194 : vector<8x128xf32>
    %196 = vector.extract_strided_slice %178 {offsets = [0, 256], sizes = [8, 128], strides = [1, 1]} : vector<8x512xf32> to vector<8x128xf32>
    %197 = math.tanh %196 : vector<8x128xf32>
    %198 = vector.extract_strided_slice %178 {offsets = [0, 384], sizes = [8, 128], strides = [1, 1]} : vector<8x512xf32> to vector<8x128xf32>
    %199 = arith.negf %198 : vector<8x128xf32>
    %200 = math.exp %199 : vector<8x128xf32>
    %cst_77 = arith.constant 1.000000e+00 : f32
    %201 = vector.broadcast %cst_77 : f32 to vector<8x128xf32>
    %202 = arith.addf %201, %200 : vector<8x128xf32>
    %203 = arith.divf %201, %202 : vector<8x128xf32>
    %204 = arith.mulf %195, %137 : vector<8x128xf32>
    %205 = arith.mulf %189, %197 : vector<8x128xf32>
    %206 = arith.addf %204, %205 : vector<8x128xf32>
    %207 = math.tanh %206 : vector<8x128xf32>
    %208 = arith.mulf %203, %207 : vector<8x128xf32>
    %209 = vector.extract_strided_slice %183 {offsets = [0, 0], sizes = [8, 128], strides = [1, 1]} : vector<8x512xf32> to vector<8x128xf32>
    %210 = arith.negf %209 : vector<8x128xf32>
    %211 = math.exp %210 : vector<8x128xf32>
    %cst_78 = arith.constant 1.000000e+00 : f32
    %212 = vector.broadcast %cst_78 : f32 to vector<8x128xf32>
    %213 = arith.addf %212, %211 : vector<8x128xf32>
    %214 = arith.divf %212, %213 : vector<8x128xf32>
    %215 = vector.extract_strided_slice %183 {offsets = [0, 128], sizes = [8, 128], strides = [1, 1]} : vector<8x512xf32> to vector<8x128xf32>
    %216 = arith.negf %215 : vector<8x128xf32>
    %217 = math.exp %216 : vector<8x128xf32>
    %cst_79 = arith.constant 1.000000e+00 : f32
    %218 = vector.broadcast %cst_79 : f32 to vector<8x128xf32>
    %219 = arith.addf %218, %217 : vector<8x128xf32>
    %220 = arith.divf %218, %219 : vector<8x128xf32>
    %221 = vector.extract_strided_slice %183 {offsets = [0, 256], sizes = [8, 128], strides = [1, 1]} : vector<8x512xf32> to vector<8x128xf32>
    %222 = math.tanh %221 : vector<8x128xf32>
    %223 = vector.extract_strided_slice %183 {offsets = [0, 384], sizes = [8, 128], strides = [1, 1]} : vector<8x512xf32> to vector<8x128xf32>
    %224 = arith.negf %223 : vector<8x128xf32>
    %225 = math.exp %224 : vector<8x128xf32>
    %cst_80 = arith.constant 1.000000e+00 : f32
    %226 = vector.broadcast %cst_80 : f32 to vector<8x128xf32>
    %227 = arith.addf %226, %225 : vector<8x128xf32>
    %228 = arith.divf %226, %227 : vector<8x128xf32>
    %229 = arith.mulf %220, %162 : vector<8x128xf32>
    %230 = arith.mulf %214, %222 : vector<8x128xf32>
    %231 = arith.addf %229, %230 : vector<8x128xf32>
    %232 = math.tanh %231 : vector<8x128xf32>
    %233 = arith.mulf %228, %232 : vector<8x128xf32>
    %234 = arith.index_cast %170 : i32 to index
    %c0_81 = arith.constant 0 : index
    %235 = vector.load %arg25[%234, %c0_81] : memref<32x128xf32, #tpu.memory_space<vmem>>, vector<8x128xf32>
    tpu.vector_store %arg25[%234, %c0_81], %208 {strides = array<i32>} : memref<32x128xf32, #tpu.memory_space<vmem>>, vector<8x128xf32>,
    %236 = arith.index_cast %173 : i32 to index
    %c0_82 = arith.constant 0 : index
    %237 = vector.load %arg26[%236, %c0_82] : memref<32x128xf32, #tpu.memory_space<vmem>>, vector<8x128xf32>
    tpu.vector_store %arg26[%236, %c0_82], %233 {strides = array<i32>} : memref<32x128xf32, #tpu.memory_space<vmem>>, vector<8x128xf32>,
    %c3_i32_83 = arith.constant 3 : i32
    %c8_i32_84 = arith.constant 8 : i32
    %238 = arith.muli %c3_i32_83, %c8_i32_84 : i32
    %239 = tpu.assume_multiple %238, 8 : i32
    %c3_i32_85 = arith.constant 3 : i32
    %240 = arith.subi %c3_i32_85, %c3_i32_83 : i32
    %c8_i32_86 = arith.constant 8 : i32
    %241 = arith.muli %240, %c8_i32_86 : i32
    %242 = tpu.assume_multiple %241, 8 : i32
    %243 = arith.index_cast %239 : i32 to index
    %c0_87 = arith.constant 0 : index
    %244 = vector.load %arg23[%243, %c0_87] : memref<32x512xf32, #tpu.memory_space<vmem>>, vector<8x512xf32>
    %245 = arith.truncf %208 : vector<8x128xf32> to vector<8x128xbf16>
    %cst_88 = arith.constant dense<0.000000e+00> : vector<8x512xf32>
    %246 = tpu.matmul %245, %25, %cst_88 {dimension_numbers = #tpu.dot_dimension_numbers<[1], [0], [0], [1], [0, 0, 1, 1], [], []>} : vector<8x128xbf16>, vector<128x512xbf16>, vector<8x512xf32> -> vector<8x512xf32>
    %247 = arith.addf %244, %246 : vector<8x512xf32>
    %248 = arith.index_cast %242 : i32 to index
    %c0_89 = arith.constant 0 : index
    %249 = vector.load %arg24[%248, %c0_89] : memref<32x512xf32, #tpu.memory_space<vmem>>, vector<8x512xf32>
    %250 = arith.truncf %233 : vector<8x128xf32> to vector<8x128xbf16>
    %cst_90 = arith.constant dense<0.000000e+00> : vector<8x512xf32>
    %251 = tpu.matmul %250, %26, %cst_90 {dimension_numbers = #tpu.dot_dimension_numbers<[1], [0], [0], [1], [0, 0, 1, 1], [], []>} : vector<8x128xbf16>, vector<128x512xbf16>, vector<8x512xf32> -> vector<8x512xf32>
    %252 = arith.addf %249, %251 : vector<8x512xf32>
    %253 = vector.extract_strided_slice %247 {offsets = [0, 0], sizes = [8, 128], strides = [1, 1]} : vector<8x512xf32> to vector<8x128xf32>
    %254 = arith.negf %253 : vector<8x128xf32>
    %255 = math.exp %254 : vector<8x128xf32>
    %cst_91 = arith.constant 1.000000e+00 : f32
    %256 = vector.broadcast %cst_91 : f32 to vector<8x128xf32>
    %257 = arith.addf %256, %255 : vector<8x128xf32>
    %258 = arith.divf %256, %257 : vector<8x128xf32>
    %259 = vector.extract_strided_slice %247 {offsets = [0, 128], sizes = [8, 128], strides = [1, 1]} : vector<8x512xf32> to vector<8x128xf32>
    %260 = arith.negf %259 : vector<8x128xf32>
    %261 = math.exp %260 : vector<8x128xf32>
    %cst_92 = arith.constant 1.000000e+00 : f32
    %262 = vector.broadcast %cst_92 : f32 to vector<8x128xf32>
    %263 = arith.addf %262, %261 : vector<8x128xf32>
    %264 = arith.divf %262, %263 : vector<8x128xf32>
    %265 = vector.extract_strided_slice %247 {offsets = [0, 256], sizes = [8, 128], strides = [1, 1]} : vector<8x512xf32> to vector<8x128xf32>
    %266 = math.tanh %265 : vector<8x128xf32>
    %267 = vector.extract_strided_slice %247 {offsets = [0, 384], sizes = [8, 128], strides = [1, 1]} : vector<8x512xf32> to vector<8x128xf32>
    %268 = arith.negf %267 : vector<8x128xf32>
    %269 = math.exp %268 : vector<8x128xf32>
    %cst_93 = arith.constant 1.000000e+00 : f32
    %270 = vector.broadcast %cst_93 : f32 to vector<8x128xf32>
    %271 = arith.addf %270, %269 : vector<8x128xf32>
    %272 = arith.divf %270, %271 : vector<8x128xf32>
    %273 = arith.mulf %264, %206 : vector<8x128xf32>
    %274 = arith.mulf %258, %266 : vector<8x128xf32>
    %275 = arith.addf %273, %274 : vector<8x128xf32>
    %276 = math.tanh %275 : vector<8x128xf32>
    %277 = arith.mulf %272, %276 : vector<8x128xf32>
    %278 = vector.extract_strided_slice %252 {offsets = [0, 0], sizes = [8, 128], strides = [1, 1]} : vector<8x512xf32> to vector<8x128xf32>
    %279 = arith.negf %278 : vector<8x128xf32>
    %280 = math.exp %279 : vector<8x128xf32>
    %cst_94 = arith.constant 1.000000e+00 : f32
    %281 = vector.broadcast %cst_94 : f32 to vector<8x128xf32>
    %282 = arith.addf %281, %280 : vector<8x128xf32>
    %283 = arith.divf %281, %282 : vector<8x128xf32>
    %284 = vector.extract_strided_slice %252 {offsets = [0, 128], sizes = [8, 128], strides = [1, 1]} : vector<8x512xf32> to vector<8x128xf32>
    %285 = arith.negf %284 : vector<8x128xf32>
    %286 = math.exp %285 : vector<8x128xf32>
    %cst_95 = arith.constant 1.000000e+00 : f32
    %287 = vector.broadcast %cst_95 : f32 to vector<8x128xf32>
    %288 = arith.addf %287, %286 : vector<8x128xf32>
    %289 = arith.divf %287, %288 : vector<8x128xf32>
    %290 = vector.extract_strided_slice %252 {offsets = [0, 256], sizes = [8, 128], strides = [1, 1]} : vector<8x512xf32> to vector<8x128xf32>
    %291 = math.tanh %290 : vector<8x128xf32>
    %292 = vector.extract_strided_slice %252 {offsets = [0, 384], sizes = [8, 128], strides = [1, 1]} : vector<8x512xf32> to vector<8x128xf32>
    %293 = arith.negf %292 : vector<8x128xf32>
    %294 = math.exp %293 : vector<8x128xf32>
    %cst_96 = arith.constant 1.000000e+00 : f32
    %295 = vector.broadcast %cst_96 : f32 to vector<8x128xf32>
    %296 = arith.addf %295, %294 : vector<8x128xf32>
    %297 = arith.divf %295, %296 : vector<8x128xf32>
    %298 = arith.mulf %289, %231 : vector<8x128xf32>
    %299 = arith.mulf %283, %291 : vector<8x128xf32>
    %300 = arith.addf %298, %299 : vector<8x128xf32>
    %301 = math.tanh %300 : vector<8x128xf32>
    %302 = arith.mulf %297, %301 : vector<8x128xf32>
    %303 = arith.index_cast %239 : i32 to index
    %c0_97 = arith.constant 0 : index
    %304 = vector.load %arg25[%303, %c0_97] : memref<32x128xf32, #tpu.memory_space<vmem>>, vector<8x128xf32>
    tpu.vector_store %arg25[%303, %c0_97], %277 {strides = array<i32>} : memref<32x128xf32, #tpu.memory_space<vmem>>, vector<8x128xf32>,
    %305 = arith.index_cast %242 : i32 to index
    %c0_98 = arith.constant 0 : index
    %306 = vector.load %arg26[%305, %c0_98] : memref<32x128xf32, #tpu.memory_space<vmem>>, vector<8x128xf32>
    tpu.vector_store %arg26[%305, %c0_98], %302 {strides = array<i32>} : memref<32x128xf32, #tpu.memory_space<vmem>>, vector<8x128xf32>,
    %c4_i32 = arith.constant 4 : i32
    %c0_99 = arith.constant 0 : index
    %c0_100 = arith.constant 0 : index
    %307 = vector.load %arg19[%c0_99, %c0_100] : memref<8x128xf32, #tpu.memory_space<vmem>>, vector<8x128xf32>
    tpu.vector_store %arg19[%c0_99, %c0_100], %277 {strides = array<i32>} : memref<8x128xf32, #tpu.memory_space<vmem>>, vector<8x128xf32>,
    %c0_101 = arith.constant 0 : index
    %c0_102 = arith.constant 0 : index
    %308 = vector.load %arg20[%c0_101, %c0_102] : memref<8x128xf32, #tpu.memory_space<vmem>>, vector<8x128xf32>
    tpu.vector_store %arg20[%c0_101, %c0_102], %275 {strides = array<i32>} : memref<8x128xf32, #tpu.memory_space<vmem>>, vector<8x128xf32>,
    %c0_103 = arith.constant 0 : index
    %c0_104 = arith.constant 0 : index
    %309 = vector.load %arg21[%c0_103, %c0_104] : memref<8x128xf32, #tpu.memory_space<vmem>>, vector<8x128xf32>
    tpu.vector_store %arg21[%c0_103, %c0_104], %302 {strides = array<i32>} : memref<8x128xf32, #tpu.memory_space<vmem>>, vector<8x128xf32>,
    %c0_105 = arith.constant 0 : index
    %c0_106 = arith.constant 0 : index
    %310 = vector.load %arg22[%c0_105, %c0_106] : memref<8x128xf32, #tpu.memory_space<vmem>>, vector<8x128xf32>
    tpu.vector_store %arg22[%c0_105, %c0_106], %300 {strides = array<i32>} : memref<8x128xf32, #tpu.memory_space<vmem>>, vector<8x128xf32>,
    %c0_107 = arith.constant 0 : index
    %c0_108 = arith.constant 0 : index
    %311 = vector.load %arg25[%c0_107, %c0_108] : memref<32x128xf32, #tpu.memory_space<vmem>>, vector<32x128xf32>
    %c0_109 = arith.constant 0 : index
    %c0_110 = arith.constant 0 : index
    %312 = vector.load %arg16[%c0_109, %c0_110] : memref<32x128xf32, #tpu.memory_space<vmem>>, vector<32x128xf32>
    tpu.vector_store %arg16[%c0_109, %c0_110], %311 {strides = array<i32>} : memref<32x128xf32, #tpu.memory_space<vmem>>, vector<32x128xf32>,
    %c0_111 = arith.constant 0 : index
    %c0_112 = arith.constant 0 : index
    %313 = vector.load %arg26[%c0_111, %c0_112] : memref<32x128xf32, #tpu.memory_space<vmem>>, vector<32x128xf32>
    %c0_113 = arith.constant 0 : index
    %c0_114 = arith.constant 0 : index
    %314 = vector.load %arg17[%c0_113, %c0_114] : memref<32x128xf32, #tpu.memory_space<vmem>>, vector<32x128xf32>
    tpu.vector_store %arg17[%c0_113, %c0_114], %313 {strides = array<i32>} : memref<32x128xf32, #tpu.memory_space<vmem>>, vector<32x128xf32>,
    %c1_i32_115 = arith.constant 1 : i32
    %315 = arith.cmpi eq, %arg0, %c1_i32_115 : i32
    %316 = arith.extui %315 : i1 to i32
    %c0_i32_116 = arith.constant 0 : i32
    %317 = arith.cmpi ne, %316, %c0_i32_116 : i32
    scf.if %317 {
      %c0_117 = arith.constant 0 : index
      %c0_118 = arith.constant 0 : index
      %318 = vector.load %arg13[%c0_117, %c0_118] : memref<128x128xbf16, #tpu.memory_space<vmem>>, vector<128x128xbf16>
      %c0_119 = arith.constant 0 : index
      %c0_120 = arith.constant 0 : index
      %319 = vector.load %arg14[%c0_119, %c0_120] : memref<128x128xbf16, #tpu.memory_space<vmem>>, vector<128x128xbf16>
      %c0_121 = arith.constant 0 : index
      %c0_122 = arith.constant 0 : index
      %320 = vector.load %arg15[%c0_121, %c0_122] : memref<1x128xf32, #tpu.memory_space<vmem>>, vector<1x128xf32>
      %321 = arith.truncf %277 : vector<8x128xf32> to vector<8x128xbf16>
      %cst_123 = arith.constant dense<0.000000e+00> : vector<8x128xf32>
      %322 = tpu.matmul %321, %318, %cst_123 {dimension_numbers = #tpu.dot_dimension_numbers<[1], [0], [0], [1], [0, 0, 1, 1], [], []>} : vector<8x128xbf16>, vector<128x128xbf16>, vector<8x128xf32> -> vector<8x128xf32>
      %323 = arith.truncf %302 : vector<8x128xf32> to vector<8x128xbf16>
      %cst_124 = arith.constant dense<0.000000e+00> : vector<8x128xf32>
      %324 = tpu.matmul %323, %319, %cst_124 {dimension_numbers = #tpu.dot_dimension_numbers<[1], [0], [0], [1], [0, 0, 1, 1], [], []>} : vector<8x128xbf16>, vector<128x128xbf16>, vector<8x128xf32> -> vector<8x128xf32>
      %325 = arith.addf %322, %324 : vector<8x128xf32>
      %326 = vector.broadcast %320 : vector<1x128xf32> to vector<8x128xf32>
      %327 = arith.addf %325, %326 : vector<8x128xf32>
      %328 = arith.truncf %275 : vector<8x128xf32> to vector<8x128xbf16>
      %cst_125 = arith.constant dense<0.000000e+00> : vector<8x128xf32>
      %329 = tpu.matmul %328, %318, %cst_125 {dimension_numbers = #tpu.dot_dimension_numbers<[1], [0], [0], [1], [0, 0, 1, 1], [], []>} : vector<8x128xbf16>, vector<128x128xbf16>, vector<8x128xf32> -> vector<8x128xf32>
      %330 = arith.truncf %300 : vector<8x128xf32> to vector<8x128xbf16>
      %cst_126 = arith.constant dense<0.000000e+00> : vector<8x128xf32>
      %331 = tpu.matmul %330, %319, %cst_126 {dimension_numbers = #tpu.dot_dimension_numbers<[1], [0], [0], [1], [0, 0, 1, 1], [], []>} : vector<8x128xbf16>, vector<128x128xbf16>, vector<8x128xf32> -> vector<8x128xf32>
      %332 = arith.addf %329, %331 : vector<8x128xf32>
      %333 = vector.broadcast %320 : vector<1x128xf32> to vector<8x128xf32>
      %334 = arith.addf %332, %333 : vector<8x128xf32>
      %c0_127 = arith.constant 0 : index
      %c0_128 = arith.constant 0 : index
      %c0_129 = arith.constant 0 : index
      %335 = vector.load %arg18[%c0_127, %c0_128, %c0_129] : memref<2x8x128xf32, #tpu.memory_space<vmem>>, vector<1x8x128xf32>
      %336 = vector.shape_cast %335 : vector<1x8x128xf32> to vector<8x128xf32>
      %337 = vector.shape_cast %327 : vector<8x128xf32> to vector<1x8x128xf32>
      tpu.vector_store %arg18[%c0_127, %c0_128, %c0_129], %337 {strides = array<i32>} : memref<2x8x128xf32, #tpu.memory_space<vmem>>, vector<1x8x128xf32>,
      %c1 = arith.constant 1 : index
      %c0_130 = arith.constant 0 : index
      %c0_131 = arith.constant 0 : index
      %338 = vector.load %arg18[%c1, %c0_130, %c0_131] : memref<2x8x128xf32, #tpu.memory_space<vmem>>, vector<1x8x128xf32>
      %339 = vector.shape_cast %338 : vector<1x8x128xf32> to vector<8x128xf32>
      %340 = vector.shape_cast %334 : vector<8x128xf32> to vector<1x8x128xf32>
      tpu.vector_store %arg18[%c1, %c0_130, %c0_131], %340 {strides = array<i32>} : memref<2x8x128xf32, #tpu.memory_space<vmem>>, vector<1x8x128xf32>,
    } else {
    }
    return
  }
  func.func @transform_0(%arg0: i32) -> (i32, i32) {
    %c0_i32 = arith.constant 0 : i32
    %c0_i32_0 = arith.constant 0 : i32
    return %arg0, %c0_i32 : i32, i32
  }
  func.func @transform_1(%arg0: i32) -> (i32, i32) {
    %c0_i32 = arith.constant 0 : i32
    %c0_i32_0 = arith.constant 0 : i32
    return %arg0, %c0_i32 : i32, i32
  }
  func.func @transform_2(%arg0: i32) -> (i32, i32) {
    %c1_i32 = arith.constant 1 : i32
    %0 = arith.subi %c1_i32, %arg0 : i32
    %c0_i32 = arith.constant 0 : i32
    %c0_i32_0 = arith.constant 0 : i32
    return %0, %c0_i32 : i32, i32
  }
  func.func @transform_3(%arg0: i32) -> (i32, i32) {
    %c1_i32 = arith.constant 1 : i32
    %0 = arith.subi %c1_i32, %arg0 : i32
    %c0_i32 = arith.constant 0 : i32
    %c0_i32_0 = arith.constant 0 : i32
    return %0, %c0_i32 : i32, i32
  }
  func.func @transform_4(%arg0: i32) -> (i32, i32) {
    %c0_i32 = arith.constant 0 : i32
    %c0_i32_0 = arith.constant 0 : i32
    %c0_i32_1 = arith.constant 0 : i32
    return %c0_i32, %c0_i32_0 : i32, i32
  }
  func.func @transform_5(%arg0: i32) -> (i32, i32) {
    %c0_i32 = arith.constant 0 : i32
    %c0_i32_0 = arith.constant 0 : i32
    %c0_i32_1 = arith.constant 0 : i32
    return %c0_i32, %c0_i32_0 : i32, i32
  }
  func.func @transform_6(%arg0: i32) -> (i32, i32) {
    %c0_i32 = arith.constant 0 : i32
    %c0_i32_0 = arith.constant 0 : i32
    %c0_i32_1 = arith.constant 0 : i32
    return %c0_i32, %c0_i32_0 : i32, i32
  }
  func.func @transform_7(%arg0: i32) -> (i32, i32) {
    %c0_i32 = arith.constant 0 : i32
    %c0_i32_0 = arith.constant 0 : i32
    %c0_i32_1 = arith.constant 0 : i32
    return %c0_i32, %c0_i32_0 : i32, i32
  }
  func.func @transform_8(%arg0: i32) -> (i32, i32) {
    %c0_i32 = arith.constant 0 : i32
    %c0_i32_0 = arith.constant 0 : i32
    %c0_i32_1 = arith.constant 0 : i32
    return %c0_i32, %c0_i32_0 : i32, i32
  }
  func.func @transform_9(%arg0: i32) -> (i32, i32) {
    %c0_i32 = arith.constant 0 : i32
    %c0_i32_0 = arith.constant 0 : i32
    %c0_i32_1 = arith.constant 0 : i32
    return %c0_i32, %c0_i32_0 : i32, i32
  }
  func.func @transform_10(%arg0: i32) -> (i32, i32) {
    %c0_i32 = arith.constant 0 : i32
    %c0_i32_0 = arith.constant 0 : i32
    %c0_i32_1 = arith.constant 0 : i32
    return %c0_i32, %c0_i32_0 : i32, i32
  }
  func.func @transform_11(%arg0: i32) -> (i32, i32) {
    %c0_i32 = arith.constant 0 : i32
    %c0_i32_0 = arith.constant 0 : i32
    %c0_i32_1 = arith.constant 0 : i32
    return %c0_i32, %c0_i32_0 : i32, i32
  }
  func.func @transform_12(%arg0: i32) -> (i32, i32) {
    %c0_i32 = arith.constant 0 : i32
    %c0_i32_0 = arith.constant 0 : i32
    %c0_i32_1 = arith.constant 0 : i32
    return %c0_i32, %c0_i32_0 : i32, i32
  }
  func.func @transform_13(%arg0: i32) -> (i32, i32) {
    %c0_i32 = arith.constant 0 : i32
    %c0_i32_0 = arith.constant 0 : i32
    %c0_i32_1 = arith.constant 0 : i32
    return %c0_i32, %c0_i32_0 : i32, i32
  }
  func.func @transform_14(%arg0: i32) -> (i32, i32) {
    %c0_i32 = arith.constant 0 : i32
    %c0_i32_0 = arith.constant 0 : i32
    %c0_i32_1 = arith.constant 0 : i32
    return %c0_i32, %c0_i32_0 : i32, i32
  }
  func.func @transform_15(%arg0: i32) -> (i32, i32) {
    %c0_i32 = arith.constant 0 : i32
    %c0_i32_0 = arith.constant 0 : i32
    return %arg0, %c0_i32 : i32, i32
  }
  func.func @transform_16(%arg0: i32) -> (i32, i32) {
    %c1_i32 = arith.constant 1 : i32
    %0 = arith.subi %c1_i32, %arg0 : i32
    %c0_i32 = arith.constant 0 : i32
    %c0_i32_0 = arith.constant 0 : i32
    return %0, %c0_i32 : i32, i32
  }
  func.func @transform_17(%arg0: i32) -> (i32, i32, i32) {
    %c0_i32 = arith.constant 0 : i32
    %c0_i32_0 = arith.constant 0 : i32
    %c0_i32_1 = arith.constant 0 : i32
    %c0_i32_2 = arith.constant 0 : i32
    return %c0_i32, %c0_i32_0, %c0_i32_1 : i32, i32, i32
  }
}

module attributes {stable_mosaic.version = 11 : i64} {
  func.func @kernel(%arg0: i32, %arg1: memref<32x128xf32, #tpu.memory_space<vmem>>, %arg2: memref<32x128xf32, #tpu.memory_space<vmem>>, %arg3: memref<128x512xbf16, #tpu.memory_space<vmem>>, %arg4: memref<128x512xbf16, #tpu.memory_space<vmem>>, %arg5: memref<128x512xbf16, #tpu.memory_space<vmem>>, %arg6: memref<128x512xbf16, #tpu.memory_space<vmem>>, %arg7: memref<1x512xf32, #tpu.memory_space<vmem>>, %arg8: memref<1x512xf32, #tpu.memory_space<vmem>>, %arg9: memref<32x128xbf16, #tpu.memory_space<vmem>>, %arg10: memref<32x128xbf16, #tpu.memory_space<vmem>>, %arg11: memref<8x128xf32, #tpu.memory_space<vmem>>, %arg12: memref<8x128xf32, #tpu.memory_space<vmem>>, %arg13: memref<8x128xf32, #tpu.memory_space<vmem>>, %arg14: memref<8x128xf32, #tpu.memory_space<vmem>>, %arg15: memref<32x512xf32, #tpu.memory_space<vmem>>, %arg16: memref<32x512xf32, #tpu.memory_space<vmem>>, %arg17: memref<32x128xf32, #tpu.memory_space<vmem>>, %arg18: memref<32x128xf32, #tpu.memory_space<vmem>>) attributes {dimension_semantics = [#tpu.dimension_semantics<arbitrary>], iteration_bounds = array<i64: 2>, scalar_prefetch = 0 : i64, scratch_operands = 8 : i64, tpu.core_type = #tpu.core_type<tc>, window_params = [{transform_indices = @transform_0, window_bounds = array<i64: 32, 128>}, {transform_indices = @transform_1, window_bounds = array<i64: 32, 128>}, {pipeline_mode = #tpu.pipeline_mode<synchronous>, transform_indices = @transform_2, window_bounds = array<i64: 128, 512>}, {pipeline_mode = #tpu.pipeline_mode<synchronous>, transform_indices = @transform_3, window_bounds = array<i64: 128, 512>}, {pipeline_mode = #tpu.pipeline_mode<synchronous>, transform_indices = @transform_4, window_bounds = array<i64: 128, 512>}, {pipeline_mode = #tpu.pipeline_mode<synchronous>, transform_indices = @transform_5, window_bounds = array<i64: 128, 512>}, {pipeline_mode = #tpu.pipeline_mode<synchronous>, transform_indices = @transform_6, window_bounds = array<i64: 1, 512>}, {pipeline_mode = #tpu.pipeline_mode<synchronous>, transform_indices = @transform_7, window_bounds = array<i64: 1, 512>}, {transform_indices = @transform_8, window_bounds = array<i64: 32, 128>}, {transform_indices = @transform_9, window_bounds = array<i64: 32, 128>}]} {
    %c0_i32 = arith.constant 0 : i32
    %0 = arith.cmpi eq, %arg0, %c0_i32 : i32
    %1 = arith.extui %0 : i1 to i32
    %c0_i32_0 = arith.constant 0 : i32
    %2 = arith.cmpi ne, %1, %c0_i32_0 : i32
    scf.if %2 {
      %cst_105 = arith.constant 0.000000e+00 : f32
      %311 = vector.broadcast %cst_105 : f32 to vector<8x128xf32>
      %c0_106 = arith.constant 0 : index
      %c0_107 = arith.constant 0 : index
      %312 = vector.load %arg11[%c0_106, %c0_107] : memref<8x128xf32, #tpu.memory_space<vmem>>, vector<8x128xf32>
      tpu.vector_store %arg11[%c0_106, %c0_107], %311 {strides = array<i32>} : memref<8x128xf32, #tpu.memory_space<vmem>>, vector<8x128xf32>,
      %c0_108 = arith.constant 0 : index
      %c0_109 = arith.constant 0 : index
      %313 = vector.load %arg12[%c0_108, %c0_109] : memref<8x128xf32, #tpu.memory_space<vmem>>, vector<8x128xf32>
      tpu.vector_store %arg12[%c0_108, %c0_109], %311 {strides = array<i32>} : memref<8x128xf32, #tpu.memory_space<vmem>>, vector<8x128xf32>,
      %c0_110 = arith.constant 0 : index
      %c0_111 = arith.constant 0 : index
      %314 = vector.load %arg13[%c0_110, %c0_111] : memref<8x128xf32, #tpu.memory_space<vmem>>, vector<8x128xf32>
      tpu.vector_store %arg13[%c0_110, %c0_111], %311 {strides = array<i32>} : memref<8x128xf32, #tpu.memory_space<vmem>>, vector<8x128xf32>,
      %c0_112 = arith.constant 0 : index
      %c0_113 = arith.constant 0 : index
      %315 = vector.load %arg14[%c0_112, %c0_113] : memref<8x128xf32, #tpu.memory_space<vmem>>, vector<8x128xf32>
      tpu.vector_store %arg14[%c0_112, %c0_113], %311 {strides = array<i32>} : memref<8x128xf32, #tpu.memory_space<vmem>>, vector<8x128xf32>,
    } else {
    }
    %c0 = arith.constant 0 : index
    %c0_1 = arith.constant 0 : index
    %3 = vector.load %arg7[%c0, %c0_1] : memref<1x512xf32, #tpu.memory_space<vmem>>, vector<1x512xf32>
    %c0_2 = arith.constant 0 : index
    %c0_3 = arith.constant 0 : index
    %4 = vector.load %arg8[%c0_2, %c0_3] : memref<1x512xf32, #tpu.memory_space<vmem>>, vector<1x512xf32>
    %c0_4 = arith.constant 0 : index
    %c0_5 = arith.constant 0 : index
    %5 = vector.load %arg1[%c0_4, %c0_5] : memref<32x128xf32, #tpu.memory_space<vmem>>, vector<32x128xf32>
    %6 = arith.truncf %5 : vector<32x128xf32> to vector<32x128xbf16>
    %c0_6 = arith.constant 0 : index
    %c0_7 = arith.constant 0 : index
    %7 = vector.load %arg3[%c0_6, %c0_7] : memref<128x512xbf16, #tpu.memory_space<vmem>>, vector<128x512xbf16>
    %cst = arith.constant dense<0.000000e+00> : vector<32x512xf32>
    %8 = tpu.matmul %6, %7, %cst {dimension_numbers = #tpu.dot_dimension_numbers<[1], [0], [0], [1], [0, 0, 1, 1], [], []>} : vector<32x128xbf16>, vector<128x512xbf16>, vector<32x512xf32> -> vector<32x512xf32>
    %9 = vector.broadcast %3 : vector<1x512xf32> to vector<32x512xf32>
    %10 = arith.addf %9, %8 : vector<32x512xf32>
    %c0_8 = arith.constant 0 : index
    %c0_9 = arith.constant 0 : index
    %11 = vector.load %arg2[%c0_8, %c0_9] : memref<32x128xf32, #tpu.memory_space<vmem>>, vector<32x128xf32>
    %12 = arith.truncf %11 : vector<32x128xf32> to vector<32x128xbf16>
    %c0_10 = arith.constant 0 : index
    %c0_11 = arith.constant 0 : index
    %13 = vector.load %arg4[%c0_10, %c0_11] : memref<128x512xbf16, #tpu.memory_space<vmem>>, vector<128x512xbf16>
    %cst_12 = arith.constant dense<0.000000e+00> : vector<32x512xf32>
    %14 = tpu.matmul %12, %13, %cst_12 {dimension_numbers = #tpu.dot_dimension_numbers<[1], [0], [0], [1], [0, 0, 1, 1], [], []>} : vector<32x128xbf16>, vector<128x512xbf16>, vector<32x512xf32> -> vector<32x512xf32>
    %15 = vector.broadcast %4 : vector<1x512xf32> to vector<32x512xf32>
    %16 = arith.addf %15, %14 : vector<32x512xf32>
    %c0_13 = arith.constant 0 : index
    %c0_14 = arith.constant 0 : index
    %17 = vector.load %arg15[%c0_13, %c0_14] : memref<32x512xf32, #tpu.memory_space<vmem>>, vector<32x512xf32>
    tpu.vector_store %arg15[%c0_13, %c0_14], %10 {strides = array<i32>} : memref<32x512xf32, #tpu.memory_space<vmem>>, vector<32x512xf32>,
    %c0_15 = arith.constant 0 : index
    %c0_16 = arith.constant 0 : index
    %18 = vector.load %arg16[%c0_15, %c0_16] : memref<32x512xf32, #tpu.memory_space<vmem>>, vector<32x512xf32>
    tpu.vector_store %arg16[%c0_15, %c0_16], %16 {strides = array<i32>} : memref<32x512xf32, #tpu.memory_space<vmem>>, vector<32x512xf32>,
    %c0_17 = arith.constant 0 : index
    %c0_18 = arith.constant 0 : index
    %19 = vector.load %arg5[%c0_17, %c0_18] : memref<128x512xbf16, #tpu.memory_space<vmem>>, vector<128x512xbf16>
    %c0_19 = arith.constant 0 : index
    %c0_20 = arith.constant 0 : index
    %20 = vector.load %arg6[%c0_19, %c0_20] : memref<128x512xbf16, #tpu.memory_space<vmem>>, vector<128x512xbf16>
    %c0_21 = arith.constant 0 : index
    %c0_22 = arith.constant 0 : index
    %21 = vector.load %arg11[%c0_21, %c0_22] : memref<8x128xf32, #tpu.memory_space<vmem>>, vector<8x128xf32>
    %c0_23 = arith.constant 0 : index
    %c0_24 = arith.constant 0 : index
    %22 = vector.load %arg12[%c0_23, %c0_24] : memref<8x128xf32, #tpu.memory_space<vmem>>, vector<8x128xf32>
    %c0_25 = arith.constant 0 : index
    %c0_26 = arith.constant 0 : index
    %23 = vector.load %arg13[%c0_25, %c0_26] : memref<8x128xf32, #tpu.memory_space<vmem>>, vector<8x128xf32>
    %c0_27 = arith.constant 0 : index
    %c0_28 = arith.constant 0 : index
    %24 = vector.load %arg14[%c0_27, %c0_28] : memref<8x128xf32, #tpu.memory_space<vmem>>, vector<8x128xf32>
    %c0_i32_29 = arith.constant 0 : i32
    %c8_i32 = arith.constant 8 : i32
    %25 = arith.muli %c0_i32_29, %c8_i32 : i32
    %26 = tpu.assume_multiple %25, 8 : i32
    %c3_i32 = arith.constant 3 : i32
    %27 = arith.subi %c3_i32, %c0_i32_29 : i32
    %c8_i32_30 = arith.constant 8 : i32
    %28 = arith.muli %27, %c8_i32_30 : i32
    %29 = tpu.assume_multiple %28, 8 : i32
    %30 = arith.index_cast %26 : i32 to index
    %c0_31 = arith.constant 0 : index
    %31 = vector.load %arg15[%30, %c0_31] : memref<32x512xf32, #tpu.memory_space<vmem>>, vector<8x512xf32>
    %32 = arith.truncf %21 : vector<8x128xf32> to vector<8x128xbf16>
    %cst_32 = arith.constant dense<0.000000e+00> : vector<8x512xf32>
    %33 = tpu.matmul %32, %19, %cst_32 {dimension_numbers = #tpu.dot_dimension_numbers<[1], [0], [0], [1], [0, 0, 1, 1], [], []>} : vector<8x128xbf16>, vector<128x512xbf16>, vector<8x512xf32> -> vector<8x512xf32>
    %34 = arith.addf %31, %33 : vector<8x512xf32>
    %35 = arith.index_cast %29 : i32 to index
    %c0_33 = arith.constant 0 : index
    %36 = vector.load %arg16[%35, %c0_33] : memref<32x512xf32, #tpu.memory_space<vmem>>, vector<8x512xf32>
    %37 = arith.truncf %23 : vector<8x128xf32> to vector<8x128xbf16>
    %cst_34 = arith.constant dense<0.000000e+00> : vector<8x512xf32>
    %38 = tpu.matmul %37, %20, %cst_34 {dimension_numbers = #tpu.dot_dimension_numbers<[1], [0], [0], [1], [0, 0, 1, 1], [], []>} : vector<8x128xbf16>, vector<128x512xbf16>, vector<8x512xf32> -> vector<8x512xf32>
    %39 = arith.addf %36, %38 : vector<8x512xf32>
    %40 = vector.extract_strided_slice %34 {offsets = [0, 0], sizes = [8, 128], strides = [1, 1]} : vector<8x512xf32> to vector<8x128xf32>
    %41 = arith.negf %40 : vector<8x128xf32>
    %42 = math.exp %41 : vector<8x128xf32>
    %cst_35 = arith.constant 1.000000e+00 : f32
    %43 = vector.broadcast %cst_35 : f32 to vector<8x128xf32>
    %44 = arith.addf %43, %42 : vector<8x128xf32>
    %45 = arith.divf %43, %44 : vector<8x128xf32>
    %46 = vector.extract_strided_slice %34 {offsets = [0, 128], sizes = [8, 128], strides = [1, 1]} : vector<8x512xf32> to vector<8x128xf32>
    %47 = arith.negf %46 : vector<8x128xf32>
    %48 = math.exp %47 : vector<8x128xf32>
    %cst_36 = arith.constant 1.000000e+00 : f32
    %49 = vector.broadcast %cst_36 : f32 to vector<8x128xf32>
    %50 = arith.addf %49, %48 : vector<8x128xf32>
    %51 = arith.divf %49, %50 : vector<8x128xf32>
    %52 = vector.extract_strided_slice %34 {offsets = [0, 256], sizes = [8, 128], strides = [1, 1]} : vector<8x512xf32> to vector<8x128xf32>
    %53 = math.tanh %52 : vector<8x128xf32>
    %54 = vector.extract_strided_slice %34 {offsets = [0, 384], sizes = [8, 128], strides = [1, 1]} : vector<8x512xf32> to vector<8x128xf32>
    %55 = arith.negf %54 : vector<8x128xf32>
    %56 = math.exp %55 : vector<8x128xf32>
    %cst_37 = arith.constant 1.000000e+00 : f32
    %57 = vector.broadcast %cst_37 : f32 to vector<8x128xf32>
    %58 = arith.addf %57, %56 : vector<8x128xf32>
    %59 = arith.divf %57, %58 : vector<8x128xf32>
    %60 = arith.mulf %51, %22 : vector<8x128xf32>
    %61 = arith.mulf %45, %53 : vector<8x128xf32>
    %62 = arith.addf %60, %61 : vector<8x128xf32>
    %63 = math.tanh %62 : vector<8x128xf32>
    %64 = arith.mulf %59, %63 : vector<8x128xf32>
    %65 = vector.extract_strided_slice %39 {offsets = [0, 0], sizes = [8, 128], strides = [1, 1]} : vector<8x512xf32> to vector<8x128xf32>
    %66 = arith.negf %65 : vector<8x128xf32>
    %67 = math.exp %66 : vector<8x128xf32>
    %cst_38 = arith.constant 1.000000e+00 : f32
    %68 = vector.broadcast %cst_38 : f32 to vector<8x128xf32>
    %69 = arith.addf %68, %67 : vector<8x128xf32>
    %70 = arith.divf %68, %69 : vector<8x128xf32>
    %71 = vector.extract_strided_slice %39 {offsets = [0, 128], sizes = [8, 128], strides = [1, 1]} : vector<8x512xf32> to vector<8x128xf32>
    %72 = arith.negf %71 : vector<8x128xf32>
    %73 = math.exp %72 : vector<8x128xf32>
    %cst_39 = arith.constant 1.000000e+00 : f32
    %74 = vector.broadcast %cst_39 : f32 to vector<8x128xf32>
    %75 = arith.addf %74, %73 : vector<8x128xf32>
    %76 = arith.divf %74, %75 : vector<8x128xf32>
    %77 = vector.extract_strided_slice %39 {offsets = [0, 256], sizes = [8, 128], strides = [1, 1]} : vector<8x512xf32> to vector<8x128xf32>
    %78 = math.tanh %77 : vector<8x128xf32>
    %79 = vector.extract_strided_slice %39 {offsets = [0, 384], sizes = [8, 128], strides = [1, 1]} : vector<8x512xf32> to vector<8x128xf32>
    %80 = arith.negf %79 : vector<8x128xf32>
    %81 = math.exp %80 : vector<8x128xf32>
    %cst_40 = arith.constant 1.000000e+00 : f32
    %82 = vector.broadcast %cst_40 : f32 to vector<8x128xf32>
    %83 = arith.addf %82, %81 : vector<8x128xf32>
    %84 = arith.divf %82, %83 : vector<8x128xf32>
    %85 = arith.mulf %76, %24 : vector<8x128xf32>
    %86 = arith.mulf %70, %78 : vector<8x128xf32>
    %87 = arith.addf %85, %86 : vector<8x128xf32>
    %88 = math.tanh %87 : vector<8x128xf32>
    %89 = arith.mulf %84, %88 : vector<8x128xf32>
    %90 = arith.index_cast %26 : i32 to index
    %c0_41 = arith.constant 0 : index
    %91 = vector.load %arg17[%90, %c0_41] : memref<32x128xf32, #tpu.memory_space<vmem>>, vector<8x128xf32>
    tpu.vector_store %arg17[%90, %c0_41], %64 {strides = array<i32>} : memref<32x128xf32, #tpu.memory_space<vmem>>, vector<8x128xf32>,
    %92 = arith.index_cast %29 : i32 to index
    %c0_42 = arith.constant 0 : index
    %93 = vector.load %arg18[%92, %c0_42] : memref<32x128xf32, #tpu.memory_space<vmem>>, vector<8x128xf32>
    tpu.vector_store %arg18[%92, %c0_42], %89 {strides = array<i32>} : memref<32x128xf32, #tpu.memory_space<vmem>>, vector<8x128xf32>,
    %c1_i32 = arith.constant 1 : i32
    %c8_i32_43 = arith.constant 8 : i32
    %94 = arith.muli %c1_i32, %c8_i32_43 : i32
    %95 = tpu.assume_multiple %94, 8 : i32
    %c3_i32_44 = arith.constant 3 : i32
    %96 = arith.subi %c3_i32_44, %c1_i32 : i32
    %c8_i32_45 = arith.constant 8 : i32
    %97 = arith.muli %96, %c8_i32_45 : i32
    %98 = tpu.assume_multiple %97, 8 : i32
    %99 = arith.index_cast %95 : i32 to index
    %c0_46 = arith.constant 0 : index
    %100 = vector.load %arg15[%99, %c0_46] : memref<32x512xf32, #tpu.memory_space<vmem>>, vector<8x512xf32>
    %101 = arith.truncf %64 : vector<8x128xf32> to vector<8x128xbf16>
    %cst_47 = arith.constant dense<0.000000e+00> : vector<8x512xf32>
    %102 = tpu.matmul %101, %19, %cst_47 {dimension_numbers = #tpu.dot_dimension_numbers<[1], [0], [0], [1], [0, 0, 1, 1], [], []>} : vector<8x128xbf16>, vector<128x512xbf16>, vector<8x512xf32> -> vector<8x512xf32>
    %103 = arith.addf %100, %102 : vector<8x512xf32>
    %104 = arith.index_cast %98 : i32 to index
    %c0_48 = arith.constant 0 : index
    %105 = vector.load %arg16[%104, %c0_48] : memref<32x512xf32, #tpu.memory_space<vmem>>, vector<8x512xf32>
    %106 = arith.truncf %89 : vector<8x128xf32> to vector<8x128xbf16>
    %cst_49 = arith.constant dense<0.000000e+00> : vector<8x512xf32>
    %107 = tpu.matmul %106, %20, %cst_49 {dimension_numbers = #tpu.dot_dimension_numbers<[1], [0], [0], [1], [0, 0, 1, 1], [], []>} : vector<8x128xbf16>, vector<128x512xbf16>, vector<8x512xf32> -> vector<8x512xf32>
    %108 = arith.addf %105, %107 : vector<8x512xf32>
    %109 = vector.extract_strided_slice %103 {offsets = [0, 0], sizes = [8, 128], strides = [1, 1]} : vector<8x512xf32> to vector<8x128xf32>
    %110 = arith.negf %109 : vector<8x128xf32>
    %111 = math.exp %110 : vector<8x128xf32>
    %cst_50 = arith.constant 1.000000e+00 : f32
    %112 = vector.broadcast %cst_50 : f32 to vector<8x128xf32>
    %113 = arith.addf %112, %111 : vector<8x128xf32>
    %114 = arith.divf %112, %113 : vector<8x128xf32>
    %115 = vector.extract_strided_slice %103 {offsets = [0, 128], sizes = [8, 128], strides = [1, 1]} : vector<8x512xf32> to vector<8x128xf32>
    %116 = arith.negf %115 : vector<8x128xf32>
    %117 = math.exp %116 : vector<8x128xf32>
    %cst_51 = arith.constant 1.000000e+00 : f32
    %118 = vector.broadcast %cst_51 : f32 to vector<8x128xf32>
    %119 = arith.addf %118, %117 : vector<8x128xf32>
    %120 = arith.divf %118, %119 : vector<8x128xf32>
    %121 = vector.extract_strided_slice %103 {offsets = [0, 256], sizes = [8, 128], strides = [1, 1]} : vector<8x512xf32> to vector<8x128xf32>
    %122 = math.tanh %121 : vector<8x128xf32>
    %123 = vector.extract_strided_slice %103 {offsets = [0, 384], sizes = [8, 128], strides = [1, 1]} : vector<8x512xf32> to vector<8x128xf32>
    %124 = arith.negf %123 : vector<8x128xf32>
    %125 = math.exp %124 : vector<8x128xf32>
    %cst_52 = arith.constant 1.000000e+00 : f32
    %126 = vector.broadcast %cst_52 : f32 to vector<8x128xf32>
    %127 = arith.addf %126, %125 : vector<8x128xf32>
    %128 = arith.divf %126, %127 : vector<8x128xf32>
    %129 = arith.mulf %120, %62 : vector<8x128xf32>
    %130 = arith.mulf %114, %122 : vector<8x128xf32>
    %131 = arith.addf %129, %130 : vector<8x128xf32>
    %132 = math.tanh %131 : vector<8x128xf32>
    %133 = arith.mulf %128, %132 : vector<8x128xf32>
    %134 = vector.extract_strided_slice %108 {offsets = [0, 0], sizes = [8, 128], strides = [1, 1]} : vector<8x512xf32> to vector<8x128xf32>
    %135 = arith.negf %134 : vector<8x128xf32>
    %136 = math.exp %135 : vector<8x128xf32>
    %cst_53 = arith.constant 1.000000e+00 : f32
    %137 = vector.broadcast %cst_53 : f32 to vector<8x128xf32>
    %138 = arith.addf %137, %136 : vector<8x128xf32>
    %139 = arith.divf %137, %138 : vector<8x128xf32>
    %140 = vector.extract_strided_slice %108 {offsets = [0, 128], sizes = [8, 128], strides = [1, 1]} : vector<8x512xf32> to vector<8x128xf32>
    %141 = arith.negf %140 : vector<8x128xf32>
    %142 = math.exp %141 : vector<8x128xf32>
    %cst_54 = arith.constant 1.000000e+00 : f32
    %143 = vector.broadcast %cst_54 : f32 to vector<8x128xf32>
    %144 = arith.addf %143, %142 : vector<8x128xf32>
    %145 = arith.divf %143, %144 : vector<8x128xf32>
    %146 = vector.extract_strided_slice %108 {offsets = [0, 256], sizes = [8, 128], strides = [1, 1]} : vector<8x512xf32> to vector<8x128xf32>
    %147 = math.tanh %146 : vector<8x128xf32>
    %148 = vector.extract_strided_slice %108 {offsets = [0, 384], sizes = [8, 128], strides = [1, 1]} : vector<8x512xf32> to vector<8x128xf32>
    %149 = arith.negf %148 : vector<8x128xf32>
    %150 = math.exp %149 : vector<8x128xf32>
    %cst_55 = arith.constant 1.000000e+00 : f32
    %151 = vector.broadcast %cst_55 : f32 to vector<8x128xf32>
    %152 = arith.addf %151, %150 : vector<8x128xf32>
    %153 = arith.divf %151, %152 : vector<8x128xf32>
    %154 = arith.mulf %145, %87 : vector<8x128xf32>
    %155 = arith.mulf %139, %147 : vector<8x128xf32>
    %156 = arith.addf %154, %155 : vector<8x128xf32>
    %157 = math.tanh %156 : vector<8x128xf32>
    %158 = arith.mulf %153, %157 : vector<8x128xf32>
    %159 = arith.index_cast %95 : i32 to index
    %c0_56 = arith.constant 0 : index
    %160 = vector.load %arg17[%159, %c0_56] : memref<32x128xf32, #tpu.memory_space<vmem>>, vector<8x128xf32>
    tpu.vector_store %arg17[%159, %c0_56], %133 {strides = array<i32>} : memref<32x128xf32, #tpu.memory_space<vmem>>, vector<8x128xf32>,
    %161 = arith.index_cast %98 : i32 to index
    %c0_57 = arith.constant 0 : index
    %162 = vector.load %arg18[%161, %c0_57] : memref<32x128xf32, #tpu.memory_space<vmem>>, vector<8x128xf32>
    tpu.vector_store %arg18[%161, %c0_57], %158 {strides = array<i32>} : memref<32x128xf32, #tpu.memory_space<vmem>>, vector<8x128xf32>,
    %c2_i32 = arith.constant 2 : i32
    %c8_i32_58 = arith.constant 8 : i32
    %163 = arith.muli %c2_i32, %c8_i32_58 : i32
    %164 = tpu.assume_multiple %163, 8 : i32
    %c3_i32_59 = arith.constant 3 : i32
    %165 = arith.subi %c3_i32_59, %c2_i32 : i32
    %c8_i32_60 = arith.constant 8 : i32
    %166 = arith.muli %165, %c8_i32_60 : i32
    %167 = tpu.assume_multiple %166, 8 : i32
    %168 = arith.index_cast %164 : i32 to index
    %c0_61 = arith.constant 0 : index
    %169 = vector.load %arg15[%168, %c0_61] : memref<32x512xf32, #tpu.memory_space<vmem>>, vector<8x512xf32>
    %170 = arith.truncf %133 : vector<8x128xf32> to vector<8x128xbf16>
    %cst_62 = arith.constant dense<0.000000e+00> : vector<8x512xf32>
    %171 = tpu.matmul %170, %19, %cst_62 {dimension_numbers = #tpu.dot_dimension_numbers<[1], [0], [0], [1], [0, 0, 1, 1], [], []>} : vector<8x128xbf16>, vector<128x512xbf16>, vector<8x512xf32> -> vector<8x512xf32>
    %172 = arith.addf %169, %171 : vector<8x512xf32>
    %173 = arith.index_cast %167 : i32 to index
    %c0_63 = arith.constant 0 : index
    %174 = vector.load %arg16[%173, %c0_63] : memref<32x512xf32, #tpu.memory_space<vmem>>, vector<8x512xf32>
    %175 = arith.truncf %158 : vector<8x128xf32> to vector<8x128xbf16>
    %cst_64 = arith.constant dense<0.000000e+00> : vector<8x512xf32>
    %176 = tpu.matmul %175, %20, %cst_64 {dimension_numbers = #tpu.dot_dimension_numbers<[1], [0], [0], [1], [0, 0, 1, 1], [], []>} : vector<8x128xbf16>, vector<128x512xbf16>, vector<8x512xf32> -> vector<8x512xf32>
    %177 = arith.addf %174, %176 : vector<8x512xf32>
    %178 = vector.extract_strided_slice %172 {offsets = [0, 0], sizes = [8, 128], strides = [1, 1]} : vector<8x512xf32> to vector<8x128xf32>
    %179 = arith.negf %178 : vector<8x128xf32>
    %180 = math.exp %179 : vector<8x128xf32>
    %cst_65 = arith.constant 1.000000e+00 : f32
    %181 = vector.broadcast %cst_65 : f32 to vector<8x128xf32>
    %182 = arith.addf %181, %180 : vector<8x128xf32>
    %183 = arith.divf %181, %182 : vector<8x128xf32>
    %184 = vector.extract_strided_slice %172 {offsets = [0, 128], sizes = [8, 128], strides = [1, 1]} : vector<8x512xf32> to vector<8x128xf32>
    %185 = arith.negf %184 : vector<8x128xf32>
    %186 = math.exp %185 : vector<8x128xf32>
    %cst_66 = arith.constant 1.000000e+00 : f32
    %187 = vector.broadcast %cst_66 : f32 to vector<8x128xf32>
    %188 = arith.addf %187, %186 : vector<8x128xf32>
    %189 = arith.divf %187, %188 : vector<8x128xf32>
    %190 = vector.extract_strided_slice %172 {offsets = [0, 256], sizes = [8, 128], strides = [1, 1]} : vector<8x512xf32> to vector<8x128xf32>
    %191 = math.tanh %190 : vector<8x128xf32>
    %192 = vector.extract_strided_slice %172 {offsets = [0, 384], sizes = [8, 128], strides = [1, 1]} : vector<8x512xf32> to vector<8x128xf32>
    %193 = arith.negf %192 : vector<8x128xf32>
    %194 = math.exp %193 : vector<8x128xf32>
    %cst_67 = arith.constant 1.000000e+00 : f32
    %195 = vector.broadcast %cst_67 : f32 to vector<8x128xf32>
    %196 = arith.addf %195, %194 : vector<8x128xf32>
    %197 = arith.divf %195, %196 : vector<8x128xf32>
    %198 = arith.mulf %189, %131 : vector<8x128xf32>
    %199 = arith.mulf %183, %191 : vector<8x128xf32>
    %200 = arith.addf %198, %199 : vector<8x128xf32>
    %201 = math.tanh %200 : vector<8x128xf32>
    %202 = arith.mulf %197, %201 : vector<8x128xf32>
    %203 = vector.extract_strided_slice %177 {offsets = [0, 0], sizes = [8, 128], strides = [1, 1]} : vector<8x512xf32> to vector<8x128xf32>
    %204 = arith.negf %203 : vector<8x128xf32>
    %205 = math.exp %204 : vector<8x128xf32>
    %cst_68 = arith.constant 1.000000e+00 : f32
    %206 = vector.broadcast %cst_68 : f32 to vector<8x128xf32>
    %207 = arith.addf %206, %205 : vector<8x128xf32>
    %208 = arith.divf %206, %207 : vector<8x128xf32>
    %209 = vector.extract_strided_slice %177 {offsets = [0, 128], sizes = [8, 128], strides = [1, 1]} : vector<8x512xf32> to vector<8x128xf32>
    %210 = arith.negf %209 : vector<8x128xf32>
    %211 = math.exp %210 : vector<8x128xf32>
    %cst_69 = arith.constant 1.000000e+00 : f32
    %212 = vector.broadcast %cst_69 : f32 to vector<8x128xf32>
    %213 = arith.addf %212, %211 : vector<8x128xf32>
    %214 = arith.divf %212, %213 : vector<8x128xf32>
    %215 = vector.extract_strided_slice %177 {offsets = [0, 256], sizes = [8, 128], strides = [1, 1]} : vector<8x512xf32> to vector<8x128xf32>
    %216 = math.tanh %215 : vector<8x128xf32>
    %217 = vector.extract_strided_slice %177 {offsets = [0, 384], sizes = [8, 128], strides = [1, 1]} : vector<8x512xf32> to vector<8x128xf32>
    %218 = arith.negf %217 : vector<8x128xf32>
    %219 = math.exp %218 : vector<8x128xf32>
    %cst_70 = arith.constant 1.000000e+00 : f32
    %220 = vector.broadcast %cst_70 : f32 to vector<8x128xf32>
    %221 = arith.addf %220, %219 : vector<8x128xf32>
    %222 = arith.divf %220, %221 : vector<8x128xf32>
    %223 = arith.mulf %214, %156 : vector<8x128xf32>
    %224 = arith.mulf %208, %216 : vector<8x128xf32>
    %225 = arith.addf %223, %224 : vector<8x128xf32>
    %226 = math.tanh %225 : vector<8x128xf32>
    %227 = arith.mulf %222, %226 : vector<8x128xf32>
    %228 = arith.index_cast %164 : i32 to index
    %c0_71 = arith.constant 0 : index
    %229 = vector.load %arg17[%228, %c0_71] : memref<32x128xf32, #tpu.memory_space<vmem>>, vector<8x128xf32>
    tpu.vector_store %arg17[%228, %c0_71], %202 {strides = array<i32>} : memref<32x128xf32, #tpu.memory_space<vmem>>, vector<8x128xf32>,
    %230 = arith.index_cast %167 : i32 to index
    %c0_72 = arith.constant 0 : index
    %231 = vector.load %arg18[%230, %c0_72] : memref<32x128xf32, #tpu.memory_space<vmem>>, vector<8x128xf32>
    tpu.vector_store %arg18[%230, %c0_72], %227 {strides = array<i32>} : memref<32x128xf32, #tpu.memory_space<vmem>>, vector<8x128xf32>,
    %c3_i32_73 = arith.constant 3 : i32
    %c8_i32_74 = arith.constant 8 : i32
    %232 = arith.muli %c3_i32_73, %c8_i32_74 : i32
    %233 = tpu.assume_multiple %232, 8 : i32
    %c3_i32_75 = arith.constant 3 : i32
    %234 = arith.subi %c3_i32_75, %c3_i32_73 : i32
    %c8_i32_76 = arith.constant 8 : i32
    %235 = arith.muli %234, %c8_i32_76 : i32
    %236 = tpu.assume_multiple %235, 8 : i32
    %237 = arith.index_cast %233 : i32 to index
    %c0_77 = arith.constant 0 : index
    %238 = vector.load %arg15[%237, %c0_77] : memref<32x512xf32, #tpu.memory_space<vmem>>, vector<8x512xf32>
    %239 = arith.truncf %202 : vector<8x128xf32> to vector<8x128xbf16>
    %cst_78 = arith.constant dense<0.000000e+00> : vector<8x512xf32>
    %240 = tpu.matmul %239, %19, %cst_78 {dimension_numbers = #tpu.dot_dimension_numbers<[1], [0], [0], [1], [0, 0, 1, 1], [], []>} : vector<8x128xbf16>, vector<128x512xbf16>, vector<8x512xf32> -> vector<8x512xf32>
    %241 = arith.addf %238, %240 : vector<8x512xf32>
    %242 = arith.index_cast %236 : i32 to index
    %c0_79 = arith.constant 0 : index
    %243 = vector.load %arg16[%242, %c0_79] : memref<32x512xf32, #tpu.memory_space<vmem>>, vector<8x512xf32>
    %244 = arith.truncf %227 : vector<8x128xf32> to vector<8x128xbf16>
    %cst_80 = arith.constant dense<0.000000e+00> : vector<8x512xf32>
    %245 = tpu.matmul %244, %20, %cst_80 {dimension_numbers = #tpu.dot_dimension_numbers<[1], [0], [0], [1], [0, 0, 1, 1], [], []>} : vector<8x128xbf16>, vector<128x512xbf16>, vector<8x512xf32> -> vector<8x512xf32>
    %246 = arith.addf %243, %245 : vector<8x512xf32>
    %247 = vector.extract_strided_slice %241 {offsets = [0, 0], sizes = [8, 128], strides = [1, 1]} : vector<8x512xf32> to vector<8x128xf32>
    %248 = arith.negf %247 : vector<8x128xf32>
    %249 = math.exp %248 : vector<8x128xf32>
    %cst_81 = arith.constant 1.000000e+00 : f32
    %250 = vector.broadcast %cst_81 : f32 to vector<8x128xf32>
    %251 = arith.addf %250, %249 : vector<8x128xf32>
    %252 = arith.divf %250, %251 : vector<8x128xf32>
    %253 = vector.extract_strided_slice %241 {offsets = [0, 128], sizes = [8, 128], strides = [1, 1]} : vector<8x512xf32> to vector<8x128xf32>
    %254 = arith.negf %253 : vector<8x128xf32>
    %255 = math.exp %254 : vector<8x128xf32>
    %cst_82 = arith.constant 1.000000e+00 : f32
    %256 = vector.broadcast %cst_82 : f32 to vector<8x128xf32>
    %257 = arith.addf %256, %255 : vector<8x128xf32>
    %258 = arith.divf %256, %257 : vector<8x128xf32>
    %259 = vector.extract_strided_slice %241 {offsets = [0, 256], sizes = [8, 128], strides = [1, 1]} : vector<8x512xf32> to vector<8x128xf32>
    %260 = math.tanh %259 : vector<8x128xf32>
    %261 = vector.extract_strided_slice %241 {offsets = [0, 384], sizes = [8, 128], strides = [1, 1]} : vector<8x512xf32> to vector<8x128xf32>
    %262 = arith.negf %261 : vector<8x128xf32>
    %263 = math.exp %262 : vector<8x128xf32>
    %cst_83 = arith.constant 1.000000e+00 : f32
    %264 = vector.broadcast %cst_83 : f32 to vector<8x128xf32>
    %265 = arith.addf %264, %263 : vector<8x128xf32>
    %266 = arith.divf %264, %265 : vector<8x128xf32>
    %267 = arith.mulf %258, %200 : vector<8x128xf32>
    %268 = arith.mulf %252, %260 : vector<8x128xf32>
    %269 = arith.addf %267, %268 : vector<8x128xf32>
    %270 = math.tanh %269 : vector<8x128xf32>
    %271 = arith.mulf %266, %270 : vector<8x128xf32>
    %272 = vector.extract_strided_slice %246 {offsets = [0, 0], sizes = [8, 128], strides = [1, 1]} : vector<8x512xf32> to vector<8x128xf32>
    %273 = arith.negf %272 : vector<8x128xf32>
    %274 = math.exp %273 : vector<8x128xf32>
    %cst_84 = arith.constant 1.000000e+00 : f32
    %275 = vector.broadcast %cst_84 : f32 to vector<8x128xf32>
    %276 = arith.addf %275, %274 : vector<8x128xf32>
    %277 = arith.divf %275, %276 : vector<8x128xf32>
    %278 = vector.extract_strided_slice %246 {offsets = [0, 128], sizes = [8, 128], strides = [1, 1]} : vector<8x512xf32> to vector<8x128xf32>
    %279 = arith.negf %278 : vector<8x128xf32>
    %280 = math.exp %279 : vector<8x128xf32>
    %cst_85 = arith.constant 1.000000e+00 : f32
    %281 = vector.broadcast %cst_85 : f32 to vector<8x128xf32>
    %282 = arith.addf %281, %280 : vector<8x128xf32>
    %283 = arith.divf %281, %282 : vector<8x128xf32>
    %284 = vector.extract_strided_slice %246 {offsets = [0, 256], sizes = [8, 128], strides = [1, 1]} : vector<8x512xf32> to vector<8x128xf32>
    %285 = math.tanh %284 : vector<8x128xf32>
    %286 = vector.extract_strided_slice %246 {offsets = [0, 384], sizes = [8, 128], strides = [1, 1]} : vector<8x512xf32> to vector<8x128xf32>
    %287 = arith.negf %286 : vector<8x128xf32>
    %288 = math.exp %287 : vector<8x128xf32>
    %cst_86 = arith.constant 1.000000e+00 : f32
    %289 = vector.broadcast %cst_86 : f32 to vector<8x128xf32>
    %290 = arith.addf %289, %288 : vector<8x128xf32>
    %291 = arith.divf %289, %290 : vector<8x128xf32>
    %292 = arith.mulf %283, %225 : vector<8x128xf32>
    %293 = arith.mulf %277, %285 : vector<8x128xf32>
    %294 = arith.addf %292, %293 : vector<8x128xf32>
    %295 = math.tanh %294 : vector<8x128xf32>
    %296 = arith.mulf %291, %295 : vector<8x128xf32>
    %297 = arith.index_cast %233 : i32 to index
    %c0_87 = arith.constant 0 : index
    %298 = vector.load %arg17[%297, %c0_87] : memref<32x128xf32, #tpu.memory_space<vmem>>, vector<8x128xf32>
    tpu.vector_store %arg17[%297, %c0_87], %271 {strides = array<i32>} : memref<32x128xf32, #tpu.memory_space<vmem>>, vector<8x128xf32>,
    %299 = arith.index_cast %236 : i32 to index
    %c0_88 = arith.constant 0 : index
    %300 = vector.load %arg18[%299, %c0_88] : memref<32x128xf32, #tpu.memory_space<vmem>>, vector<8x128xf32>
    tpu.vector_store %arg18[%299, %c0_88], %296 {strides = array<i32>} : memref<32x128xf32, #tpu.memory_space<vmem>>, vector<8x128xf32>,
    %c4_i32 = arith.constant 4 : i32
    %c0_89 = arith.constant 0 : index
    %c0_90 = arith.constant 0 : index
    %301 = vector.load %arg11[%c0_89, %c0_90] : memref<8x128xf32, #tpu.memory_space<vmem>>, vector<8x128xf32>
    tpu.vector_store %arg11[%c0_89, %c0_90], %271 {strides = array<i32>} : memref<8x128xf32, #tpu.memory_space<vmem>>, vector<8x128xf32>,
    %c0_91 = arith.constant 0 : index
    %c0_92 = arith.constant 0 : index
    %302 = vector.load %arg12[%c0_91, %c0_92] : memref<8x128xf32, #tpu.memory_space<vmem>>, vector<8x128xf32>
    tpu.vector_store %arg12[%c0_91, %c0_92], %269 {strides = array<i32>} : memref<8x128xf32, #tpu.memory_space<vmem>>, vector<8x128xf32>,
    %c0_93 = arith.constant 0 : index
    %c0_94 = arith.constant 0 : index
    %303 = vector.load %arg13[%c0_93, %c0_94] : memref<8x128xf32, #tpu.memory_space<vmem>>, vector<8x128xf32>
    tpu.vector_store %arg13[%c0_93, %c0_94], %296 {strides = array<i32>} : memref<8x128xf32, #tpu.memory_space<vmem>>, vector<8x128xf32>,
    %c0_95 = arith.constant 0 : index
    %c0_96 = arith.constant 0 : index
    %304 = vector.load %arg14[%c0_95, %c0_96] : memref<8x128xf32, #tpu.memory_space<vmem>>, vector<8x128xf32>
    tpu.vector_store %arg14[%c0_95, %c0_96], %294 {strides = array<i32>} : memref<8x128xf32, #tpu.memory_space<vmem>>, vector<8x128xf32>,
    %c0_97 = arith.constant 0 : index
    %c0_98 = arith.constant 0 : index
    %305 = vector.load %arg17[%c0_97, %c0_98] : memref<32x128xf32, #tpu.memory_space<vmem>>, vector<32x128xf32>
    %306 = arith.truncf %305 : vector<32x128xf32> to vector<32x128xbf16>
    %c0_99 = arith.constant 0 : index
    %c0_100 = arith.constant 0 : index
    %307 = vector.load %arg9[%c0_99, %c0_100] : memref<32x128xbf16, #tpu.memory_space<vmem>>, vector<32x128xbf16>
    tpu.vector_store %arg9[%c0_99, %c0_100], %306 {strides = array<i32>} : memref<32x128xbf16, #tpu.memory_space<vmem>>, vector<32x128xbf16>,
    %c0_101 = arith.constant 0 : index
    %c0_102 = arith.constant 0 : index
    %308 = vector.load %arg18[%c0_101, %c0_102] : memref<32x128xf32, #tpu.memory_space<vmem>>, vector<32x128xf32>
    %309 = arith.truncf %308 : vector<32x128xf32> to vector<32x128xbf16>
    %c0_103 = arith.constant 0 : index
    %c0_104 = arith.constant 0 : index
    %310 = vector.load %arg10[%c0_103, %c0_104] : memref<32x128xbf16, #tpu.memory_space<vmem>>, vector<32x128xbf16>
    tpu.vector_store %arg10[%c0_103, %c0_104], %309 {strides = array<i32>} : memref<32x128xbf16, #tpu.memory_space<vmem>>, vector<32x128xbf16>,
    return
  }
  func.func @transform_0(%arg0: i32) -> (i32, i32) {
    %c0_i32 = arith.constant 0 : i32
    %c0_i32_0 = arith.constant 0 : i32
    return %arg0, %c0_i32 : i32, i32
  }
  func.func @transform_1(%arg0: i32) -> (i32, i32) {
    %c1_i32 = arith.constant 1 : i32
    %0 = arith.subi %c1_i32, %arg0 : i32
    %c0_i32 = arith.constant 0 : i32
    %c0_i32_0 = arith.constant 0 : i32
    return %0, %c0_i32 : i32, i32
  }
  func.func @transform_2(%arg0: i32) -> (i32, i32) {
    %c0_i32 = arith.constant 0 : i32
    %c0_i32_0 = arith.constant 0 : i32
    %c0_i32_1 = arith.constant 0 : i32
    return %c0_i32, %c0_i32_0 : i32, i32
  }
  func.func @transform_3(%arg0: i32) -> (i32, i32) {
    %c0_i32 = arith.constant 0 : i32
    %c0_i32_0 = arith.constant 0 : i32
    %c0_i32_1 = arith.constant 0 : i32
    return %c0_i32, %c0_i32_0 : i32, i32
  }
  func.func @transform_4(%arg0: i32) -> (i32, i32) {
    %c0_i32 = arith.constant 0 : i32
    %c0_i32_0 = arith.constant 0 : i32
    %c0_i32_1 = arith.constant 0 : i32
    return %c0_i32, %c0_i32_0 : i32, i32
  }
  func.func @transform_5(%arg0: i32) -> (i32, i32) {
    %c0_i32 = arith.constant 0 : i32
    %c0_i32_0 = arith.constant 0 : i32
    %c0_i32_1 = arith.constant 0 : i32
    return %c0_i32, %c0_i32_0 : i32, i32
  }
  func.func @transform_6(%arg0: i32) -> (i32, i32) {
    %c0_i32 = arith.constant 0 : i32
    %c0_i32_0 = arith.constant 0 : i32
    %c0_i32_1 = arith.constant 0 : i32
    return %c0_i32, %c0_i32_0 : i32, i32
  }
  func.func @transform_7(%arg0: i32) -> (i32, i32) {
    %c0_i32 = arith.constant 0 : i32
    %c0_i32_0 = arith.constant 0 : i32
    %c0_i32_1 = arith.constant 0 : i32
    return %c0_i32, %c0_i32_0 : i32, i32
  }
  func.func @transform_8(%arg0: i32) -> (i32, i32) {
    %c0_i32 = arith.constant 0 : i32
    %c0_i32_0 = arith.constant 0 : i32
    return %arg0, %c0_i32 : i32, i32
  }
  func.func @transform_9(%arg0: i32) -> (i32, i32) {
    %c1_i32 = arith.constant 1 : i32
    %0 = arith.subi %c1_i32, %arg0 : i32
    %c0_i32 = arith.constant 0 : i32
    %c0_i32_0 = arith.constant 0 : i32
    return %0, %c0_i32 : i32, i32
  }
}

</mosaic_0001>

<bundles_post_ra>
// kernel: encoder_forward.2
= control target key start
LH: loop header
LB: loop body
LE: loop exit
PB: predicated region body
PF: predicated region fallthrough
CT: control target
= control target key end

     0   :  { %s3263_s30 = smov 0   ;;  %s4373_s0 = inlined_call_operand.vmem [shape: f32[64,128], index: 0, kind: input, shape index: {}, may-alias: {0,1}]   ;;  %s4374_s1 = inlined_call_operand.vmem [shape: f32[64,128], index: 1, kind: input, shape index: {}, may-alias: {0,1}]   ;;  %s4375_s2 = inlined_call_operand.vmem [shape: bf16[128,512], index: 2, kind: input, shape index: {}]   ;;  %s4376_s3 = inlined_call_operand.vmem [shape: bf16[128,512], index: 3, kind: input, shape index: {}]   ;;  %s4377_s4 = inlined_call_operand.vmem [shape: bf16[128,512], index: 4, kind: input, shape index: {}]   ;;  %s4378_s5 = inlined_call_operand.vmem [shape: bf16[128,512], index: 5, kind: input, shape index: {}]   ;;  %s4379_s6 = inlined_call_operand.vmem [shape: f32[1,512], index: 6, kind: input, shape index: {}]   ;;  %s4380_s7 = inlined_call_operand.vmem [shape: f32[1,512], index: 7, kind: input, shape index: {}]   ;;  %s4381_s8 = inlined_call_operand.vmem [shape: bf16[64,128], index: 8, kind: output, shape index: {0}]   ;;  %s4382_s9 = inlined_call_operand.vmem [shape: bf16[64,128], index: 9, kind: output, shape index: {1}]  }
   0x1 LB: > { %s2614_s10 = sadd.s32 4294967295, %s3209_s30   ;;  %p2618_p0 = scmp.ge.s32.totalorder %s3209_s30, 1  ;;  %s3209_s30 = sphi %s3263_s30, %s20_s30  }
   0x2   : > { %p308_p1 = scmp.lt.s32.totalorder %s3209_s30, 3 }
   0x4   : > { %p309_p2 = pnand %p2618_p0, %p308_p1 }
   0x6   : > { %312 = sbr.rel (%p309_p2) target bundleno = 1162 (0x48a), region = 52 }
   0xb   : > { %s2619_s11 = sshll.u32 %s2614_s10, 2  ;;  %s362_s12 = ssub.s32 1, %s2614_s10 }
   0xc   : > { %p357_p3 = scmp.lt.s32.totalorder %s2619_s11, 7  ;;  %s2621_s13 = sshll.u32 %s362_s12, 2 }
   0xd   : > { %p364_p4 = scmp.lt.s32.totalorder %s2621_s13, 7  ;;  %p2627_p5 = scmp.ne.s32.totalorder %s2614_s10, 0 }
   0xe   : > { %s4551_s11 = smov (!%p357_p3, %s2619_s11), 7 }
   0xf   : > { %s4553_s13 = smov (!%p364_p4, %s2621_s13), 7  ;;  %s2620_s14 = sshll.u32 %s4551_s11, 3 }
  0x10   : > { %s2624_s15 = sshll.u32 %s4551_s11, 2  ;;  %s3274_s18 = scalar_lea.vmem %s4373_s0, %s2620_s14 }
  0x11   : > { %s2622_s19 = sshll.u32 %s4553_s13, 3  ;;  %s3284_s25 = scalar_lea.vmem %s4381_s8, %s2624_s15 }
  0x12   : > { %s3279_s22 = scalar_lea.vmem %s4374_s1, %s2622_s19  ;;  %s2626_s26 = sshll.u32 %s4553_s13, 2 }
  0x13   : > { %s3289_s29 = scalar_lea.vmem %s4382_s9, %s2626_s26  ;;  %388 = sbr.rel (%p2627_p5) target bundleno = 27 (0x1b), region = 56 }
  0x18   : > { %v3211_v0 = vmov 0.0  }
  0x19   : > { %389 = vst [vmem:[#allocation2] sm:$0xff] %v3211_v0  ;;  %390 = vst [vmem:[#allocation3] sm:$0xff] %v3211_v0 }
  0x1a   : > { %391 = vst [vmem:[#allocation4] sm:$0xff] %v3211_v0  ;;  %392 = vst [vmem:[#allocation5] sm:$0xff] %v3211_v0 }
  0x1b PF: > { %v2830_v1 = vld [vmem:[%s4375_s2 + $0xe4] ss:$16 sps:$4 sm:$0xff]   ;;  %v2832_v2 = vld [vmem:[%s4375_s2 + $0xec] ss:$16 sps:$4 sm:$0xff]   ;;  %v4383_v3 = vmov 0  }
  0x1c   : > { %625 = vmatprep.mubr.bf16.mxu0 %v4383_v3  ;;  %678 = vmatprep.mubr.bf16.mxu1 %v4383_v3  ;;  %v2834_v4 = vld [vmem:[%s4375_s2 + $0xe0] ss:$16 sps:$4 sm:$0xff]   ;;  %v2835_v5 = vld [vmem:[%s4375_s2 + $0xe8] ss:$16 sps:$4 sm:$0xff]   ;;  %v2836_v6 = vld [vmem:[%s4375_s2 + $0xc4] ss:$16 sps:$4 sm:$0xff]  }
  0x1d   : > { %593 = vmatprep.subr.bf16.mxu0 %v2830_v1  ;;  %646 = vmatprep.subr.bf16.mxu1 %v2832_v2  ;;  %v2838_v7 = vld [vmem:[%s4375_s2 + $0xcc] ss:$16 sps:$4 sm:$0xff]   ;;  %v2840_v8 = vld [vmem:[%s4375_s2 + $0xc0] ss:$16 sps:$4 sm:$0xff]   ;;  %v2841_v9 = vld [vmem:[%s4375_s2 + $0xc8] ss:$16 sps:$4 sm:$0xff]  }
  0x1e   : > { %594 = vmatpush1.bf16.msra.mxu0 %v2834_v4  ;;  %647 = vmatpush1.bf16.msra.mxu1 %v2835_v5  ;;  %v2842_v10 = vld [vmem:[%s4375_s2 + $0xa4] ss:$16 sps:$4 sm:$0xff]   ;;  %v2844_v11 = vld [vmem:[%s4375_s2 + $0xac] ss:$16 sps:$4 sm:$0xff]   ;;  %v2846_v12 = vld [vmem:[%s4375_s2 + $0xa0] ss:$16 sps:$4 sm:$0xff]  }
  0x1f   : > { %595 = vmatprep.subr.bf16.mxu0 %v2836_v6  ;;  %648 = vmatprep.subr.bf16.mxu1 %v2838_v7  ;;  %v2847_v13 = vld [vmem:[%s4375_s2 + $0xa8] ss:$16 sps:$4 sm:$0xff]   ;;  %v2848_v14 = vld [vmem:[%s4375_s2 + $0x84] ss:$16 sps:$4 sm:$0xff]   ;;  %v2850_v15 = vld [vmem:[%s4375_s2 + $0x8c] ss:$16 sps:$4 sm:$0xff]  }
  0x20   : > { %v2852_v16 = vld [vmem:[%s4375_s2 + $0x80] ss:$16 sps:$4 sm:$0xff]   ;;  %v2853_v17 = vld [vmem:[%s4375_s2 + $0x88] ss:$16 sps:$4 sm:$0xff]   ;;  %v2854_v18 = vld [vmem:[%s4375_s2 + $0x64] ss:$16 sps:$4 sm:$0xff]  }
  0x21   : > { %v2856_v19 = vld [vmem:[%s4375_s2 + $0x6c] ss:$16 sps:$4 sm:$0xff]   ;;  %v2858_v20 = vld [vmem:[%s4375_s2 + $0x60] ss:$16 sps:$4 sm:$0xff]   ;;  %v2859_v21 = vld [vmem:[%s4375_s2 + $0x68] ss:$16 sps:$4 sm:$0xff]  }
  0x22   : > { %596 = vmatpush1.bf16.msra.mxu0 %v2840_v8  ;;  %649 = vmatpush1.bf16.msra.mxu1 %v2841_v9  ;;  %v2860_v22 = vld [vmem:[%s4375_s2 + $0x44] ss:$16 sps:$4 sm:$0xff]   ;;  %v2862_v23 = vld [vmem:[%s4375_s2 + $0x4c] ss:$16 sps:$4 sm:$0xff]   ;;  %v2864_v24 = vld [vmem:[%s4375_s2 + $0x40] ss:$16 sps:$4 sm:$0xff]  }
  0x23   : > { %597 = vmatprep.subr.bf16.mxu0 %v2842_v10  ;;  %650 = vmatprep.subr.bf16.mxu1 %v2844_v11  ;;  %v2865_v25 = vld [vmem:[%s4375_s2 + $0x48] ss:$16 sps:$4 sm:$0xff]   ;;  %v2866_v26 = vld [vmem:[%s4375_s2 + $0x24] ss:$16 sps:$4 sm:$0xff]   ;;  %v2868_v27 = vld [vmem:[%s4375_s2 + $0x2c] ss:$16 sps:$4 sm:$0xff]  }
  0x24   : > { %v2870_v28 = vld [vmem:[%s4375_s2 + $0x20] ss:$16 sps:$4 sm:$0xff]   ;;  %v2871_v29 = vld [vmem:[%s4375_s2 + $0x28] ss:$16 sps:$4 sm:$0xff]   ;;  %v2872_v30 = vld [vmem:[%s4375_s2 + $0x4] ss:$16 sps:$4 sm:$0xff]  }
  0x25   : > { %v2874_v31 = vld [vmem:[%s4375_s2 + $0xc] ss:$16 sps:$4 sm:$0xff]   ;;  %v2876_v32 = vld [vmem:[%s4375_s2] ss:$16 sps:$4 sm:$0xff]   ;;  %v2877_v33 = vld [vmem:[%s4375_s2 + $0x8] ss:$16 sps:$4 sm:$0xff]  }
  0x26   : > { %598 = vmatpush1.bf16.msra.mxu0 %v2846_v12  ;;  %651 = vmatpush1.bf16.msra.mxu1 %v2847_v13  ;;  %v395_v34 = vld [vmem:[%s3274_s18] sm:$0xff]  ;;  %v396_v35 = vld [vmem:[%s3274_s18 + $0x8] sm:$0xff]  ;;  %v397_v46 = vld [vmem:[%s3274_s18 + $0x10] sm:$0xff] }
  0x27   : > { %599 = vmatprep.subr.bf16.mxu0 %v2848_v14  ;;  %652 = vmatprep.subr.bf16.mxu1 %v2850_v15  ;;  %v2880_v36 = vld [vmem:[%s4376_s3 + $0xe4] ss:$16 sps:$4 sm:$0xff]   ;;  %v2883_v37 = vld [vmem:[%s4376_s3 + $0xec] ss:$16 sps:$4 sm:$0xff]   ;;  %v399_v38 = vpack.c.bf16 %v396_v35, %v395_v34  ;;  %v2878_v39 = vld [vmem:[%s4376_s3 + $0xe0] ss:$16 sps:$4 sm:$0xff]  }
  0x28   : > { %v2881_v40 = vld [vmem:[%s4376_s3 + $0xe8] ss:$16 sps:$4 sm:$0xff]   ;;  %v2886_v41 = vld [vmem:[%s4376_s3 + $0xc4] ss:$16 sps:$4 sm:$0xff]   ;;  %v2889_v42 = vld [vmem:[%s4376_s3 + $0xcc] ss:$16 sps:$4 sm:$0xff]  }
  0x29   : > { %v2884_v43 = vld [vmem:[%s4376_s3 + $0xc0] ss:$16 sps:$4 sm:$0xff]   ;;  %v2887_v44 = vld [vmem:[%s4376_s3 + $0xc8] ss:$16 sps:$4 sm:$0xff]   ;;  %v2892_v45 = vld [vmem:[%s4376_s3 + $0xa4] ss:$16 sps:$4 sm:$0xff]  }
  0x2a   : > { %600 = vmatpush1.bf16.msra.mxu0 %v2852_v16  ;;  %653 = vmatpush1.bf16.msra.mxu1 %v2853_v17  ;;  %v398_v47 = vld [vmem:[%s3274_s18 + $0x18] sm:$0xff]  ;;  %v2890_v49 = vld [vmem:[%s4376_s3 + $0xa0] ss:$16 sps:$4 sm:$0xff]   ;;  %v2898_v52 = vld [vmem:[%s4376_s3 + $0x84] ss:$16 sps:$4 sm:$0xff]  }
  0x2b   : > { %601 = vmatprep.subr.bf16.mxu0 %v2854_v18  ;;  %654 = vmatprep.subr.bf16.mxu1 %v2856_v19  ;;  %v2895_v48 = vld [vmem:[%s4376_s3 + $0xac] ss:$16 sps:$4 sm:$0xff]   ;;  %v2893_v50 = vld [vmem:[%s4376_s3 + $0xa8] ss:$16 sps:$4 sm:$0xff]   ;;  %v400_v51 = vpack.c.bf16 %v398_v47, %v397_v46  ;;  %v2896_v54 = vld [vmem:[%s4376_s3 + $0x80] ss:$16 sps:$4 sm:$0xff]  }
  0x2c   : > { %v2901_v53 = vld [vmem:[%s4376_s3 + $0x8c] ss:$16 sps:$4 sm:$0xff]   ;;  %v2899_v55 = vld [vmem:[%s4376_s3 + $0x88] ss:$16 sps:$4 sm:$0xff]   ;;  %v2904_v56 = vld [vmem:[%s4376_s3 + $0x64] ss:$16 sps:$4 sm:$0xff]  }
  0x2d   : > { %v2907_v57 = vld [vmem:[%s4376_s3 + $0x6c] ss:$16 sps:$4 sm:$0xff]   ;;  %v2902_v58 = vld [vmem:[%s4376_s3 + $0x60] ss:$16 sps:$4 sm:$0xff]   ;;  %v2905_v59 = vld [vmem:[%s4376_s3 + $0x68] ss:$16 sps:$4 sm:$0xff]  }
  0x2e   : > { %602 = vmatpush1.bf16.msra.mxu0 %v2858_v20  ;;  %655 = vmatpush1.bf16.msra.mxu1 %v2859_v21  ;;  %v2910_v60 = vld [vmem:[%s4376_s3 + $0x44] ss:$16 sps:$4 sm:$0xff]   ;;  %v2913_v61 = vld [vmem:[%s4376_s3 + $0x4c] ss:$16 sps:$4 sm:$0xff]   ;;  %v2908_v62 = vld [vmem:[%s4376_s3 + $0x40] ss:$16 sps:$4 sm:$0xff]  }
  0x2f   : > { %603 = vmatprep.subr.bf16.mxu0 %v2860_v22  ;;  %656 = vmatprep.subr.bf16.mxu1 %v2862_v23  ;;  %v2911_v63 = vld [vmem:[%s4376_s3 + $0x48] ss:$16 sps:$4 sm:$0xff]   ;;  %v2916_v0 = vld [vmem:[%s4376_s3 + $0x24] ss:$16 sps:$4 sm:$0xff]   ;;  %v2919_v1 = vld [vmem:[%s4376_s3 + $0x2c] ss:$16 sps:$4 sm:$0xff]  }
  0x30   : > { %v2914_v2 = vld [vmem:[%s4376_s3 + $0x20] ss:$16 sps:$4 sm:$0xff]   ;;  %v2917_v4 = vld [vmem:[%s4376_s3 + $0x28] ss:$16 sps:$4 sm:$0xff]   ;;  %v2922_v5 = vld [vmem:[%s4376_s3 + $0x4] ss:$16 sps:$4 sm:$0xff]  }
  0x31   : > { %v2925_v6 = vld [vmem:[%s4376_s3 + $0xc] ss:$16 sps:$4 sm:$0xff]   ;;  %v2920_v7 = vld [vmem:[%s4376_s3] ss:$16 sps:$4 sm:$0xff]   ;;  %v2923_v8 = vld [vmem:[%s4376_s3 + $0x8] ss:$16 sps:$4 sm:$0xff]  }
  0x32   : > { %604 = vmatpush1.bf16.msra.mxu0 %v2864_v24  ;;  %657 = vmatpush1.bf16.msra.mxu1 %v2865_v25  ;;  %v736_v9 = vld [vmem:[%s3279_s22] sm:$0xff]  ;;  %v737_v10 = vld [vmem:[%s3279_s22 + $0x8] sm:$0xff]  ;;  %v738_v20 = vld [vmem:[%s3279_s22 + $0x10] sm:$0xff] }
  0x33   : > { %605 = vmatprep.subr.bf16.mxu0 %v2866_v26  ;;  %658 = vmatprep.subr.bf16.mxu1 %v2868_v27  ;;  %v3498_v11 = vld [vmem:[%s4377_s4 + $0xe4] ss:$16 sps:$4 sm:$0xff]   ;;  %v3503_v12 = vld [vmem:[%s4377_s4 + $0xec] ss:$16 sps:$4 sm:$0xff]   ;;  %v740_v13 = vpack.c.bf16 %v737_v10, %v736_v9  ;;  %v3508_v14 = vld [vmem:[%s4377_s4 + $0xe0] ss:$16 sps:$4 sm:$0xff]  }
  0x34   : > { %v3513_v15 = vld [vmem:[%s4377_s4 + $0xe8] ss:$16 sps:$4 sm:$0xff]   ;;  %v3518_v16 = vld [vmem:[%s4377_s4 + $0xc4] ss:$16 sps:$4 sm:$0xff]   ;;  %v3525_v17 = vld [vmem:[%s4377_s4 + $0xcc] ss:$16 sps:$4 sm:$0xff]  }
  0x35   : > { %4432 = vst [vmem:[#allocation10_spill] sm:$0xff] %v3525_v17  ;;  %v3530_v18 = vld [vmem:[%s4377_s4 + $0xc0] ss:$16 sps:$4 sm:$0xff]   ;;  %v3535_v19 = vld [vmem:[%s4377_s4 + $0xc8] ss:$16 sps:$4 sm:$0xff]  }
  0x36   : > { %606 = vmatpush1.bf16.msra.mxu0 %v2870_v28  ;;  %659 = vmatpush1.bf16.msra.mxu1 %v2871_v29  ;;  %4433 = vst [vmem:[#allocation11_spill] sm:$0xff] %v3530_v18  ;;  %4434 = vst [vmem:[#allocation12_spill] sm:$0xff] %v3535_v19  ;;  %v739_v21 = vld [vmem:[%s3279_s22 + $0x18] sm:$0xff]  ;;  %v3546_v22 = vld [vmem:[%s4377_s4 + $0xa4] ss:$16 sps:$4 sm:$0xff]  }
  0x37   : > { %607 = vmatprep.subr.bf16.mxu0 %v2872_v30  ;;  %660 = vmatprep.subr.bf16.mxu1 %v2874_v31  ;;  %4435 = vst [vmem:[#allocation13_spill] sm:$0xff] %v3546_v22  ;;  %v3551_v23 = vld [vmem:[%s4377_s4 + $0xac] ss:$16 sps:$4 sm:$0xff]   ;;  %v3558_v24 = vld [vmem:[%s4377_s4 + $0xa0] ss:$16 sps:$4 sm:$0xff]   ;;  %v741_v26 = vpack.c.bf16 %v739_v21, %v738_v20 }
  0x38   : > { %4436 = vst [vmem:[#allocation14_spill] sm:$0xff] %v3551_v23  ;;  %4437 = vst [vmem:[#allocation15_spill] sm:$0xff] %v3558_v24  ;;  %v3563_v25 = vld [vmem:[%s4377_s4 + $0xa8] ss:$16 sps:$4 sm:$0xff]   ;;  %v3570_v27 = vld [vmem:[%s4377_s4 + $0x84] ss:$16 sps:$4 sm:$0xff]  }
  0x39   : > { %4438 = vst [vmem:[#allocation16_spill] sm:$0xff] %v3563_v25  ;;  %4439 = vst [vmem:[#allocation17_spill] sm:$0xff] %v3570_v27  ;;  %v3577_v28 = vld [vmem:[%s4377_s4 + $0x8c] ss:$16 sps:$4 sm:$0xff]   ;;  %v3582_v29 = vld [vmem:[%s4377_s4 + $0x80] ss:$16 sps:$4 sm:$0xff]  }
  0x3a   : > { %608 = vmatpush1.bf16.msra.mxu0 %v2876_v32  ;;  %661 = vmatpush1.bf16.msra.mxu1 %v2877_v33  ;;  %4440 = vst [vmem:[#allocation18_spill] sm:$0xff] %v3577_v28  ;;  %4441 = vst [vmem:[#allocation19_spill] sm:$0xff] %v3582_v29  ;;  %v3589_v30 = vld [vmem:[%s4377_s4 + $0x88] ss:$16 sps:$4 sm:$0xff]   ;;  %v3596_v31 = vld [vmem:[%s4377_s4 + $0x64] ss:$16 sps:$4 sm:$0xff]  }
  0x3b   : > { %934 = vmatprep.subr.bf16.mxu0 %v2880_v36  ;;  %987 = vmatprep.subr.bf16.mxu1 %v2883_v37  ;;  %4442 = vst [vmem:[#allocation20_spill] sm:$0xff] %v3589_v30  ;;  %4443 = vst [vmem:[#allocation21_spill] sm:$0xff] %v3596_v31  ;;  %v3601_v32 = vld [vmem:[%s4377_s4 + $0x6c] ss:$16 sps:$4 sm:$0xff]   ;;  %v3608_v33 = vld [vmem:[%s4377_s4 + $0x60] ss:$16 sps:$4 sm:$0xff]  }
  0x3c   : > { %4444 = vst [vmem:[#allocation22_spill] sm:$0xff] %v3601_v32  ;;  %4445 = vst [vmem:[#allocation23_spill] sm:$0xff] %v3608_v33  ;;  %v3613_v34 = vld [vmem:[%s4377_s4 + $0x68] ss:$16 sps:$4 sm:$0xff]   ;;  %v3620_v35 = vld [vmem:[%s4377_s4 + $0x44] ss:$16 sps:$4 sm:$0xff]  }
  0x3d   : > { %626 = vmatmul.mubr.bf16.vlgmr.msra.gmra.mxu0 %v399_v38  ;;  %679 = vmatmul.mubr.bf16.vlgmr.msra.gmra.mxu1 %v399_v38  ;;  %4446 = vst [vmem:[#allocation24_spill] sm:$0xff] %v3613_v34  ;;  %4447 = vst [vmem:[#allocation25_spill] sm:$0xff] %v3620_v35  ;;  %v3627_v36 = vld [vmem:[%s4377_s4 + $0x4c] ss:$16 sps:$4 sm:$0xff]   ;;  %v3632_v37 = vld [vmem:[%s4377_s4 + $0x40] ss:$16 sps:$4 sm:$0xff]  }
  0x3e   : > { %935 = vmatpush1.bf16.msra.mxu0 %v2878_v39  ;;  %988 = vmatpush1.bf16.msra.mxu1 %v2881_v40  ;;  %4448 = vst [vmem:[#allocation26_spill] sm:$0xff] %v3627_v36  ;;  %4449 = vst [vmem:[#allocation27_spill] sm:$0xff] %v3632_v37  ;;  %v3639_v38 = vld [vmem:[%s4377_s4 + $0x48] ss:$16 sps:$4 sm:$0xff]   ;;  %v3646_v39 = vld [vmem:[%s4377_s4 + $0x24] ss:$16 sps:$4 sm:$0xff]  }
  0x3f   : > { %936 = vmatprep.subr.bf16.mxu0 %v2886_v41  ;;  %989 = vmatprep.subr.bf16.mxu1 %v2889_v42  ;;  %4450 = vst [vmem:[#allocation28_spill] sm:$0xff] %v3639_v38  ;;  %4451 = vst [vmem:[#allocation29_spill] sm:$0xff] %v3646_v39  ;;  %v3651_v40 = vld [vmem:[%s4377_s4 + $0x2c] ss:$16 sps:$4 sm:$0xff]   ;;  %v3658_v41 = vld [vmem:[%s4377_s4 + $0x20] ss:$16 sps:$4 sm:$0xff]  }
  0x40   : > { %635 = vmatprep.mubr.bf16.mxu0 %v4383_v3  ;;  %688 = vmatprep.mubr.bf16.mxu1 %v4383_v3  ;;  %4452 = vst [vmem:[#allocation30_spill] sm:$0xff] %v3651_v40  ;;  %4453 = vst [vmem:[#allocation31_spill] sm:$0xff] %v3658_v41  ;;  %v3663_v42 = vld [vmem:[%s4377_s4 + $0x28] ss:$16 sps:$4 sm:$0xff]   ;;  %v1173_v47 = vld [vmem:[#allocation2] sm:$0xff] }
  0x41   : > { %4454 = vst [vmem:[#allocation32_spill] sm:$0xff] %v3663_v42  ;;  %v3687_v46 = vld [vmem:[%s4377_s4 + $0x8] ss:$16 sps:$4 sm:$0xff]   ;;  %v3840_v10 = vld [vmem:[%s4378_s5 + $0x24] ss:$16 sps:$4 sm:$0xff]  }
  0x42   : > { %937 = vmatpush1.bf16.msra.mxu0 %v2884_v43  ;;  %990 = vmatpush1.bf16.msra.mxu1 %v2887_v44  ;;  %v3670_v43 = vld [vmem:[%s4377_s4 + $0x4] ss:$16 sps:$4 sm:$0xff]   ;;  %v3675_v44 = vld [vmem:[%s4377_s4 + $0xc] ss:$16 sps:$4 sm:$0xff]   ;;  %4458 = vst [vmem:[#allocation36_spill] sm:$0xff] %v3687_v46  ;;  %4461 = vst [vmem:[#allocation39_spill] sm:$0xff] %v3840_v10 }
  0x43   : > { %938 = vmatprep.subr.bf16.mxu0 %v2892_v45  ;;  %991 = vmatprep.subr.bf16.mxu1 %v2895_v48  ;;  %4455 = vst [vmem:[#allocation33_spill] sm:$0xff] %v3670_v43  ;;  %4456 = vst [vmem:[#allocation34_spill] sm:$0xff] %v3675_v44  ;;  %v3682_v45 = vld [vmem:[%s4377_s4] ss:$16 sps:$4 sm:$0xff]   ;;  %v3694_v48 = vld [vmem:[%s4378_s5 + $0xe4] ss:$16 sps:$4 sm:$0xff]  }
  0x44   : > { %4457 = vst [vmem:[#allocation35_spill] sm:$0xff] %v3682_v45  ;;  %4459 = vst [vmem:[#allocation37_spill] sm:$0xff] %v3694_v48  ;;  %v3833_v9 = vld [vmem:[%s4378_s5 + $0x48] ss:$16 sps:$4 sm:$0xff]   ;;  %v3852_v20 = vld [vmem:[%s4378_s5 + $0x20] ss:$16 sps:$4 sm:$0xff]  }
  0x45   : > { %636 = vmatmul.mubr.bf16.gmra.mxu0 %v400_v51  ;;  %689 = vmatmul.mubr.bf16.gmra.mxu1 %v400_v51  ;;  %v3706_v51 = vld [vmem:[%s4378_s5 + $0xe0] ss:$16 sps:$4 sm:$0xff]   ;;  %v3857_v21 = vld [vmem:[%s4378_s5 + $0x28] ss:$16 sps:$4 sm:$0xff]  }
  0x46   : > { %939 = vmatpush1.bf16.msra.mxu0 %v2890_v49  ;;  %992 = vmatpush1.bf16.msra.mxu1 %v2893_v50  ;;  %v3699_v49 = vld [vmem:[%s4378_s5 + $0xec] ss:$16 sps:$4 sm:$0xff]   ;;  %v1184_v50 = vpack.c.bf16 %v1173_v47, %v1173_v47 }
  0x47   : > { %940 = vmatprep.subr.bf16.mxu0 %v2898_v52  ;;  %993 = vmatprep.subr.bf16.mxu1 %v2901_v53  ;;  %4460 = vst [vmem:[#allocation38_spill] sm:$0xff] %v3699_v49  ;;  %v3711_v52 = vld [vmem:[%s4378_s5 + $0xe8] ss:$16 sps:$4 sm:$0xff]   ;;  %v3718_v53 = vld [vmem:[%s4378_s5 + $0xc4] ss:$16 sps:$4 sm:$0xff]  }
  0x48   : > { %966 = vmatprep.mubr.bf16.mxu0 %v4383_v3  ;;  %1019 = vmatprep.mubr.bf16.mxu1 %v4383_v3  ;;  %v3869_v47 = vld [vmem:[%s4378_s5 + $0xc] ss:$16 sps:$4 sm:$0xff]  }
  0x49   : > { %4463 = vst [vmem:[#allocation41_spill] sm:$0xff] %v3869_v47 }
  0x4a   : > { %941 = vmatpush1.bf16.msra.mxu0 %v2896_v54  ;;  %994 = vmatpush1.bf16.msra.mxu1 %v2899_v55  ;;  %v3723_v54 = vld [vmem:[%s4378_s5 + $0xcc] ss:$16 sps:$4 sm:$0xff]   ;;  %v3730_v55 = vld [vmem:[%s4378_s5 + $0xc0] ss:$16 sps:$4 sm:$0xff]  }
  0x4b   : > { %942 = vmatprep.subr.bf16.mxu0 %v2904_v56  ;;  %995 = vmatprep.subr.bf16.mxu1 %v2907_v57  ;;  %v3735_v56 = vld [vmem:[%s4378_s5 + $0xc8] ss:$16 sps:$4 sm:$0xff]   ;;  %v3742_v57 = vld [vmem:[%s4378_s5 + $0xa4] ss:$16 sps:$4 sm:$0xff]  }
  0x4e   : > { %943 = vmatpush1.bf16.msra.mxu0 %v2902_v58  ;;  %996 = vmatpush1.bf16.msra.mxu1 %v2905_v59  ;;  %v3747_v58 = vld [vmem:[%s4378_s5 + $0xac] ss:$16 sps:$4 sm:$0xff]   ;;  %v3756_v59 = vld [vmem:[%s4378_s5 + $0xa0] ss:$16 sps:$4 sm:$0xff]  }
  0x4f   : > { %944 = vmatprep.subr.bf16.mxu0 %v2910_v60  ;;  %997 = vmatprep.subr.bf16.mxu1 %v2913_v61  ;;  %v3761_v60 = vld [vmem:[%s4378_s5 + $0xa8] ss:$16 sps:$4 sm:$0xff]   ;;  %v3768_v61 = vld [vmem:[%s4378_s5 + $0x84] ss:$16 sps:$4 sm:$0xff]  }
  0x52   : > { %945 = vmatpush1.bf16.msra.mxu0 %v2908_v62  ;;  %998 = vmatpush1.bf16.msra.mxu1 %v2911_v63  ;;  %v3773_v62 = vld [vmem:[%s4378_s5 + $0x8c] ss:$16 sps:$4 sm:$0xff]   ;;  %v3780_v63 = vld [vmem:[%s4378_s5 + $0x80] ss:$16 sps:$4 sm:$0xff]  }
  0x53   : > { %946 = vmatprep.subr.bf16.mxu0 %v2916_v0  ;;  %999 = vmatprep.subr.bf16.mxu1 %v2919_v1  ;;  %v3785_v0 = vld [vmem:[%s4378_s5 + $0x88] ss:$16 sps:$4 sm:$0xff]   ;;  %v3792_v1 = vld [vmem:[%s4378_s5 + $0x64] ss:$16 sps:$4 sm:$0xff]  }
  0x56   : > { %947 = vmatpush1.bf16.msra.mxu0 %v2914_v2  ;;  %1000 = vmatpush1.bf16.msra.mxu1 %v2917_v4  ;;  %v3797_v2 = vld [vmem:[%s4378_s5 + $0x6c] ss:$16 sps:$4 sm:$0xff]   ;;  %v3804_v4 = vld [vmem:[%s4378_s5 + $0x60] ss:$16 sps:$4 sm:$0xff]  }
  0x57   : > { %948 = vmatprep.subr.bf16.mxu0 %v2922_v5  ;;  %1001 = vmatprep.subr.bf16.mxu1 %v2925_v6  ;;  %v3809_v5 = vld [vmem:[%s4378_s5 + $0x68] ss:$16 sps:$4 sm:$0xff]   ;;  %v3816_v6 = vld [vmem:[%s4378_s5 + $0x44] ss:$16 sps:$4 sm:$0xff]  }
  0x5a   : > { %949 = vmatpush1.bf16.msra.mxu0 %v2920_v7  ;;  %1002 = vmatpush1.bf16.msra.mxu1 %v2923_v8  ;;  %v3821_v7 = vld [vmem:[%s4378_s5 + $0x4c] ss:$16 sps:$4 sm:$0xff]   ;;  %v3828_v8 = vld [vmem:[%s4378_s5 + $0x40] ss:$16 sps:$4 sm:$0xff]  }
  0x5b   : > { %1345 = vmatprep.subr.bf16.mxu0 %v3498_v11  ;;  %1386 = vmatprep.subr.bf16.mxu1 %v3503_v12 }
  0x5d   : > { %967 = vmatmul.mubr.bf16.vlgmr.msra.gmra.mxu0 %v740_v13  ;;  %1020 = vmatmul.mubr.bf16.vlgmr.msra.gmra.mxu1 %v740_v13  ;;  %v3845_v13 = vld [vmem:[%s4378_s5 + $0x2c] ss:$16 sps:$4 sm:$0xff]  }
  0x5e   : > { %1346 = vmatpush1.bf16.msra.mxu0 %v3508_v14  ;;  %1387 = vmatpush1.bf16.msra.mxu1 %v3513_v15  ;;  %4462 = vst [vmem:[#allocation40_spill] sm:$0xff] %v3845_v13 }
  0x5f   : > { %1347 = vmatprep.subr.bf16.mxu0 %v3518_v16  ;;  %1388 = vmatprep.subr.bf16.mxu1 %v3525_v17 }
  0x60   : > { %976 = vmatprep.mubr.bf16.mxu0 %v4383_v3  ;;  %1029 = vmatprep.mubr.bf16.mxu1 %v4383_v3 }
  0x62   : > { %1348 = vmatpush1.bf16.msra.mxu0 %v3530_v18  ;;  %1389 = vmatpush1.bf16.msra.mxu1 %v3535_v19 }
  0x63   : > { %1349 = vmatprep.subr.bf16.mxu0 %v3546_v22  ;;  %1390 = vmatprep.subr.bf16.mxu1 %v3551_v23 }
  0x65   : > { %977 = vmatmul.mubr.bf16.gmra.mxu0 %v741_v26  ;;  %1030 = vmatmul.mubr.bf16.gmra.mxu1 %v741_v26  ;;  %v3864_v26 = vld [vmem:[%s4378_s5 + $0x4] ss:$16 sps:$4 sm:$0xff]  }
  0x66   : > { %1350 = vmatpush1.bf16.msra.mxu0 %v3558_v24  ;;  %1391 = vmatpush1.bf16.msra.mxu1 %v3563_v25 }
  0x67   : > { %1351 = vmatprep.subr.bf16.mxu0 %v3570_v27  ;;  %1392 = vmatprep.subr.bf16.mxu1 %v3577_v28 }
  0x68   : > { %1377 = vmatprep.mubr.bf16.mxu0 %v4383_v3  ;;  %1418 = vmatprep.mubr.bf16.mxu1 %v4383_v3 }
  0x6a   : > { %1352 = vmatpush1.bf16.msra.mxu0 %v3582_v29  ;;  %1393 = vmatpush1.bf16.msra.mxu1 %v3589_v30 }
  0x6b   : > { %1353 = vmatprep.subr.bf16.mxu0 %v3596_v31  ;;  %1394 = vmatprep.subr.bf16.mxu1 %v3601_v32 }
  0x6e   : > { %1354 = vmatpush1.bf16.msra.mxu0 %v3608_v33  ;;  %1395 = vmatpush1.bf16.msra.mxu1 %v3613_v34 }
  0x6f   : > { %1355 = vmatprep.subr.bf16.mxu0 %v3620_v35  ;;  %1396 = vmatprep.subr.bf16.mxu1 %v3627_v36 }
  0x72   : > { %1356 = vmatpush1.bf16.msra.mxu0 %v3632_v37  ;;  %1397 = vmatpush1.bf16.msra.mxu1 %v3639_v38 }
  0x73   : > { %1357 = vmatprep.subr.bf16.mxu0 %v3646_v39  ;;  %1398 = vmatprep.subr.bf16.mxu1 %v3651_v40 }
  0x76   : > { %1358 = vmatpush1.bf16.msra.mxu0 %v3658_v41  ;;  %1399 = vmatpush1.bf16.msra.mxu1 %v3663_v42 }
  0x77   : > { %1359 = vmatprep.subr.bf16.mxu0 %v3670_v43  ;;  %1400 = vmatprep.subr.bf16.mxu1 %v3675_v44 }
  0x7a   : > { %1360 = vmatpush1.bf16.msra.mxu0 %v3682_v45  ;;  %1401 = vmatpush1.bf16.msra.mxu1 %v3687_v46 }
  0x7b   : > { %1599 = vmatprep.subr.bf16.mxu0 %v3694_v48  ;;  %1640 = vmatprep.subr.bf16.mxu1 %v3699_v49 }
  0x7d   : > { %1378 = vmatmul.mubr.bf16.vlgmr.msra.gmra.mxu0 %v1184_v50  ;;  %1419 = vmatmul.mubr.bf16.vlgmr.msra.gmra.mxu1 %v1184_v50  ;;  %v3876_v50 = vld [vmem:[%s4378_s5] ss:$16 sps:$4 sm:$0xff]  }
  0x7e   : > { %1600 = vmatpush1.bf16.msra.mxu0 %v3706_v51  ;;  %1641 = vmatpush1.bf16.msra.mxu1 %v3711_v52 }
  0x7f   : > { %1601 = vmatprep.subr.bf16.mxu0 %v3718_v53  ;;  %1642 = vmatprep.subr.bf16.mxu1 %v3723_v54 }
  0x80   : > { %1631 = vmatprep.mubr.bf16.mxu0 %v4383_v3  ;;  %1672 = vmatprep.mubr.bf16.mxu1 %v4383_v3  ;;  %v3881_v3 = vld [vmem:[%s4378_s5 + $0x8] ss:$16 sps:$4 sm:$0xff]  }
  0x82   : > { %1602 = vmatpush1.bf16.msra.mxu0 %v3730_v55  ;;  %1643 = vmatpush1.bf16.msra.mxu1 %v3735_v56 }
  0x83   : > { %1603 = vmatprep.subr.bf16.mxu0 %v3742_v57  ;;  %1644 = vmatprep.subr.bf16.mxu1 %v3747_v58 }
  0x86   : > { %1604 = vmatpush1.bf16.msra.mxu0 %v3756_v59  ;;  %1645 = vmatpush1.bf16.msra.mxu1 %v3761_v60 }
  0x87   : > { %1605 = vmatprep.subr.bf16.mxu0 %v3768_v61  ;;  %1646 = vmatprep.subr.bf16.mxu1 %v3773_v62 }
  0x8a   : > { %1606 = vmatpush1.bf16.msra.mxu0 %v3780_v63  ;;  %1647 = vmatpush1.bf16.msra.mxu1 %v3785_v0 }
  0x8b   : > { %1607 = vmatprep.subr.bf16.mxu0 %v3792_v1  ;;  %1648 = vmatprep.subr.bf16.mxu1 %v3797_v2 }
  0x8e   : > { %1608 = vmatpush1.bf16.msra.mxu0 %v3804_v4  ;;  %1649 = vmatpush1.bf16.msra.mxu1 %v3809_v5 }
  0x8f   : > { %1609 = vmatprep.subr.bf16.mxu0 %v3816_v6  ;;  %1650 = vmatprep.subr.bf16.mxu1 %v3821_v7 }
  0x92   : > { %1610 = vmatpush1.bf16.msra.mxu0 %v3828_v8  ;;  %1651 = vmatpush1.bf16.msra.mxu1 %v3833_v9 }
  0x93   : > { %1611 = vmatprep.subr.bf16.mxu0 %v3840_v10  ;;  %1652 = vmatprep.subr.bf16.mxu1 %v3845_v13  ;;  %v1175_v13 = vld [vmem:[#allocation4] sm:$0xff] }
  0x94   : > { %v1438_v10 = vpack.c.bf16 %v1175_v13, %v1175_v13 }
  0x96   : > { %1612 = vmatpush1.bf16.msra.mxu0 %v3852_v20  ;;  %1653 = vmatpush1.bf16.msra.mxu1 %v3857_v21 }
  0x97   : > { %1613 = vmatprep.subr.bf16.mxu0 %v3864_v26  ;;  %1654 = vmatprep.subr.bf16.mxu1 %v3869_v47  ;;  %v4464_v47 = vmov 0  }
  0x9a   : > { %1614 = vmatpush1.bf16.msra.mxu0 %v3876_v50  ;;  %1655 = vmatpush1.bf16.msra.mxu1 %v3881_v3 }
  0x9b   : > { %1744 = vmatprep.subr.bf16.mxu0 %v3498_v11  ;;  %1785 = vmatprep.subr.bf16.mxu1 %v3503_v12 }
  0x9d   : > { %1632 = vmatmul.mubr.bf16.vlgmr.msra.gmra.mxu0 %v1438_v10  ;;  %1673 = vmatmul.mubr.bf16.vlgmr.msra.gmra.mxu1 %v1438_v10  ;;  %v700_v10 = vlaneseq }
  0x9e   : > { %1745 = vmatpush1.bf16.msra.mxu0 %v3508_v14  ;;  %1786 = vmatpush1.bf16.msra.mxu1 %v3513_v15 }
  0x9f   : > { %1746 = vmatprep.subr.bf16.mxu0 %v3518_v16  ;;  %1787 = vmatprep.subr.bf16.mxu1 %v3525_v17  ;;  %v701_v13 = vshrl.u32 %v700_v10, 7 }
  0xa0   : > { %1776 = vmatprep.mubr.bf16.mxu0 %v4464_v47  ;;  %1817 = vmatprep.mubr.bf16.mxu1 %v4464_v47 }
  0xa2   : > { %1747 = vmatpush1.bf16.msra.mxu0 %v3530_v18  ;;  %1788 = vmatpush1.bf16.msra.mxu1 %v3535_v19 }
  0xa3   : > { %1748 = vmatprep.subr.bf16.mxu0 %v3546_v22  ;;  %1789 = vmatprep.subr.bf16.mxu1 %v3551_v23 }
  0xa6   : > { %1749 = vmatpush1.bf16.msra.mxu0 %v3558_v24  ;;  %1790 = vmatpush1.bf16.msra.mxu1 %v3563_v25 }
  0xa7   : > { %1750 = vmatprep.subr.bf16.mxu0 %v3570_v27  ;;  %1791 = vmatprep.subr.bf16.mxu1 %v3577_v28 }
  0xaa   : > { %1751 = vmatpush1.bf16.msra.mxu0 %v3582_v29  ;;  %1792 = vmatpush1.bf16.msra.mxu1 %v3589_v30 }
  0xab   : > { %1752 = vmatprep.subr.bf16.mxu0 %v3596_v31  ;;  %1793 = vmatprep.subr.bf16.mxu1 %v3601_v32 }
  0xae   : > { %1753 = vmatpush1.bf16.msra.mxu0 %v3608_v33  ;;  %1794 = vmatpush1.bf16.msra.mxu1 %v3613_v34 }
  0xaf   : > { %1754 = vmatprep.subr.bf16.mxu0 %v3620_v35  ;;  %1795 = vmatprep.subr.bf16.mxu1 %v3627_v36 }
  0xb2   : > { %1755 = vmatpush1.bf16.msra.mxu0 %v3632_v37  ;;  %1796 = vmatpush1.bf16.msra.mxu1 %v3639_v38  ;;  %v714_v38 = vsub.s32 3, %v701_v13 }
  0xb3   : > { %1756 = vmatprep.subr.bf16.mxu0 %v3646_v39  ;;  %1797 = vmatprep.subr.bf16.mxu1 %v3651_v40  ;;  %v710_v39 = vsub.s32 2, %v701_v13  ;;  %v702_v40 = vsub.s32 0, %v701_v13 }
  0xb6   : > { %1757 = vmatpush1.bf16.msra.mxu0 %v3658_v41  ;;  %1798 = vmatpush1.bf16.msra.mxu1 %v3663_v42  ;;  %v393_v42 = vld [vmem:[%s4379_s6] sm:$0xf] }
  0xb7   : > { %1758 = vmatprep.subr.bf16.mxu0 %v3670_v43  ;;  %1799 = vmatprep.subr.bf16.mxu1 %v3675_v44  ;;  %v3930_v41 = vrot.slane %v393_v42, %v710_v39  ;;  %v3936_v10 = vrot.slane %v393_v42, %v714_v38 }
  0xba   : > { %1759 = vmatpush1.bf16.msra.mxu0 %v3682_v45  ;;  %1800 = vmatpush1.bf16.msra.mxu1 %v3687_v46  ;;  %v706_v45 = vsub.s32 1, %v701_v13 }
  0xbb   : > { %1838 = vmatprep.subr.bf16.mxu0 %v3694_v48  ;;  %1879 = vmatprep.subr.bf16.mxu1 %v3699_v49  ;;  %v703_v49 = vrot.slane %v393_v42, %v702_v40 }
  0xbc   : > { %v707_v35 = vrot.slane %v393_v42, %v706_v45 }
  0xfd   : > { %v3926_v43 = vpop.f32.mrf.mxu0  ;;  %v3928_v44 = vpop.f32.mrf.mxu1 }
  0xff   : > { %v3932_v46 = vpop.f32.mrf.mxu0  ;;  %v3934_v48 = vpop.f32.mrf.mxu1 }
 0x100   : > { %v723_v17 = vadd.f32 %v3936_v10, %v3934_v48 }
 0x101   : > { %v631_v37 = vpop.f32.mrf.mxu0  ;;  %v684_v36 = vpop.f32.mrf.mxu1 }
 0x102   : > { %v3938_v34 = vadd.f32 %v703_v49, %v631_v37  ;;  %v3941_v33 = vadd.f32 %v3930_v41, %v684_v36 }
 0x103   : > { %v633_v32 = vpop.f32.mrf.mxu0  ;;  %v686_v31 = vpop.f32.mrf.mxu1 }
 0x104   : > { %4465 = vst [vmem:[#allocation42_spill] sm:$0xff] %v3938_v34  ;;  %4466 = vst [vmem:[#allocation43_spill] sm:$0xff] %v3941_v33  ;;  %v3943_v13 = vadd.f32 %v707_v35, %v633_v32  ;;  %v3946_v30 = vadd.f32 %v3936_v10, %v686_v31 }
 0x105   : > { %v637_v29 = vpop.f32.mrf.mxu0  ;;  %v690_v28 = vpop.f32.mrf.mxu1 }
 0x106   : > { %4467 = vst [vmem:[#allocation44_spill] sm:$0xff] %v3943_v13  ;;  %4468 = vst [vmem:[#allocation45_spill] sm:$0xff] %v3946_v30  ;;  %v3948_v27 = vadd.f32 %v703_v49, %v637_v29  ;;  %v3951_v25 = vadd.f32 %v3930_v41, %v690_v28 }
 0x107   : > { %v639_v42 = vpop.f32.mrf.mxu0  ;;  %v692_v37 = vpop.f32.mrf.mxu1 }
 0x108   : > { %4469 = vst [vmem:[#allocation46_spill] sm:$0xff] %v3948_v27  ;;  %4470 = vst [vmem:[#allocation47_spill] sm:$0xff] %v3951_v25  ;;  %v3953_v34 = vadd.f32 %v707_v35, %v639_v42  ;;  %v3956_v36 = vadd.f32 %v3936_v10, %v692_v37  ;;  %v394_v42 = vld [vmem:[%s4380_s7] sm:$0xf] }
 0x109   : > { %v641_v33 = vpop.f32.mrf.mxu0  ;;  %v694_v32 = vpop.f32.mrf.mxu1  ;;  %v1044_v37 = vrot.slane %v394_v42, %v702_v40  ;;  %v3971_v25 = vrot.slane %v394_v42, %v710_v39 }
 0x10a   : > { %4471 = vst [vmem:[#allocation48_spill] sm:$0xff] %v3953_v34  ;;  %4472 = vst [vmem:[#allocation49_spill] sm:$0xff] %v3956_v36  ;;  %v3958_v13 = vadd.f32 %v703_v49, %v641_v33  ;;  %v3961_v31 = vadd.f32 %v3930_v41, %v694_v32  ;;  %v3973_v36 = vrot.slane %v394_v42, %v706_v45 }
 0x10b   : > { %v643_v30 = vpop.f32.mrf.mxu0  ;;  %v696_v29 = vpop.f32.mrf.mxu1  ;;  %v3975_v33 = vrot.slane %v394_v42, %v714_v38 }
 0x10c   : > { %4473 = vst [vmem:[#allocation50_spill] sm:$0xff] %v3958_v13  ;;  %4474 = vst [vmem:[#allocation51_spill] sm:$0xff] %v3961_v31  ;;  %v3963_v27 = vadd.f32 %v707_v35, %v643_v30  ;;  %v3966_v28 = vadd.f32 %v3936_v10, %v696_v29  ;;  %v1174_v10 = vld [vmem:[#allocation3] sm:$0xff] }
 0x10e   : > { %4475 = vst [vmem:[#allocation52_spill] sm:$0xff] %v3963_v27  ;;  %4476 = vst [vmem:[#allocation53_spill] sm:$0xff] %v3966_v28 }
 0x11d   : > { %v968_v32 = vpop.f32.mrf.mxu0  ;;  %v1021_v31 = vpop.f32.mrf.mxu1 }
 0x11e   : > { %v3977_v13 = vadd.f32 %v1044_v37, %v968_v32  ;;  %v3980_v30 = vadd.f32 %v3971_v25, %v1021_v31 }
 0x11f   : > { %v970_v29 = vpop.f32.mrf.mxu0  ;;  %v1023_v28 = vpop.f32.mrf.mxu1 }
 0x120   : > { %4477 = vst [vmem:[#allocation54_spill] sm:$0xff] %v3977_v13  ;;  %4478 = vst [vmem:[#allocation55_spill] sm:$0xff] %v3980_v30  ;;  %v3983_v27 = vadd.f32 %v3973_v36, %v970_v29  ;;  %v3986_v40 = vadd.f32 %v3975_v33, %v1023_v28 }
 0x121   : > { %v972_v39 = vpop.f32.mrf.mxu0  ;;  %v1025_v45 = vpop.f32.mrf.mxu1 }
 0x122   : > { %4479 = vst [vmem:[#allocation56_spill] sm:$0xff] %v3983_v27  ;;  %4480 = vst [vmem:[#allocation57_spill] sm:$0xff] %v3986_v40  ;;  %v3988_v34 = vadd.f32 %v1044_v37, %v972_v39  ;;  %v3991_v38 = vadd.f32 %v3971_v25, %v1025_v45 }
 0x123   : > { %v974_v42 = vpop.f32.mrf.mxu0  ;;  %v1027_v32 = vpop.f32.mrf.mxu1 }
 0x124   : > { %4481 = vst [vmem:[#allocation58_spill] sm:$0xff] %v3988_v34  ;;  %4482 = vst [vmem:[#allocation59_spill] sm:$0xff] %v3991_v38  ;;  %v3994_v31 = vadd.f32 %v3973_v36, %v974_v42  ;;  %v3997_v30 = vadd.f32 %v3975_v33, %v1027_v32 }
 0x125   : > { %v978_v29 = vpop.f32.mrf.mxu0  ;;  %v1031_v27 = vpop.f32.mrf.mxu1 }
 0x126   : > { %4483 = vst [vmem:[#allocation60_spill] sm:$0xff] %v3994_v31  ;;  %4484 = vst [vmem:[#allocation61_spill] sm:$0xff] %v3997_v30  ;;  %v3999_v13 = vadd.f32 %v1044_v37, %v978_v29  ;;  %v4002_v28 = vadd.f32 %v3971_v25, %v1031_v27  ;;  %v720_v30 = vadd.f32 %v703_v49, %v3926_v43 }
 0x127   : > { %v980_v39 = vpop.f32.mrf.mxu0  ;;  %v1033_v40 = vpop.f32.mrf.mxu1  ;;  %v722_v49 = vadd.f32 %v3930_v41, %v3928_v44 }
 0x128   : > { %4485 = vst [vmem:[#allocation62_spill] sm:$0xff] %v3999_v13  ;;  %4486 = vst [vmem:[#allocation63_spill] sm:$0xff] %v4002_v28  ;;  %v4005_v45 = vadd.f32 %v3973_v36, %v980_v39  ;;  %v4008_v38 = vadd.f32 %v3975_v33, %v1033_v40  ;;  %v721_v13 = vadd.f32 %v707_v35, %v3932_v46 }
 0x129   : > { %v1035_v42 = vpop.f32.mrf.mxu1  ;;  %v982_v31 = vpop.f32.mrf.mxu0 }
 0x12a   : > { %4487 = vst [vmem:[#allocation64_spill] sm:$0xff] %v4005_v45  ;;  %4488 = vst [vmem:[#allocation65_spill] sm:$0xff] %v4008_v38 }
 0x12b   : > { %v1037_v34 = vpop.f32.mrf.mxu1  ;;  %v984_v32 = vpop.f32.mrf.mxu0 }
 0x12c   : > { %v1074_v48 = vadd.f32 %v3973_v36, %v984_v32  ;;  %v1076_v36 = vadd.f32 %v3975_v33, %v1037_v34 }
 0x13d   : > { %v1379_v24 = vpop.f32.mrf.mxu0  ;;  %v1420_v29 = vpop.f32.mrf.mxu1 }
 0x13e   : > { %v1427_v27 = vadd.f32 %v1379_v24, %v720_v30  ;;  %v1429_v46 = vadd.f32 %v1420_v29, %v722_v49 }
 0x13f   : > { %v1381_v28 = vpop.f32.mrf.mxu0  ;;  %v1422_v23 = vpop.f32.mrf.mxu1 }
 0x140   : > { %v2756_v22 = vmul.f32 -1.442695, %v1427_v27  ;;  %v1428_v19 = vadd.f32 %v1381_v28, %v721_v13  ;;  %v1430_v43 = vadd.f32 %v1422_v23, %v723_v17 }
 0x141   : > { %v1383_v39 = vpop.f32.mrf.mxu0  ;;  %v1424_v45 = vpop.f32.mrf.mxu1 }
 0x142   : > { %3022 = vpow2.f32 %v2756_v22  ;;  %v2757_v40 = vmul.f32 -1.442695, %v1428_v19  ;;  %v2758_v35 = vmul.f32 -1.442695, %v1430_v43  ;;  %v1073_v19 = vadd.f32 %v1044_v37, %v982_v31 }
 0x143   : > { %v1384_v38 = vpop.f32.mrf.mxu0  ;;  %v1425_v18 = vpop.f32.mrf.mxu1 }
 0x144   : > { %3024 = vpow2.f32 %v2757_v40 }
 0x145   : > { %3026 = vpow2.f32 %v2758_v35 }
 0x14f   : > { %v3023_v24 = vpop.eup %3022 }
 0x150   : > { %v1688_v30 = vadd.f32 1.0, %v3023_v24 }
 0x151   : > { %v3025_v27 = vpop.eup %3024 }
 0x152   : > { %3028 = vrcp.f32 %v1688_v30  ;;  %v1694_v13 = vadd.f32 1.0, %v3025_v27  ;;  %v3027_v38 = vpop.eup %3026  ;;  %v1075_v27 = vadd.f32 %v3971_v25, %v1035_v42  ;;  %v1176_v42 = vld [vmem:[#allocation5] sm:$0xff] }
 0x153   : > { %3030 = vtanh.f32 %v1429_v46  ;;  %v1701_v40 = vadd.f32 1.0, %v3027_v38 }
 0x154   : > { %3032 = vrcp.f32 %v1694_v13 }
 0x15d   : > { %v1633_v18 = vpop.f32.mrf.mxu0  ;;  %v1674_v22 = vpop.f32.mrf.mxu1 }
 0x15e   : > { %v1681_v17 = vadd.f32 %v1633_v18, %v1073_v19  ;;  %v1683_v18 = vadd.f32 %v1674_v22, %v1075_v27  ;;  %v4498_v27 = vld [vmem:[#allocation15_spill] sm:$0xff] }
 0x15f   : > { %v3029_v23 = vpop.eup %3028  ;;  %v1635_v41 = vpop.f32.mrf.mxu0 }
 0x160   : > { %v1676_v44 = vpop.f32.mrf.mxu1  ;;  %v3031_v28 = vpop.eup %3030  ;;  %v2759_v45 = vmul.f32 -1.442695, %v1681_v17  ;;  %v1682_v29 = vadd.f32 %v1635_v41, %v1074_v48 }
 0x161   : > { %v3033_v39 = vpop.eup %3032  ;;  %v1637_v43 = vpop.f32.mrf.mxu0  ;;  %v1705_v35 = vmul.f32 %v3031_v28, %v3029_v23  ;;  %v1684_v32 = vadd.f32 %v1676_v44, %v1076_v36  ;;  %v4494_v36 = vld [vmem:[#allocation11_spill] sm:$0xff] }
 0x162   : > { %v1678_v49 = vpop.f32.mrf.mxu1  ;;  %v1704_v24 = vmul.f32 %v3033_v39, %v1174_v10  ;;  %3034 = vpow2.f32 %v2759_v45  ;;  %v2760_v37 = vmul.f32 -1.442695, %v1682_v29  ;;  %v4490_v43 = vld [vmem:[#allocation40_spill] sm:$0xff] }
 0x163   : > { %v1638_v31 = vpop.f32.mrf.mxu0  ;;  %v2761_v13 = vmul.f32 -1.442695, %v1684_v32  ;;  %v4495_v32 = vld [vmem:[#allocation12_spill] sm:$0xff] }
 0x164   : > { %v1679_v46 = vpop.f32.mrf.mxu1  ;;  %v4017_v30 = vadd.f32 %v1705_v35, %v1704_v24  ;;  %3036 = vpow2.f32 %v2760_v37  ;;  %v4491_v35 = vld [vmem:[#allocation41_spill] sm:$0xff] }
 0x165   : > { %3038 = vrcp.f32 %v1701_v40  ;;  %v4489_v40 = vld [vmem:[#allocation39_spill] sm:$0xff]  ;;  %v4493_v46 = vld [vmem:[#allocation10_spill] sm:$0xff] }
 0x166   : > { %3040 = vtanh.f32 %v4017_v30 }
 0x167   : > { %3042 = vpow2.f32 %v2761_v13  ;;  %v4502_v13 = vld [vmem:[#allocation19_spill] sm:$0xff] }
 0x16f   : > { %v3035_v19 = vpop.eup %3034 }
 0x170   : > { %v1712_v38 = vadd.f32 1.0, %v3035_v19  ;;  %v4503_v19 = vld [vmem:[#allocation20_spill] sm:$0xff] }
 0x171   : > { %v3037_v48 = vpop.eup %3036 }
 0x172   : > { %v3039_v17 = vpop.eup %3038  ;;  %3044 = vrcp.f32 %v1712_v38  ;;  %v1718_v23 = vadd.f32 1.0, %v3037_v48  ;;  %v4505_v38 = vld [vmem:[#allocation22_spill] sm:$0xff]  ;;  %v4506_v48 = vld [vmem:[#allocation23_spill] sm:$0xff] }
 0x173   : > { %v3041_v10 = vpop.eup %3040  ;;  %3046 = vtanh.f32 %v1683_v18  ;;  %v4504_v18 = vld [vmem:[#allocation21_spill] sm:$0xff] }
 0x174   : > { %3048 = vrcp.f32 %v1718_v23  ;;  %v4022_v41 = vmul.f32 %v3041_v10, %v3039_v17  ;;  %v3043_v25 = vpop.eup %3042  ;;  %v4507_v17 = vld [vmem:[#allocation24_spill] sm:$0xff]  ;;  %v4508_v23 = vld [vmem:[#allocation25_spill] sm:$0xff]  ;;  %v4509_v10 = vld [vmem:[#allocation26_spill] sm:$0xff] }
 0x175   : > { %v1725_v28 = vadd.f32 1.0, %v3043_v25  ;;  %v4511_v25 = vld [vmem:[#allocation28_spill] sm:$0xff] }
 0x176   : > { %v1743_v34 = vpack.c.bf16 %v4022_v41, %v4022_v41 }
 0x177   : > { %3050 = vrcp.f32 %v1725_v28  ;;  %v4516_v28 = vld [vmem:[#allocation33_spill] sm:$0xff] }
 0x178   : > { %1777 = vmatmul.mubr.bf16.vlgmr.msra.gmra.mxu0 %v1743_v34  ;;  %1818 = vmatmul.mubr.bf16.vlgmr.msra.gmra.mxu1 %v1743_v34  ;;  %v4510_v34 = vld [vmem:[#allocation27_spill] sm:$0xff] }
 0x179   : > { %1839 = vmatpush1.bf16.msra.mxu0 %v3706_v51  ;;  %1880 = vmatpush1.bf16.msra.mxu1 %v3711_v52 }
 0x17a   : > { %1840 = vmatprep.subr.bf16.mxu0 %v3718_v53  ;;  %1881 = vmatprep.subr.bf16.mxu1 %v3723_v54 }
 0x17b   : > { %1870 = vmatprep.mubr.bf16.mxu0 %v4464_v47  ;;  %1911 = vmatprep.mubr.bf16.mxu1 %v4464_v47 }
 0x17d   : > { %1841 = vmatpush1.bf16.msra.mxu0 %v3730_v55  ;;  %1882 = vmatpush1.bf16.msra.mxu1 %v3735_v56 }
 0x17e   : > { %1842 = vmatprep.subr.bf16.mxu0 %v3742_v57  ;;  %1883 = vmatprep.subr.bf16.mxu1 %v3747_v58 }
 0x17f   : > { %v3045_v33 = vpop.eup %3044 }
 0x180   : > { %v3047_v22 = vpop.eup %3046 }
 0x181   : > { %v3049_v44 = vpop.eup %3048  ;;  %1843 = vmatpush1.bf16.msra.mxu0 %v3756_v59  ;;  %1884 = vmatpush1.bf16.msra.mxu1 %v3761_v60  ;;  %v1729_v45 = vmul.f32 %v3047_v22, %v3045_v33  ;;  %v4512_v33 = vld [vmem:[#allocation29_spill] sm:$0xff]  ;;  %v4514_v22 = vld [vmem:[#allocation31_spill] sm:$0xff] }
 0x182   : > { %v1728_v29 = vmul.f32 %v3049_v44, %v1176_v42  ;;  %1844 = vmatprep.subr.bf16.mxu0 %v3768_v61  ;;  %1885 = vmatprep.subr.bf16.mxu1 %v3773_v62  ;;  %v4513_v42 = vld [vmem:[#allocation30_spill] sm:$0xff]  ;;  %v4515_v44 = vld [vmem:[#allocation32_spill] sm:$0xff] }
 0x184   : > { %v4040_v39 = vadd.f32 %v1729_v45, %v1728_v29  ;;  %v3051_v49 = vpop.eup %3050  ;;  %v4517_v45 = vld [vmem:[#allocation34_spill] sm:$0xff]  ;;  %v4518_v29 = vld [vmem:[#allocation35_spill] sm:$0xff] }
 0x185   : > { %1845 = vmatpush1.bf16.msra.mxu0 %v3780_v63  ;;  %1886 = vmatpush1.bf16.msra.mxu1 %v3785_v0 }
 0x186   : > { %1846 = vmatprep.subr.bf16.mxu0 %v3792_v1  ;;  %1887 = vmatprep.subr.bf16.mxu1 %v3797_v2  ;;  %3052 = vtanh.f32 %v4040_v39 }
 0x189   : > { %1847 = vmatpush1.bf16.msra.mxu0 %v3804_v4  ;;  %1888 = vmatpush1.bf16.msra.mxu1 %v3809_v5 }
 0x18a   : > { %1848 = vmatprep.subr.bf16.mxu0 %v3816_v6  ;;  %1889 = vmatprep.subr.bf16.mxu1 %v3821_v7 }
 0x18d   : > { %1849 = vmatpush1.bf16.msra.mxu0 %v3828_v8  ;;  %1890 = vmatpush1.bf16.msra.mxu1 %v3833_v9 }
 0x18e   : > { %1850 = vmatprep.subr.bf16.mxu0 %v4489_v40  ;;  %1891 = vmatprep.subr.bf16.mxu1 %v4490_v43 }
 0x191   : > { %1851 = vmatpush1.bf16.msra.mxu0 %v3852_v20  ;;  %1892 = vmatpush1.bf16.msra.mxu1 %v3857_v21 }
 0x192   : > { %1852 = vmatprep.subr.bf16.mxu0 %v3864_v26  ;;  %1893 = vmatprep.subr.bf16.mxu1 %v4491_v35 }
 0x193   : > { %v3053_v24 = vpop.eup %3052 }
 0x194   : > { %v4059_v37 = vmul.f32 %v3053_v24, %v3051_v49  ;;  %v4519_v49 = vld [vmem:[#allocation36_spill] sm:$0xff]  ;;  %v4520_v24 = vld [vmem:[#allocation37_spill] sm:$0xff] }
 0x195   : > { %1853 = vmatpush1.bf16.msra.mxu0 %v3876_v50  ;;  %1894 = vmatpush1.bf16.msra.mxu1 %v3881_v3 }
 0x196   : > { %4492 = vst [vmem:[#allocation39_spill] sm:$0xff] %v4059_v37  ;;  %v1837_v31 = vpack.c.bf16 %v4059_v37, %v4059_v37  ;;  %1983 = vmatprep.subr.bf16.mxu0 %v3498_v11  ;;  %2024 = vmatprep.subr.bf16.mxu1 %v3503_v12  ;;  %v4496_v11 = vld [vmem:[#allocation13_spill] sm:$0xff]  ;;  %v4497_v12 = vld [vmem:[#allocation14_spill] sm:$0xff] }
 0x198   : > { %1871 = vmatmul.mubr.bf16.vlgmr.msra.gmra.mxu0 %v1837_v31  ;;  %1912 = vmatmul.mubr.bf16.vlgmr.msra.gmra.mxu1 %v1837_v31  ;;  %v4521_v31 = vld [vmem:[#allocation38_spill] sm:$0xff] }
 0x199   : > { %1984 = vmatpush1.bf16.msra.mxu0 %v3508_v14  ;;  %2025 = vmatpush1.bf16.msra.mxu1 %v3513_v15  ;;  %v4499_v14 = vld [vmem:[#allocation16_spill] sm:$0xff]  ;;  %v4500_v15 = vld [vmem:[#allocation17_spill] sm:$0xff] }
 0x19a   : > { %1985 = vmatprep.subr.bf16.mxu0 %v3518_v16  ;;  %2026 = vmatprep.subr.bf16.mxu1 %v4493_v46  ;;  %v4501_v16 = vld [vmem:[#allocation18_spill] sm:$0xff] }
 0x19b   : > { %2015 = vmatprep.mubr.bf16.mxu0 %v4464_v47  ;;  %2056 = vmatprep.mubr.bf16.mxu1 %v4464_v47 }
 0x19d   : > { %1986 = vmatpush1.bf16.msra.mxu0 %v4494_v36  ;;  %2027 = vmatpush1.bf16.msra.mxu1 %v4495_v32  ;;  %v4522_v32 = vld [vmem:[#allocation42_spill] sm:$0xff] }
 0x19e   : > { %1987 = vmatprep.subr.bf16.mxu0 %v4496_v11  ;;  %2028 = vmatprep.subr.bf16.mxu1 %v4497_v12 }
 0x1a1   : > { %1988 = vmatpush1.bf16.msra.mxu0 %v4498_v27  ;;  %2029 = vmatpush1.bf16.msra.mxu1 %v4499_v14 }
 0x1a2   : > { %1989 = vmatprep.subr.bf16.mxu0 %v4500_v15  ;;  %2030 = vmatprep.subr.bf16.mxu1 %v4501_v16  ;;  %v4523_v15 = vld [vmem:[#allocation44_spill] sm:$0xff] }
 0x1a5   : > { %1990 = vmatpush1.bf16.msra.mxu0 %v4502_v13  ;;  %2031 = vmatpush1.bf16.msra.mxu1 %v4503_v19 }
 0x1a6   : > { %1991 = vmatprep.subr.bf16.mxu0 %v4504_v18  ;;  %2032 = vmatprep.subr.bf16.mxu1 %v4505_v38 }
 0x1a9   : > { %1992 = vmatpush1.bf16.msra.mxu0 %v4506_v48  ;;  %2033 = vmatpush1.bf16.msra.mxu1 %v4507_v17  ;;  %v4524_v17 = vld [vmem:[#allocation45_spill] sm:$0xff] }
 0x1aa   : > { %1993 = vmatprep.subr.bf16.mxu0 %v4508_v23  ;;  %2034 = vmatprep.subr.bf16.mxu1 %v4509_v10  ;;  %v4525_v10 = vld [vmem:[#allocation43_spill] sm:$0xff] }
 0x1ad   : > { %1994 = vmatpush1.bf16.msra.mxu0 %v4510_v34  ;;  %2035 = vmatpush1.bf16.msra.mxu1 %v4511_v25 }
 0x1ae   : > { %1995 = vmatprep.subr.bf16.mxu0 %v4512_v33  ;;  %2036 = vmatprep.subr.bf16.mxu1 %v4513_v42 }
 0x1b1   : > { %1996 = vmatpush1.bf16.msra.mxu0 %v4514_v22  ;;  %2037 = vmatpush1.bf16.msra.mxu1 %v4515_v44 }
 0x1b2   : > { %1997 = vmatprep.subr.bf16.mxu0 %v4516_v28  ;;  %2038 = vmatprep.subr.bf16.mxu1 %v4517_v45 }
 0x1b5   : > { %1998 = vmatpush1.bf16.msra.mxu0 %v4518_v29  ;;  %2039 = vmatpush1.bf16.msra.mxu1 %v4519_v49 }
 0x1b6   : > { %2076 = vmatprep.subr.bf16.mxu0 %v4520_v24  ;;  %2117 = vmatprep.subr.bf16.mxu1 %v4521_v31 }
 0x238   : > { %v1778_v46 = vpop.f32.mrf.mxu0  ;;  %v1819_v36 = vpop.f32.mrf.mxu1 }
 0x239   : > { %v1826_v11 = vadd.f32 %v1778_v46, %v4522_v32  ;;  %v1828_v34 = vadd.f32 %v1819_v36, %v4525_v10 }
 0x23a   : > { %v1780_v12 = vpop.f32.mrf.mxu0  ;;  %v1821_v27 = vpop.f32.mrf.mxu1 }
 0x23b   : > { %v2762_v14 = vmul.f32 -1.442695, %v1826_v11  ;;  %v1827_v16 = vadd.f32 %v1780_v12, %v4523_v15  ;;  %v1829_v23 = vadd.f32 %v1821_v27, %v4524_v17 }
 0x23c   : > { %v1782_v13 = vpop.f32.mrf.mxu0  ;;  %v1823_v19 = vpop.f32.mrf.mxu1 }
 0x23d   : > { %3054 = vpow2.f32 %v2762_v14  ;;  %v2763_v18 = vmul.f32 -1.442695, %v1827_v16  ;;  %v2764_v37 = vmul.f32 -1.442695, %v1829_v23  ;;  %v4526_v16 = vld [vmem:[#allocation62_spill] sm:$0xff] }
 0x23e   : > { %v1783_v38 = vpop.f32.mrf.mxu0  ;;  %v1824_v48 = vpop.f32.mrf.mxu1 }
 0x23f   : > { %3056 = vpow2.f32 %v2763_v18  ;;  %v4527_v48 = vld [vmem:[#allocation64_spill] sm:$0xff] }
 0x240   : > { %3058 = vtanh.f32 %v1828_v34 }
 0x241   : > { %3060 = vpow2.f32 %v2764_v37 }
 0x24a   : > { %v3055_v31 = vpop.eup %3054 }
 0x24b   : > { %v1927_v24 = vadd.f32 1.0, %v3055_v31 }
 0x24c   : > { %v3057_v46 = vpop.eup %3056 }
 0x24d   : > { %3062 = vrcp.f32 %v1927_v24  ;;  %v1933_v32 = vadd.f32 1.0, %v3057_v46  ;;  %v3059_v11 = vpop.eup %3058 }
 0x24e   : > { %v3061_v15 = vpop.eup %3060 }
 0x24f   : > { %3064 = vrcp.f32 %v1933_v32  ;;  %v1940_v23 = vadd.f32 1.0, %v3061_v15 }
 0x258   : > { %v1872_v12 = vpop.f32.mrf.mxu0  ;;  %v1913_v14 = vpop.f32.mrf.mxu1 }
 0x259   : > { %v1920_v13 = vadd.f32 %v1872_v12, %v4526_v16  ;;  %v4529_v16 = vld [vmem:[#allocation63_spill] sm:$0xff] }
 0x25a   : > { %v3063_v19 = vpop.eup %3062  ;;  %v1874_v18 = vpop.f32.mrf.mxu0 }
 0x25b   : > { %v1915_v27 = vpop.f32.mrf.mxu1  ;;  %v1944_v38 = vmul.f32 %v3063_v19, %v3059_v11  ;;  %v2765_v36 = vmul.f32 -1.442695, %v1920_v13  ;;  %v1921_v17 = vadd.f32 %v1874_v18, %v4527_v48  ;;  %v4528_v11 = vld [vmem:[#allocation65_spill] sm:$0xff]  ;;  %v1922_v13 = vadd.f32 %v1913_v14, %v4529_v16 }
 0x25c   : > { %v3065_v31 = vpop.eup %3064  ;;  %v1876_v10 = vpop.f32.mrf.mxu0  ;;  %v1923_v12 = vadd.f32 %v1915_v27, %v4528_v11 }
 0x25d   : > { %v1917_v37 = vpop.f32.mrf.mxu1  ;;  %v1943_v24 = vmul.f32 %v3065_v31, %v4017_v30  ;;  %3066 = vpow2.f32 %v2765_v36  ;;  %v2766_v34 = vmul.f32 -1.442695, %v1921_v17  ;;  %v3172_v10 = vld [vmem:[%s4377_s4 + $0x40] ss:$16 sps:$4 sm:$0xff]  }
 0x25e   : > { %v1877_v46 = vpop.f32.mrf.mxu0  ;;  %v2767_v15 = vmul.f32 -1.442695, %v1923_v12  ;;  %v4530_v37 = vld [vmem:[#allocation36_spill] sm:$0xff] }
 0x25f   : > { %v1918_v32 = vpop.f32.mrf.mxu1  ;;  %v4108_v49 = vadd.f32 %v1944_v38, %v1943_v24  ;;  %3068 = vpow2.f32 %v2766_v34  ;;  %v4531_v24 = vld [vmem:[#allocation37_spill] sm:$0xff]  ;;  %v4532_v34 = vld [vmem:[#allocation38_spill] sm:$0xff] }
 0x260   : > { %3070 = vrcp.f32 %v1940_v23  ;;  %v4533_v46 = vld [vmem:[#allocation46_spill] sm:$0xff] }
 0x261   : > { %3072 = vtanh.f32 %v4108_v49 }
 0x262   : > { %3074 = vtanh.f32 %v1922_v13 }
 0x263   : > { %3076 = vpow2.f32 %v2767_v15  ;;  %v4535_v15 = vld [vmem:[#allocation49_spill] sm:$0xff] }
 0x26a   : > { %v3067_v19 = vpop.eup %3066 }
 0x26b   : > { %v1951_v18 = vadd.f32 1.0, %v3067_v19 }
 0x26c   : > { %v3069_v30 = vpop.eup %3068 }
 0x26d   : > { %v3071_v36 = vpop.eup %3070  ;;  %3078 = vrcp.f32 %v1951_v18  ;;  %v1957_v48 = vadd.f32 1.0, %v3069_v30  ;;  %v4536_v18 = vld [vmem:[#allocation47_spill] sm:$0xff] }
 0x26e   : > { %v3073_v38 = vpop.eup %3072 }
 0x26f   : > { %3080 = vrcp.f32 %v1957_v48  ;;  %v1947_v17 = vmul.f32 %v3073_v38, %v3071_v36  ;;  %v3075_v14 = vpop.eup %3074 }
 0x271   : > { %v1982_v31 = vpack.c.bf16 %v1947_v17, %v1947_v17  ;;  %v2801_v23 = vpack.c.bf16 %v1947_v17, %v4022_v41  ;;  %v3077_v41 = vpop.eup %3076 }
 0x273   : > { %2016 = vmatmul.mubr.bf16.vlgmr.msra.gmra.mxu0 %v1982_v31  ;;  %2802 = vst [vmem:[%s3284_s25] sm:$0xff] %v2801_v23   ;;  %2057 = vmatmul.mubr.bf16.vlgmr.msra.gmra.mxu1 %v1982_v31 }
 0x274   : > { %2077 = vmatpush1.bf16.msra.mxu0 %v3706_v51  ;;  %2118 = vmatpush1.bf16.msra.mxu1 %v3711_v52 }
 0x275   : > { %2078 = vmatprep.subr.bf16.mxu0 %v3718_v53  ;;  %2119 = vmatprep.subr.bf16.mxu1 %v3723_v54  ;;  %v1964_v53 = vadd.f32 1.0, %v3077_v41 }
 0x276   : > { %2108 = vmatprep.mubr.bf16.mxu0 %v4464_v47  ;;  %2149 = vmatprep.mubr.bf16.mxu1 %v4464_v47 }
 0x277   : > { %3082 = vrcp.f32 %v1964_v53 }
 0x278   : > { %2079 = vmatpush1.bf16.msra.mxu0 %v3730_v55  ;;  %2120 = vmatpush1.bf16.msra.mxu1 %v3735_v56 }
 0x279   : > { %2080 = vmatprep.subr.bf16.mxu0 %v3742_v57  ;;  %2121 = vmatprep.subr.bf16.mxu1 %v3747_v58 }
 0x27a   : > { %v3079_v51 = vpop.eup %3078 }
 0x27b   : > { %v1968_v52 = vmul.f32 %v3079_v51, %v3075_v14 }
 0x27c   : > { %v3081_v27 = vpop.eup %3080  ;;  %2081 = vmatpush1.bf16.msra.mxu0 %v3756_v59  ;;  %2122 = vmatpush1.bf16.msra.mxu1 %v3761_v60  ;;  %v3150_v60 = vld [vmem:[%s4377_s4 + $0xe4] ss:$16 sps:$4 sm:$0xff]  }
 0x27d   : > { %v1967_v54 = vmul.f32 %v3081_v27, %v4040_v39  ;;  %2082 = vmatprep.subr.bf16.mxu0 %v3768_v61  ;;  %2123 = vmatprep.subr.bf16.mxu1 %v3773_v62  ;;  %v3151_v61 = vld [vmem:[%s4377_s4 + $0xec] ss:$16 sps:$4 sm:$0xff]   ;;  %v3152_v62 = vld [vmem:[%s4377_s4 + $0xe0] ss:$16 sps:$4 sm:$0xff]  }
 0x27e   : > { %v3168_v39 = vld [vmem:[%s4377_s4 + $0x60] ss:$16 sps:$4 sm:$0xff]  }
 0x27f   : > { %v4130_v55 = vadd.f32 %v1968_v52, %v1967_v54  ;;  %v4537_v52 = vld [vmem:[#allocation58_spill] sm:$0xff] }
 0x280   : > { %2083 = vmatpush1.bf16.msra.mxu0 %v3780_v63  ;;  %2124 = vmatpush1.bf16.msra.mxu1 %v3785_v0  ;;  %v3154_v63 = vld [vmem:[%s4377_s4 + $0xc4] ss:$16 sps:$4 sm:$0xff]   ;;  %v3155_v0 = vld [vmem:[%s4377_s4 + $0xcc] ss:$16 sps:$4 sm:$0xff]  }
 0x281   : > { %2084 = vmatprep.subr.bf16.mxu0 %v3792_v1  ;;  %2125 = vmatprep.subr.bf16.mxu1 %v3797_v2  ;;  %3084 = vtanh.f32 %v4130_v55  ;;  %v3156_v1 = vld [vmem:[%s4377_s4 + $0xc0] ss:$16 sps:$4 sm:$0xff]   ;;  %v3157_v2 = vld [vmem:[%s4377_s4 + $0xc8] ss:$16 sps:$4 sm:$0xff]  }
 0x284   : > { %2085 = vmatpush1.bf16.msra.mxu0 %v3804_v4  ;;  %2126 = vmatpush1.bf16.msra.mxu1 %v3809_v5  ;;  %v3083_v56 = vpop.eup %3082  ;;  %v3158_v4 = vld [vmem:[%s4377_s4 + $0xa4] ss:$16 sps:$4 sm:$0xff]   ;;  %v3159_v5 = vld [vmem:[%s4377_s4 + $0xac] ss:$16 sps:$4 sm:$0xff]  }
 0x285   : > { %2086 = vmatprep.subr.bf16.mxu0 %v3816_v6  ;;  %2127 = vmatprep.subr.bf16.mxu1 %v3821_v7  ;;  %v3160_v6 = vld [vmem:[%s4377_s4 + $0xa0] ss:$16 sps:$4 sm:$0xff]   ;;  %v3161_v7 = vld [vmem:[%s4377_s4 + $0xa8] ss:$16 sps:$4 sm:$0xff]  }
 0x288   : > { %2087 = vmatpush1.bf16.msra.mxu0 %v3828_v8  ;;  %2128 = vmatpush1.bf16.msra.mxu1 %v3833_v9  ;;  %v3162_v8 = vld [vmem:[%s4377_s4 + $0x84] ss:$16 sps:$4 sm:$0xff]   ;;  %v3163_v9 = vld [vmem:[%s4377_s4 + $0x8c] ss:$16 sps:$4 sm:$0xff]  }
 0x289   : > { %2088 = vmatprep.subr.bf16.mxu0 %v4489_v40  ;;  %2129 = vmatprep.subr.bf16.mxu1 %v4490_v43  ;;  %v3169_v40 = vld [vmem:[%s4377_s4 + $0x68] ss:$16 sps:$4 sm:$0xff]   ;;  %v3170_v43 = vld [vmem:[%s4377_s4 + $0x44] ss:$16 sps:$4 sm:$0xff]  }
 0x28c   : > { %2089 = vmatpush1.bf16.msra.mxu0 %v3852_v20  ;;  %2130 = vmatpush1.bf16.msra.mxu1 %v3857_v21  ;;  %v3164_v20 = vld [vmem:[%s4377_s4 + $0x80] ss:$16 sps:$4 sm:$0xff]   ;;  %v3165_v21 = vld [vmem:[%s4377_s4 + $0x88] ss:$16 sps:$4 sm:$0xff]  }
 0x28d   : > { %2090 = vmatprep.subr.bf16.mxu0 %v3864_v26  ;;  %2131 = vmatprep.subr.bf16.mxu1 %v4491_v35  ;;  %v3166_v26 = vld [vmem:[%s4377_s4 + $0x64] ss:$16 sps:$4 sm:$0xff]   ;;  %v3171_v35 = vld [vmem:[%s4377_s4 + $0x4c] ss:$16 sps:$4 sm:$0xff]  }
 0x28e   : > { %v3085_v57 = vpop.eup %3084 }
 0x28f   : > { %v4149_v58 = vmul.f32 %v3085_v57, %v3083_v56 }
 0x290   : > { %2091 = vmatpush1.bf16.msra.mxu0 %v3876_v50  ;;  %2132 = vmatpush1.bf16.msra.mxu1 %v3881_v3  ;;  %v3153_v3 = vld [vmem:[%s4377_s4 + $0xe8] ss:$16 sps:$4 sm:$0xff]   ;;  %v3167_v50 = vld [vmem:[%s4377_s4 + $0x6c] ss:$16 sps:$4 sm:$0xff]  }
 0x291   : > { %v2075_v59 = vpack.c.bf16 %v4149_v58, %v4149_v58  ;;  %2221 = vmatprep.subr.bf16.mxu0 %v3150_v60  ;;  %2262 = vmatprep.subr.bf16.mxu1 %v3151_v61  ;;  %v4538_v60 = vld [vmem:[#allocation60_spill] sm:$0xff] }
 0x293   : > { %2109 = vmatmul.mubr.bf16.vlgmr.msra.gmra.mxu0 %v2075_v59  ;;  %2150 = vmatmul.mubr.bf16.vlgmr.msra.gmra.mxu1 %v2075_v59 }
 0x294   : > { %2222 = vmatpush1.bf16.msra.mxu0 %v3152_v62  ;;  %2263 = vmatpush1.bf16.msra.mxu1 %v3153_v3 }
 0x295   : > { %2223 = vmatprep.subr.bf16.mxu0 %v3154_v63  ;;  %2264 = vmatprep.subr.bf16.mxu1 %v3155_v0 }
 0x296   : > { %2253 = vmatprep.mubr.bf16.mxu0 %v4464_v47  ;;  %2294 = vmatprep.mubr.bf16.mxu1 %v4464_v47 }
 0x298   : > { %2224 = vmatpush1.bf16.msra.mxu0 %v3156_v1  ;;  %2265 = vmatpush1.bf16.msra.mxu1 %v3157_v2 }
 0x299   : > { %2225 = vmatprep.subr.bf16.mxu0 %v3158_v4  ;;  %2266 = vmatprep.subr.bf16.mxu1 %v3159_v5 }
 0x29c   : > { %2226 = vmatpush1.bf16.msra.mxu0 %v3160_v6  ;;  %2267 = vmatpush1.bf16.msra.mxu1 %v3161_v7  ;;  %v4539_v7 = vld [vmem:[#allocation61_spill] sm:$0xff] }
 0x29d   : > { %2227 = vmatprep.subr.bf16.mxu0 %v3162_v8  ;;  %2268 = vmatprep.subr.bf16.mxu1 %v3163_v9  ;;  %v4540_v9 = vld [vmem:[#allocation59_spill] sm:$0xff] }
 0x2a0   : > { %2228 = vmatpush1.bf16.msra.mxu0 %v3164_v20  ;;  %2269 = vmatpush1.bf16.msra.mxu1 %v3165_v21 }
 0x2a1   : > { %2229 = vmatprep.subr.bf16.mxu0 %v3166_v26  ;;  %2270 = vmatprep.subr.bf16.mxu1 %v3167_v50 }
 0x2a4   : > { %2230 = vmatpush1.bf16.msra.mxu0 %v3168_v39  ;;  %2271 = vmatpush1.bf16.msra.mxu1 %v3169_v40 }
 0x2a5   : > { %2231 = vmatprep.subr.bf16.mxu0 %v3170_v43  ;;  %2272 = vmatprep.subr.bf16.mxu1 %v3171_v35 }
 0x2a8   : > { %2232 = vmatpush1.bf16.msra.mxu0 %v3172_v10  ;;  %2273 = vmatpush1.bf16.msra.mxu1 %v4511_v25 }
 0x2a9   : > { %2233 = vmatprep.subr.bf16.mxu0 %v4512_v33  ;;  %2274 = vmatprep.subr.bf16.mxu1 %v4513_v42 }
 0x2ac   : > { %2234 = vmatpush1.bf16.msra.mxu0 %v4514_v22  ;;  %2275 = vmatpush1.bf16.msra.mxu1 %v4515_v44  ;;  %v4534_v44 = vld [vmem:[#allocation48_spill] sm:$0xff] }
 0x2ad   : > { %2235 = vmatprep.subr.bf16.mxu0 %v4516_v28  ;;  %2276 = vmatprep.subr.bf16.mxu1 %v4517_v45 }
 0x2b0   : > { %2236 = vmatpush1.bf16.msra.mxu0 %v4518_v29  ;;  %2277 = vmatpush1.bf16.msra.mxu1 %v4530_v37  ;;  %v3173_v37 = vld [vmem:[%s4378_s5 + $0xe0] ss:$16 sps:$4 sm:$0xff]  }
 0x2b1   : > { %2314 = vmatprep.subr.bf16.mxu0 %v4531_v24  ;;  %2355 = vmatprep.subr.bf16.mxu1 %v4532_v34  ;;  %v3174_v24 = vld [vmem:[%s4378_s5 + $0xe8] ss:$16 sps:$4 sm:$0xff]   ;;  %v3175_v34 = vld [vmem:[%s4378_s5 + $0xc4] ss:$16 sps:$4 sm:$0xff]  }
 0x333   : > { %v2017_v25 = vpop.f32.mrf.mxu0  ;;  %v2058_v33 = vpop.f32.mrf.mxu1 }
 0x334   : > { %v2065_v42 = vadd.f32 %v2017_v25, %v4533_v46  ;;  %v2067_v30 = vadd.f32 %v2058_v33, %v4536_v18  ;;  %v3176_v25 = vld [vmem:[%s4378_s5 + $0xcc] ss:$16 sps:$4 sm:$0xff]   ;;  %v3177_v46 = vld [vmem:[%s4378_s5 + $0xc0] ss:$16 sps:$4 sm:$0xff]  }
 0x335   : > { %v2019_v32 = vpop.f32.mrf.mxu0  ;;  %v2060_v22 = vpop.f32.mrf.mxu1  ;;  %v3185_v18 = vld [vmem:[%s4378_s5 + $0x80] ss:$16 sps:$4 sm:$0xff]  }
 0x336   : > { %v2768_v11 = vmul.f32 -1.442695, %v2065_v42  ;;  %v2066_v12 = vadd.f32 %v2019_v32, %v4534_v44  ;;  %v2068_v19 = vadd.f32 %v2060_v22, %v4535_v15  ;;  %v3178_v42 = vld [vmem:[%s4378_s5 + $0xc8] ss:$16 sps:$4 sm:$0xff]   ;;  %v3179_v22 = vld [vmem:[%s4378_s5 + $0xa4] ss:$16 sps:$4 sm:$0xff]  }
 0x337   : > { %v2021_v28 = vpop.f32.mrf.mxu0  ;;  %v2062_v16 = vpop.f32.mrf.mxu1  ;;  %v3184_v15 = vld [vmem:[%s4378_s5 + $0x8c] ss:$16 sps:$4 sm:$0xff]  }
 0x338   : > { %3086 = vpow2.f32 %v2768_v11  ;;  %v2769_v45 = vmul.f32 -1.442695, %v2066_v12  ;;  %v2770_v36 = vmul.f32 -1.442695, %v2068_v19  ;;  %v3181_v16 = vld [vmem:[%s4378_s5 + $0xa0] ss:$16 sps:$4 sm:$0xff]  }
 0x339   : > { %v2022_v29 = vpop.f32.mrf.mxu0  ;;  %v2063_v13 = vpop.f32.mrf.mxu1 }
 0x33a   : > { %3088 = vpow2.f32 %v2769_v45  ;;  %v3182_v45 = vld [vmem:[%s4378_s5 + $0xa8] ss:$16 sps:$4 sm:$0xff]   ;;  %v3183_v13 = vld [vmem:[%s4378_s5 + $0x84] ss:$16 sps:$4 sm:$0xff]  }
 0x33b   : > { %3090 = vtanh.f32 %v2067_v30  ;;  %v3187_v30 = vld [vmem:[%s4378_s5 + $0x64] ss:$16 sps:$4 sm:$0xff]  }
 0x33c   : > { %3092 = vpow2.f32 %v2770_v36  ;;  %v3188_v36 = vld [vmem:[%s4378_s5 + $0x6c] ss:$16 sps:$4 sm:$0xff]  }
 0x345   : > { %v3087_v48 = vpop.eup %3086 }
 0x346   : > { %v2165_v38 = vadd.f32 1.0, %v3087_v48  ;;  %v3189_v48 = vld [vmem:[%s4378_s5 + $0x60] ss:$16 sps:$4 sm:$0xff]  }
 0x347   : > { %v3089_v17 = vpop.eup %3088 }
 0x348   : > { %3094 = vrcp.f32 %v2165_v38  ;;  %v2171_v31 = vadd.f32 1.0, %v3089_v17  ;;  %v3091_v23 = vpop.eup %3090  ;;  %v3190_v38 = vld [vmem:[%s4378_s5 + $0x68] ss:$16 sps:$4 sm:$0xff]   ;;  %v3191_v17 = vld [vmem:[%s4378_s5 + $0x44] ss:$16 sps:$4 sm:$0xff]  }
 0x349   : > { %v3093_v51 = vpop.eup %3092 }
 0x34a   : > { %3096 = vrcp.f32 %v2171_v31  ;;  %v2178_v3 = vadd.f32 1.0, %v3093_v51  ;;  %v3192_v31 = vld [vmem:[%s4378_s5 + $0x4c] ss:$16 sps:$4 sm:$0xff]  }
 0x34b   : > { %v3196_v51 = vld [vmem:[%s4378_s5 + $0x2c] ss:$16 sps:$4 sm:$0xff]  }
 0x353   : > { %v2110_v14 = vpop.f32.mrf.mxu0  ;;  %v2151_v41 = vpop.f32.mrf.mxu1 }
 0x354   : > { %v2158_v27 = vadd.f32 %v2110_v14, %v4537_v52  ;;  %v2160_v20 = vadd.f32 %v2151_v41, %v4540_v9  ;;  %v3194_v14 = vld [vmem:[%s4378_s5 + $0x48] ss:$16 sps:$4 sm:$0xff]   ;;  %v3195_v41 = vld [vmem:[%s4378_s5 + $0x24] ss:$16 sps:$4 sm:$0xff]   ;;  %v3197_v52 = vld [vmem:[%s4378_s5 + $0x20] ss:$16 sps:$4 sm:$0xff]  }
 0x355   : > { %v3095_v53 = vpop.eup %3094  ;;  %v2112_v54 = vpop.f32.mrf.mxu0 }
 0x356   : > { %v2153_v56 = vpop.f32.mrf.mxu1  ;;  %v2182_v57 = vmul.f32 %v3095_v53, %v3091_v23  ;;  %v2771_v59 = vmul.f32 -1.442695, %v2158_v27  ;;  %v2159_v61 = vadd.f32 %v2112_v54, %v4538_v60  ;;  %v3193_v23 = vld [vmem:[%s4378_s5 + $0x40] ss:$16 sps:$4 sm:$0xff]   ;;  %v3198_v27 = vld [vmem:[%s4378_s5 + $0x28] ss:$16 sps:$4 sm:$0xff]  }
 0x357   : > { %v3097_v62 = vpop.eup %3096  ;;  %v2114_v63 = vpop.f32.mrf.mxu0  ;;  %v2161_v8 = vadd.f32 %v2153_v56, %v4539_v7  ;;  %v3199_v54 = vld [vmem:[%s4378_s5 + $0x4] ss:$16 sps:$4 sm:$0xff]   ;;  %v3200_v56 = vld [vmem:[%s4378_s5 + $0xc] ss:$16 sps:$4 sm:$0xff]   ;;  %v3201_v60 = vld [vmem:[%s4378_s5] ss:$16 sps:$4 sm:$0xff]  }
 0x358   : > { %v2155_v0 = vpop.f32.mrf.mxu1  ;;  %v2181_v1 = vmul.f32 %v3097_v62, %v4108_v49  ;;  %3098 = vpow2.f32 %v2771_v59  ;;  %v2772_v2 = vmul.f32 -1.442695, %v2159_v61  ;;  %v3202_v61 = vld [vmem:[%s4378_s5 + $0x8] ss:$16 sps:$4 sm:$0xff]   ;;  %v4542_v7 = vld [vmem:[#allocation52_spill] sm:$0xff] }
 0x359   : > { %v2115_v4 = vpop.f32.mrf.mxu0  ;;  %v2773_v21 = vmul.f32 -1.442695, %v2161_v8  ;;  %v4541_v0 = vld [vmem:[#allocation50_spill] sm:$0xff] }
 0x35a   : > { %v2156_v5 = vpop.f32.mrf.mxu1  ;;  %v4244_v6 = vadd.f32 %v2182_v57, %v2181_v1  ;;  %3100 = vpow2.f32 %v2772_v2 }
 0x35b   : > { %3102 = vrcp.f32 %v2178_v3 }
 0x35c   : > { %3104 = vtanh.f32 %v4244_v6 }
 0x35d   : > { %3106 = vtanh.f32 %v2160_v20 }
 0x35e   : > { %3108 = vpow2.f32 %v2773_v21 }
 0x365   : > { %v3099_v26 = vpop.eup %3098 }
 0x366   : > { %v2189_v50 = vadd.f32 1.0, %v3099_v26 }
 0x367   : > { %v3101_v39 = vpop.eup %3100 }
 0x368   : > { %v3103_v49 = vpop.eup %3102  ;;  %3110 = vrcp.f32 %v2189_v50  ;;  %v2195_v40 = vadd.f32 1.0, %v3101_v39  ;;  %v4543_v39 = vld [vmem:[#allocation53_spill] sm:$0xff] }
 0x369   : > { %v3105_v43 = vpop.eup %3104 }
 0x36a   : > { %3112 = vrcp.f32 %v2195_v40  ;;  %v4249_v35 = vmul.f32 %v3105_v43, %v3103_v49  ;;  %v3107_v33 = vpop.eup %3106  ;;  %v4544_v40 = vld [vmem:[#allocation51_spill] sm:$0xff] }
 0x36b   : > { %v3109_v32 = vpop.eup %3108 }
 0x36c   : > { %v2220_v10 = vpack.c.bf16 %v4249_v35, %v4249_v35  ;;  %v2202_v28 = vadd.f32 1.0, %v3109_v32 }
 0x36e   : > { %2254 = vmatmul.mubr.bf16.vlgmr.msra.gmra.mxu0 %v2220_v10  ;;  %2295 = vmatmul.mubr.bf16.vlgmr.msra.gmra.mxu1 %v2220_v10  ;;  %3114 = vrcp.f32 %v2202_v28 }
 0x36f   : > { %2315 = vmatpush1.bf16.msra.mxu0 %v3173_v37  ;;  %2356 = vmatpush1.bf16.msra.mxu1 %v3174_v24 }
 0x370   : > { %2316 = vmatprep.subr.bf16.mxu0 %v3175_v34  ;;  %2357 = vmatprep.subr.bf16.mxu1 %v3176_v25 }
 0x371   : > { %2346 = vmatprep.mubr.bf16.mxu0 %v4464_v47  ;;  %2387 = vmatprep.mubr.bf16.mxu1 %v4464_v47  ;;  %v3180_v47 = vld [vmem:[%s4378_s5 + $0xac] ss:$16 sps:$4 sm:$0xff]  }
 0x373   : > { %2317 = vmatpush1.bf16.msra.mxu0 %v3177_v46  ;;  %2358 = vmatpush1.bf16.msra.mxu1 %v3178_v42 }
 0x374   : > { %2318 = vmatprep.subr.bf16.mxu0 %v3179_v22  ;;  %2359 = vmatprep.subr.bf16.mxu1 %v3180_v47  ;;  %v4545_v22 = vld [vmem:[#allocation54_spill] sm:$0xff] }
 0x375   : > { %v3111_v11 = vpop.eup %3110 }
 0x376   : > { %v2206_v44 = vmul.f32 %v3111_v11, %v3107_v33 }
 0x377   : > { %v3113_v12 = vpop.eup %3112  ;;  %2319 = vmatpush1.bf16.msra.mxu0 %v3181_v16  ;;  %2360 = vmatpush1.bf16.msra.mxu1 %v3182_v45  ;;  %v4546_v45 = vld [vmem:[#allocation56_spill] sm:$0xff] }
 0x378   : > { %v2205_v29 = vmul.f32 %v3113_v12, %v4130_v55  ;;  %2320 = vmatprep.subr.bf16.mxu0 %v3183_v13  ;;  %2361 = vmatprep.subr.bf16.mxu1 %v3184_v15  ;;  %v3186_v55 = vld [vmem:[%s4378_s5 + $0x88] ss:$16 sps:$4 sm:$0xff]  }
 0x37a   : > { %v4292_v19 = vadd.f32 %v2206_v44, %v2205_v29 }
 0x37b   : > { %2321 = vmatpush1.bf16.msra.mxu0 %v3185_v18  ;;  %2362 = vmatpush1.bf16.msra.mxu1 %v3186_v55  ;;  %v3115_v53 = vpop.eup %3114 }
 0x37c   : > { %2322 = vmatprep.subr.bf16.mxu0 %v3187_v30  ;;  %2363 = vmatprep.subr.bf16.mxu1 %v3188_v36  ;;  %3116 = vtanh.f32 %v4292_v19 }
 0x37f   : > { %2323 = vmatpush1.bf16.msra.mxu0 %v3189_v48  ;;  %2364 = vmatpush1.bf16.msra.mxu1 %v3190_v38 }
 0x380   : > { %2324 = vmatprep.subr.bf16.mxu0 %v3191_v17  ;;  %2365 = vmatprep.subr.bf16.mxu1 %v3192_v31  ;;  %v4547_v31 = vld [vmem:[#allocation57_spill] sm:$0xff] }
 0x383   : > { %2325 = vmatpush1.bf16.msra.mxu0 %v3193_v23  ;;  %2366 = vmatpush1.bf16.msra.mxu1 %v3194_v14  ;;  %v4548_v14 = vld [vmem:[#allocation55_spill] sm:$0xff] }
 0x384   : > { %2326 = vmatprep.subr.bf16.mxu0 %v3195_v41  ;;  %2367 = vmatprep.subr.bf16.mxu1 %v3196_v51 }
 0x387   : > { %2327 = vmatpush1.bf16.msra.mxu0 %v3197_v52  ;;  %2368 = vmatpush1.bf16.msra.mxu1 %v3198_v27 }
 0x388   : > { %2328 = vmatprep.subr.bf16.mxu0 %v3199_v54  ;;  %2369 = vmatprep.subr.bf16.mxu1 %v3200_v56 }
 0x389   : > { %v3117_v57 = vpop.eup %3116 }
 0x38a   : > { %v4343_v59 = vmul.f32 %v3117_v57, %v3115_v53 }
 0x38b   : > { %2329 = vmatpush1.bf16.msra.mxu0 %v3201_v60  ;;  %2370 = vmatpush1.bf16.msra.mxu1 %v3202_v61 }
 0x38c   : > { %v2313_v62 = vpack.c.bf16 %v4343_v59, %v4343_v59 }
 0x38e   : > { %2347 = vmatmul.mubr.bf16.vlgmr.msra.gmra.mxu0 %v2313_v62  ;;  %2388 = vmatmul.mubr.bf16.vlgmr.msra.gmra.mxu1 %v2313_v62 }
 0x42e   : > { %v2255_v3 = vpop.f32.mrf.mxu0  ;;  %v2296_v63 = vpop.f32.mrf.mxu1 }
 0x42f   : > { %v2303_v1 = vadd.f32 %v2255_v3, %v4541_v0  ;;  %v2305_v43 = vadd.f32 %v2296_v63, %v4544_v40 }
 0x430   : > { %v2257_v2 = vpop.f32.mrf.mxu0  ;;  %v2298_v4 = vpop.f32.mrf.mxu1 }
 0x431   : > { %v2774_v5 = vmul.f32 -1.442695, %v2303_v1  ;;  %v2304_v8 = vadd.f32 %v2257_v2, %v4542_v7  ;;  %v2306_v49 = vadd.f32 %v2298_v4, %v4543_v39 }
 0x432   : > { %v2259_v9 = vpop.f32.mrf.mxu0  ;;  %v2300_v20 = vpop.f32.mrf.mxu1 }
 0x433   : > { %3118 = vpow2.f32 %v2774_v5  ;;  %v2775_v21 = vmul.f32 -1.442695, %v2304_v8  ;;  %v2776_v10 = vmul.f32 -1.442695, %v2306_v49  ;;  %v4549_v9 = vld [vmem:[#allocation39_spill] sm:$0xff] }
 0x434   : > { %v2260_v26 = vpop.f32.mrf.mxu0  ;;  %v2301_v50 = vpop.f32.mrf.mxu1  ;;  %v2816_v20 = vpack.c.bf16 %v4549_v9, %v4149_v58 }
 0x435   : > { %3120 = vpow2.f32 %v2775_v21 }
 0x436   : > { %3122 = vtanh.f32 %v2305_v43  ;;  %2819 = vst [vmem:[%s3289_s29 + $0x8] sm:$0xff] %v2816_v20  }
 0x437   : > { %3124 = vpow2.f32 %v2776_v10 }
 0x440   : > { %v3119_v37 = vpop.eup %3118 }
 0x441   : > { %v2403_v24 = vadd.f32 1.0, %v3119_v37 }
 0x442   : > { %v3121_v34 = vpop.eup %3120 }
 0x443   : > { %3126 = vrcp.f32 %v2403_v24  ;;  %v2409_v25 = vadd.f32 1.0, %v3121_v34  ;;  %v3123_v33 = vpop.eup %3122 }
 0x444   : > { %v3125_v32 = vpop.eup %3124 }
 0x445   : > { %3128 = vrcp.f32 %v2409_v25  ;;  %v2416_v15 = vadd.f32 1.0, %v3125_v32 }
 0x44e   : > { %v2348_v46 = vpop.f32.mrf.mxu0  ;;  %v2389_v42 = vpop.f32.mrf.mxu1 }
 0x44f   : > { %v2396_v47 = vadd.f32 %v2348_v46, %v4545_v22  ;;  %v2398_v41 = vadd.f32 %v2389_v42, %v4548_v14 }
 0x450   : > { %v3127_v11 = vpop.eup %3126  ;;  %v2350_v44 = vpop.f32.mrf.mxu0 }
 0x451   : > { %v2391_v12 = vpop.f32.mrf.mxu1  ;;  %v2420_v28 = vmul.f32 %v3127_v11, %v3123_v33  ;;  %v2777_v16 = vmul.f32 -1.442695, %v2396_v47  ;;  %v2397_v29 = vadd.f32 %v2350_v44, %v4546_v45 }
 0x452   : > { %v3129_v13 = vpop.eup %3128  ;;  %v2352_v18 = vpop.f32.mrf.mxu0  ;;  %v2399_v23 = vadd.f32 %v2391_v12, %v4547_v31 }
 0x453   : > { %v2393_v55 = vpop.f32.mrf.mxu1  ;;  %v2419_v30 = vmul.f32 %v3129_v13, %v4244_v6  ;;  %3130 = vpow2.f32 %v2777_v16  ;;  %v2778_v36 = vmul.f32 -1.442695, %v2397_v29 }
 0x454   : > { %v2353_v48 = vpop.f32.mrf.mxu0  ;;  %v2779_v51 = vmul.f32 -1.442695, %v2399_v23 }
 0x455   : > { %v2394_v38 = vpop.f32.mrf.mxu1  ;;  %v2421_v17 = vadd.f32 %v2420_v28, %v2419_v30  ;;  %3132 = vpow2.f32 %v2778_v36 }
 0x456   : > { %3134 = vrcp.f32 %v2416_v15 }
 0x457   : > { %3136 = vtanh.f32 %v2421_v17  ;;  %2452 = vst [vmem:[#allocation3] sm:$0xff] %v2421_v17 }
 0x458   : > { %3138 = vtanh.f32 %v2398_v41 }
 0x459   : > { %3140 = vpow2.f32 %v2779_v51 }
 0x460   : > { %v3131_v52 = vpop.eup %3130 }
 0x461   : > { %v2427_v27 = vadd.f32 1.0, %v3131_v52 }
 0x462   : > { %v3133_v53 = vpop.eup %3132 }
 0x463   : > { %v3135_v6 = vpop.eup %3134  ;;  %3142 = vrcp.f32 %v2427_v27  ;;  %v2433_v54 = vadd.f32 1.0, %v3133_v53 }
 0x464   : > { %v3137_v56 = vpop.eup %3136 }
 0x465   : > { %v2423_v57 = vmul.f32 %v3137_v56, %v3135_v6  ;;  %3144 = vrcp.f32 %v2433_v54  ;;  %v3139_v61 = vpop.eup %3138 }
 0x466   : > { %v3141_v62 = vpop.eup %3140 }
 0x467   : > { %2451 = vst [vmem:[#allocation2] sm:$0xff] %v2423_v57  ;;  %v2806_v60 = vpack.c.bf16 %v2423_v57, %v4249_v35  ;;  %v2440_v1 = vadd.f32 1.0, %v3141_v62 }
 0x469   : > { %2818 = vst [vmem:[%s3284_s25 + $0x8] sm:$0xff] %v2806_v60   ;;  %3146 = vrcp.f32 %v2440_v1 }
 0x470   : > { %v3143_v3 = vpop.eup %3142 }
 0x471   : > { %v2444_v63 = vmul.f32 %v3143_v3, %v3139_v61 }
 0x472   : > { %v3145_v0 = vpop.eup %3144 }
 0x473   : > { %v2443_v2 = vmul.f32 %v3145_v0, %v4292_v19 }
 0x475   : > { %v2445_v4 = vadd.f32 %v2444_v63, %v2443_v2 }
 0x476   : > { %v3147_v5 = vpop.eup %3146 }
 0x477   : > { %3148 = vtanh.f32 %v2445_v4  ;;  %2454 = vst [vmem:[#allocation5] sm:$0xff] %v2445_v4 }
 0x484   : > { %v3149_v7 = vpop.eup %3148 }
 0x485   : > { %v2447_v8 = vmul.f32 %v3149_v7, %v3147_v5 }
 0x487   : > { %2453 = vst [vmem:[#allocation4] sm:$0xff] %v2447_v8  ;;  %v2811_v35 = vpack.c.bf16 %v4343_v59, %v2447_v8 }
 0x489   : > { %2812 = vst [vmem:[%s3289_s29] sm:$0xff] %v2811_v35  }
 0x48a PF: > { %s20_s30 = sadd.s32 1, %s3209_s30  }
 0x48b   : > { %p17_p6 = scmp.ge.s32.totalorder %s20_s30, 4  }
 0x48d   :  { %19 = sbr.rel (!%p17_p6) target bundleno = 1 (0x1), region = 115 }

// kernel: encoder_forward.3
= control target key start
LH: loop header
LB: loop body
LE: loop exit
PB: predicated region body
PF: predicated region fallthrough
CT: control target
= control target key end

     0   :  { %s4861_s24 = smov 0   ;;  %s6366_s0 = inlined_call_operand.vmem [shape: bf16[64,128], index: 0, kind: input, shape index: {}, may-alias: {0,2}]   ;;  %s6367_s1 = inlined_call_operand.vmem [shape: bf16[64,128], index: 1, kind: input, shape index: {}, may-alias: {1,3}]   ;;  %s6368_s2 = inlined_call_operand.vmem [shape: bf16[64,128], index: 2, kind: input, shape index: {}, may-alias: {0,2}]   ;;  %s6369_s3 = inlined_call_operand.vmem [shape: bf16[64,128], index: 3, kind: input, shape index: {}, may-alias: {1,3}]   ;;  %s6370_s4 = inlined_call_operand.vmem [shape: bf16[128,512], index: 4, kind: input, shape index: {}]   ;;  %s6371_s5 = inlined_call_operand.vmem [shape: bf16[128,512], index: 5, kind: input, shape index: {}]   ;;  %s6372_s6 = inlined_call_operand.vmem [shape: bf16[128,512], index: 6, kind: input, shape index: {}]   ;;  %s6373_s7 = inlined_call_operand.vmem [shape: bf16[128,512], index: 7, kind: input, shape index: {}]   ;;  %s6374_s8 = inlined_call_operand.vmem [shape: bf16[128,512], index: 8, kind: input, shape index: {}]   ;;  %s6375_s9 = inlined_call_operand.vmem [shape: bf16[128,512], index: 9, kind: input, shape index: {}]   ;;  %s6376_s10 = inlined_call_operand.vmem [shape: f32[1,512], index: 10, kind: input, shape index: {}]   ;;  %s6377_s11 = inlined_call_operand.vmem [shape: f32[1,512], index: 11, kind: input, shape index: {}]   ;;  %s6378_s12 = inlined_call_operand.vmem [shape: bf16[128,128], index: 12, kind: input, shape index: {}]   ;;  %s6379_s13 = inlined_call_operand.vmem [shape: bf16[128,128], index: 13, kind: input, shape index: {}]   ;;  %s6380_s14 = inlined_call_operand.vmem [shape: f32[1,128], index: 14, kind: input, shape index: {}]   ;;  %s6381_s15 = inlined_call_operand.vmem [shape: f32[64,128], index: 15, kind: output, shape index: {0}]   ;;  %s6382_s16 = inlined_call_operand.vmem [shape: f32[64,128], index: 16, kind: output, shape index: {1}]   ;;  %s6383_s17 = inlined_call_operand.vmem [shape: f32[2,8,128], index: 17, kind: output, shape index: {2}]  }
   0x1   :  { %6477 = sst [smem:[#allocation81_spill]] %s6366_s0 }
   0x2   :  { %6478 = sst [smem:[#allocation82_spill]] %s6367_s1 }
   0x3   :  { %6479 = sst [smem:[#allocation83_spill]] %s6377_s11 }
   0x4   :  { %6480 = sst [smem:[#allocation84_spill]] %s6378_s12 }
   0x5   :  { %6481 = sst [smem:[#allocation85_spill]] %s6379_s13 }
   0x6   :  { %6482 = sst [smem:[#allocation86_spill]] %s6380_s14 }
   0x7   :  { %6483 = sst [smem:[#allocation87_spill]] %s6383_s17 }
   0x8 LB: > { %6484 = sst [smem:[#allocation10_spill]] %s4765_s24  ;;  %s4867_s25 = sadd.s32 4294967295, %s4765_s24   ;;  %s4765_s24 = sphi %s4861_s24, %s28_s24  }
   0x9   : > { %p3868_p0 = scmp.ge.s32.totalorder %s4765_s24, 1  ;;  %p531_p1 = scmp.lt.s32.totalorder %s4765_s24, 3 }
   0xb   : > { %p532_p2 = pnand %p3868_p0, %p531_p1 }
   0xd   : > { %535 = sbr.rel (%p532_p2) target bundleno = 1498 (0x5da), region = 80 }
  0x12   : > { %s3869_s26 = sshll.u32 %s4867_s25, 2  ;;  %s618_s27 = ssub.s32 1, %s4867_s25 }
  0x13   : > { %p607_p3 = scmp.lt.s32.totalorder %s3869_s26, 7  ;;  %s3873_s28 = sshll.u32 %s618_s27, 2 }
  0x14   : > { %p620_p4 = scmp.lt.s32.totalorder %s3873_s28, 7  ;;  %s6485_s19 = sld [smem:[#allocation81_spill]] }
  0x15   : > { %s6637_s26 = smov (!%p607_p3, %s3869_s26), 7  ;;  %s6486_s22 = sld [smem:[#allocation82_spill]] }
  0x16   : > { %s6639_s28 = smov (!%p620_p4, %s3873_s28), 7  ;;  %s3870_s29 = sshll.u32 %s6637_s26, 2 }
  0x17   : > { %s3878_s0 = sshll.u32 %s6637_s26, 3  ;;  %s3874_s24 = sshll.u32 %s6639_s28, 2 }
  0x18   : > { %s4886_s27 = scalar_lea.vmem %s6381_s15, %s3878_s0  ;;  %s4891_s26 = scalar_lea.vmem %s6368_s2, %s3874_s24 }
  0x19   : > { %s4896_s18 = scalar_lea.vmem %s6369_s3, %s3874_s24  ;;  %p3881_p5 = scmp.ne.s32.totalorder %s4867_s25, 0 }
  0x1a   : > { %s4876_s1 = scalar_lea.vmem %s6485_s19, %s3870_s29  ;;  %s3880_s19 = sshll.u32 %s6639_s28, 3 }
  0x1b   : > { %s4881_s23 = scalar_lea.vmem %s6486_s22, %s3870_s29  ;;  %s4901_s21 = scalar_lea.vmem %s6382_s16, %s3880_s19 }
  0x1c   : > { %652 = sbr.rel (%p3881_p5) target bundleno = 36 (0x24), region = 84 }
  0x21   : > { %v4767_v0 = vmov 0.0  }
  0x22   : > { %653 = vst [vmem:[#allocation2] sm:$0xff] %v4767_v0  ;;  %654 = vst [vmem:[#allocation3] sm:$0xff] %v4767_v0 }
  0x23   : > { %655 = vst [vmem:[#allocation4] sm:$0xff] %v4767_v0  ;;  %656 = vst [vmem:[#allocation5] sm:$0xff] %v4767_v0 }
  0x24 PF: > { %v4255_v1 = vld [vmem:[%s6370_s4 + $0xe4] ss:$16 sps:$4 sm:$0xff]   ;;  %v4257_v2 = vld [vmem:[%s6370_s4 + $0xec] ss:$16 sps:$4 sm:$0xff]   ;;  %v6388_v3 = vmov 0   ;;  %s6548_s20 = sld [smem:[#allocation83_spill]] }
  0x25   : > { %899 = vmatprep.mubr.bf16.mxu0 %v6388_v3  ;;  %952 = vmatprep.mubr.bf16.mxu1 %v6388_v3  ;;  %v4259_v4 = vld [vmem:[%s6370_s4 + $0xe0] ss:$16 sps:$4 sm:$0xff]   ;;  %v4260_v5 = vld [vmem:[%s6370_s4 + $0xe8] ss:$16 sps:$4 sm:$0xff]   ;;  %v4261_v6 = vld [vmem:[%s6370_s4 + $0xc4] ss:$16 sps:$4 sm:$0xff]  }
  0x26   : > { %867 = vmatprep.subr.bf16.mxu0 %v4255_v1  ;;  %920 = vmatprep.subr.bf16.mxu1 %v4257_v2  ;;  %v4263_v7 = vld [vmem:[%s6370_s4 + $0xcc] ss:$16 sps:$4 sm:$0xff]   ;;  %v4265_v8 = vld [vmem:[%s6370_s4 + $0xc0] ss:$16 sps:$4 sm:$0xff]   ;;  %v4266_v9 = vld [vmem:[%s6370_s4 + $0xc8] ss:$16 sps:$4 sm:$0xff]  }
  0x27   : > { %868 = vmatpush1.bf16.msra.mxu0 %v4259_v4  ;;  %921 = vmatpush1.bf16.msra.mxu1 %v4260_v5  ;;  %v4267_v10 = vld [vmem:[%s6370_s4 + $0xa4] ss:$16 sps:$4 sm:$0xff]   ;;  %v4269_v11 = vld [vmem:[%s6370_s4 + $0xac] ss:$16 sps:$4 sm:$0xff]   ;;  %v4271_v12 = vld [vmem:[%s6370_s4 + $0xa0] ss:$16 sps:$4 sm:$0xff]  }
  0x28   : > { %869 = vmatprep.subr.bf16.mxu0 %v4261_v6  ;;  %922 = vmatprep.subr.bf16.mxu1 %v4263_v7  ;;  %v4272_v13 = vld [vmem:[%s6370_s4 + $0xa8] ss:$16 sps:$4 sm:$0xff]   ;;  %v4273_v14 = vld [vmem:[%s6370_s4 + $0x84] ss:$16 sps:$4 sm:$0xff]   ;;  %v4275_v15 = vld [vmem:[%s6370_s4 + $0x8c] ss:$16 sps:$4 sm:$0xff]  }
  0x29   : > { %v4277_v16 = vld [vmem:[%s6370_s4 + $0x80] ss:$16 sps:$4 sm:$0xff]   ;;  %v4278_v17 = vld [vmem:[%s6370_s4 + $0x88] ss:$16 sps:$4 sm:$0xff]   ;;  %v4279_v18 = vld [vmem:[%s6370_s4 + $0x64] ss:$16 sps:$4 sm:$0xff]  }
  0x2a   : > { %v4281_v19 = vld [vmem:[%s6370_s4 + $0x6c] ss:$16 sps:$4 sm:$0xff]   ;;  %v4283_v20 = vld [vmem:[%s6370_s4 + $0x60] ss:$16 sps:$4 sm:$0xff]   ;;  %v4284_v21 = vld [vmem:[%s6370_s4 + $0x68] ss:$16 sps:$4 sm:$0xff]  }
  0x2b   : > { %870 = vmatpush1.bf16.msra.mxu0 %v4265_v8  ;;  %923 = vmatpush1.bf16.msra.mxu1 %v4266_v9  ;;  %v4285_v22 = vld [vmem:[%s6370_s4 + $0x44] ss:$16 sps:$4 sm:$0xff]   ;;  %v4287_v23 = vld [vmem:[%s6370_s4 + $0x4c] ss:$16 sps:$4 sm:$0xff]   ;;  %v4289_v24 = vld [vmem:[%s6370_s4 + $0x40] ss:$16 sps:$4 sm:$0xff]  }
  0x2c   : > { %871 = vmatprep.subr.bf16.mxu0 %v4267_v10  ;;  %924 = vmatprep.subr.bf16.mxu1 %v4269_v11  ;;  %v4290_v25 = vld [vmem:[%s6370_s4 + $0x48] ss:$16 sps:$4 sm:$0xff]   ;;  %v4291_v26 = vld [vmem:[%s6370_s4 + $0x24] ss:$16 sps:$4 sm:$0xff]   ;;  %v4293_v27 = vld [vmem:[%s6370_s4 + $0x2c] ss:$16 sps:$4 sm:$0xff]  }
  0x2d   : > { %v4295_v28 = vld [vmem:[%s6370_s4 + $0x20] ss:$16 sps:$4 sm:$0xff]   ;;  %v4296_v29 = vld [vmem:[%s6370_s4 + $0x28] ss:$16 sps:$4 sm:$0xff]   ;;  %v4297_v30 = vld [vmem:[%s6370_s4 + $0x4] ss:$16 sps:$4 sm:$0xff]  }
  0x2e   : > { %v4299_v31 = vld [vmem:[%s6370_s4 + $0xc] ss:$16 sps:$4 sm:$0xff]   ;;  %v4301_v32 = vld [vmem:[%s6370_s4] ss:$16 sps:$4 sm:$0xff]   ;;  %v4302_v33 = vld [vmem:[%s6370_s4 + $0x8] ss:$16 sps:$4 sm:$0xff]  }
  0x2f   : > { %872 = vmatpush1.bf16.msra.mxu0 %v4271_v12  ;;  %925 = vmatpush1.bf16.msra.mxu1 %v4272_v13  ;;  %v4306_v34 = vld [vmem:[%s6372_s6 + $0xe4] ss:$16 sps:$4 sm:$0xff]   ;;  %v4309_v35 = vld [vmem:[%s6372_s6 + $0xec] ss:$16 sps:$4 sm:$0xff]   ;;  %v4304_v37 = vld [vmem:[%s6372_s6 + $0xe0] ss:$16 sps:$4 sm:$0xff]  }
  0x30   : > { %873 = vmatprep.subr.bf16.mxu0 %v4273_v14  ;;  %926 = vmatprep.subr.bf16.mxu1 %v4275_v15  ;;  %v4303_v36 = vld [vmem:[%s4876_s1] sm:$0xff]   ;;  %v4307_v38 = vld [vmem:[%s6372_s6 + $0xe8] ss:$16 sps:$4 sm:$0xff]   ;;  %v4315_v40 = vld [vmem:[%s6372_s6 + $0xcc] ss:$16 sps:$4 sm:$0xff]   ;;  %p4106_p6 = scmp.ne.s32.totalorder %s4867_s25, 1 }
  0x31   : > { %v4312_v39 = vld [vmem:[%s6372_s6 + $0xc4] ss:$16 sps:$4 sm:$0xff]   ;;  %v4310_v41 = vld [vmem:[%s6372_s6 + $0xc0] ss:$16 sps:$4 sm:$0xff]   ;;  %v4313_v42 = vld [vmem:[%s6372_s6 + $0xc8] ss:$16 sps:$4 sm:$0xff]  }
  0x32   : > { %v4318_v43 = vld [vmem:[%s6372_s6 + $0xa4] ss:$16 sps:$4 sm:$0xff]   ;;  %v4321_v44 = vld [vmem:[%s6372_s6 + $0xac] ss:$16 sps:$4 sm:$0xff]   ;;  %v4316_v46 = vld [vmem:[%s6372_s6 + $0xa0] ss:$16 sps:$4 sm:$0xff]  }
  0x33   : > { %874 = vmatpush1.bf16.msra.mxu0 %v4277_v16  ;;  %927 = vmatpush1.bf16.msra.mxu1 %v4278_v17  ;;  %v4334_v45 = vld [vmem:[%s4876_s1 + $0x8] sm:$0xff]   ;;  %v4324_v48 = vld [vmem:[%s6372_s6 + $0x84] ss:$16 sps:$4 sm:$0xff]   ;;  %v4322_v50 = vld [vmem:[%s6372_s6 + $0x80] ss:$16 sps:$4 sm:$0xff]   ;;  %s6632_s30 = sld [smem:[#allocation84_spill]] (!%p4106_p6) }
  0x34   : > { %875 = vmatprep.subr.bf16.mxu0 %v4279_v18  ;;  %928 = vmatprep.subr.bf16.mxu1 %v4281_v19  ;;  %v4319_v47 = vld [vmem:[%s6372_s6 + $0xa8] ss:$16 sps:$4 sm:$0xff]   ;;  %v4327_v49 = vld [vmem:[%s6372_s6 + $0x8c] ss:$16 sps:$4 sm:$0xff]   ;;  %v4330_v52 = vld [vmem:[%s6372_s6 + $0x64] ss:$16 sps:$4 sm:$0xff]  }
  0x35   : > { %v4325_v51 = vld [vmem:[%s6372_s6 + $0x88] ss:$16 sps:$4 sm:$0xff]   ;;  %v4333_v53 = vld [vmem:[%s6372_s6 + $0x6c] ss:$16 sps:$4 sm:$0xff]   ;;  %v4328_v54 = vld [vmem:[%s6372_s6 + $0x60] ss:$16 sps:$4 sm:$0xff]  }
  0x36   : > { %v4331_v55 = vld [vmem:[%s6372_s6 + $0x68] ss:$16 sps:$4 sm:$0xff]   ;;  %v4337_v56 = vld [vmem:[%s6372_s6 + $0x44] ss:$16 sps:$4 sm:$0xff]   ;;  %v4340_v57 = vld [vmem:[%s6372_s6 + $0x4c] ss:$16 sps:$4 sm:$0xff]  }
  0x37   : > { %876 = vmatpush1.bf16.msra.mxu0 %v4283_v20  ;;  %929 = vmatpush1.bf16.msra.mxu1 %v4284_v21  ;;  %v4335_v58 = vld [vmem:[%s6372_s6 + $0x40] ss:$16 sps:$4 sm:$0xff]   ;;  %v4338_v59 = vld [vmem:[%s6372_s6 + $0x48] ss:$16 sps:$4 sm:$0xff]   ;;  %v4343_v60 = vld [vmem:[%s6372_s6 + $0x24] ss:$16 sps:$4 sm:$0xff]  }
  0x38   : > { %877 = vmatprep.subr.bf16.mxu0 %v4285_v22  ;;  %930 = vmatprep.subr.bf16.mxu1 %v4287_v23  ;;  %v4346_v61 = vld [vmem:[%s6372_s6 + $0x2c] ss:$16 sps:$4 sm:$0xff]   ;;  %v4341_v62 = vld [vmem:[%s6372_s6 + $0x20] ss:$16 sps:$4 sm:$0xff]   ;;  %v4344_v63 = vld [vmem:[%s6372_s6 + $0x28] ss:$16 sps:$4 sm:$0xff]  }
  0x39   : > { %v4349_v0 = vld [vmem:[%s6372_s6 + $0x4] ss:$16 sps:$4 sm:$0xff]   ;;  %v4352_v1 = vld [vmem:[%s6372_s6 + $0xc] ss:$16 sps:$4 sm:$0xff]   ;;  %v4347_v2 = vld [vmem:[%s6372_s6] ss:$16 sps:$4 sm:$0xff]  }
  0x3a   : > { %v4350_v4 = vld [vmem:[%s6372_s6 + $0x8] ss:$16 sps:$4 sm:$0xff]   ;;  %v4356_v5 = vld [vmem:[%s6371_s5 + $0xe4] ss:$16 sps:$4 sm:$0xff]   ;;  %v4359_v6 = vld [vmem:[%s6371_s5 + $0xec] ss:$16 sps:$4 sm:$0xff]  }
  0x3b   : > { %878 = vmatpush1.bf16.msra.mxu0 %v4289_v24  ;;  %931 = vmatpush1.bf16.msra.mxu1 %v4290_v25  ;;  %v4353_v7 = vld [vmem:[%s4891_s26] sm:$0xff]   ;;  %v4357_v9 = vld [vmem:[%s6371_s5 + $0xe8] ss:$16 sps:$4 sm:$0xff]   ;;  %v4365_v11 = vld [vmem:[%s6371_s5 + $0xcc] ss:$16 sps:$4 sm:$0xff]   ;;  %s6633_s24 = sld [smem:[#allocation86_spill]] (!%p4106_p6) }
  0x3c   : > { %879 = vmatprep.subr.bf16.mxu0 %v4291_v26  ;;  %932 = vmatprep.subr.bf16.mxu1 %v4293_v27  ;;  %v4354_v8 = vld [vmem:[%s6371_s5 + $0xe0] ss:$16 sps:$4 sm:$0xff]   ;;  %v4362_v10 = vld [vmem:[%s6371_s5 + $0xc4] ss:$16 sps:$4 sm:$0xff]   ;;  %v4363_v13 = vld [vmem:[%s6371_s5 + $0xc8] ss:$16 sps:$4 sm:$0xff]  }
  0x3d   : > { %v4360_v12 = vld [vmem:[%s6371_s5 + $0xc0] ss:$16 sps:$4 sm:$0xff]   ;;  %v4368_v14 = vld [vmem:[%s6371_s5 + $0xa4] ss:$16 sps:$4 sm:$0xff]   ;;  %v4371_v15 = vld [vmem:[%s6371_s5 + $0xac] ss:$16 sps:$4 sm:$0xff]  }
  0x3e   : > { %v4366_v16 = vld [vmem:[%s6371_s5 + $0xa0] ss:$16 sps:$4 sm:$0xff]   ;;  %v4384_v17 = vld [vmem:[%s4891_s26 + $0x8] sm:$0xff]   ;;  %v4374_v19 = vld [vmem:[%s6371_s5 + $0x84] ss:$16 sps:$4 sm:$0xff]   ;;  %s6631_s26 = sld [smem:[#allocation85_spill]] (!%p4106_p6) }
  0x3f   : > { %880 = vmatpush1.bf16.msra.mxu0 %v4295_v28  ;;  %933 = vmatpush1.bf16.msra.mxu1 %v4296_v29  ;;  %v4369_v18 = vld [vmem:[%s6371_s5 + $0xa8] ss:$16 sps:$4 sm:$0xff]   ;;  %v4377_v20 = vld [vmem:[%s6371_s5 + $0x8c] ss:$16 sps:$4 sm:$0xff]   ;;  %v4372_v21 = vld [vmem:[%s6371_s5 + $0x80] ss:$16 sps:$4 sm:$0xff]  }
  0x40   : > { %881 = vmatprep.subr.bf16.mxu0 %v4297_v30  ;;  %934 = vmatprep.subr.bf16.mxu1 %v4299_v31  ;;  %v4375_v22 = vld [vmem:[%s6371_s5 + $0x88] ss:$16 sps:$4 sm:$0xff]   ;;  %v4380_v23 = vld [vmem:[%s6371_s5 + $0x64] ss:$16 sps:$4 sm:$0xff]   ;;  %v4383_v24 = vld [vmem:[%s6371_s5 + $0x6c] ss:$16 sps:$4 sm:$0xff]  }
  0x41   : > { %v4378_v25 = vld [vmem:[%s6371_s5 + $0x60] ss:$16 sps:$4 sm:$0xff]   ;;  %v4381_v26 = vld [vmem:[%s6371_s5 + $0x68] ss:$16 sps:$4 sm:$0xff]   ;;  %v4387_v27 = vld [vmem:[%s6371_s5 + $0x44] ss:$16 sps:$4 sm:$0xff]  }
  0x42   : > { %v4390_v28 = vld [vmem:[%s6371_s5 + $0x4c] ss:$16 sps:$4 sm:$0xff]   ;;  %v4385_v29 = vld [vmem:[%s6371_s5 + $0x40] ss:$16 sps:$4 sm:$0xff]   ;;  %v4388_v30 = vld [vmem:[%s6371_s5 + $0x48] ss:$16 sps:$4 sm:$0xff]  }
  0x43   : > { %882 = vmatpush1.bf16.msra.mxu0 %v4301_v32  ;;  %935 = vmatpush1.bf16.msra.mxu1 %v4302_v33  ;;  %v4393_v31 = vld [vmem:[%s6371_s5 + $0x24] ss:$16 sps:$4 sm:$0xff]   ;;  %v4396_v32 = vld [vmem:[%s6371_s5 + $0x2c] ss:$16 sps:$4 sm:$0xff]   ;;  %v4391_v33 = vld [vmem:[%s6371_s5 + $0x20] ss:$16 sps:$4 sm:$0xff]  }
  0x44   : > { %1218 = vmatprep.subr.bf16.mxu0 %v4306_v34  ;;  %1271 = vmatprep.subr.bf16.mxu1 %v4309_v35  ;;  %v4394_v34 = vld [vmem:[%s6371_s5 + $0x28] ss:$16 sps:$4 sm:$0xff]   ;;  %v4399_v35 = vld [vmem:[%s6371_s5 + $0x4] ss:$16 sps:$4 sm:$0xff]   ;;  %s6634_s0 = sld [smem:[#allocation87_spill]] (!%p4106_p6) }
  0x46   : > { %900 = vmatmul.mubr.bf16.vlgmr.msra.gmra.mxu0 %v4303_v36  ;;  %953 = vmatmul.mubr.bf16.vlgmr.msra.gmra.mxu1 %v4303_v36  ;;  %v4402_v36 = vld [vmem:[%s6371_s5 + $0xc] ss:$16 sps:$4 sm:$0xff]  }
  0x47   : > { %1219 = vmatpush1.bf16.msra.mxu0 %v4304_v37  ;;  %1272 = vmatpush1.bf16.msra.mxu1 %v4307_v38  ;;  %v4397_v37 = vld [vmem:[%s6371_s5] ss:$16 sps:$4 sm:$0xff]   ;;  %v4400_v38 = vld [vmem:[%s6371_s5 + $0x8] ss:$16 sps:$4 sm:$0xff]  }
  0x48   : > { %1220 = vmatprep.subr.bf16.mxu0 %v4312_v39  ;;  %1273 = vmatprep.subr.bf16.mxu1 %v4315_v40  ;;  %v4406_v39 = vld [vmem:[%s6373_s7 + $0xe4] ss:$16 sps:$4 sm:$0xff]   ;;  %v4409_v40 = vld [vmem:[%s6373_s7 + $0xec] ss:$16 sps:$4 sm:$0xff]  }
  0x49   : > { %909 = vmatprep.mubr.bf16.mxu0 %v6388_v3  ;;  %962 = vmatprep.mubr.bf16.mxu1 %v6388_v3 }
  0x4b   : > { %1221 = vmatpush1.bf16.msra.mxu0 %v4310_v41  ;;  %1274 = vmatpush1.bf16.msra.mxu1 %v4313_v42  ;;  %v4403_v41 = vld [vmem:[%s4881_s23] sm:$0xff]  }
  0x4c   : > { %1222 = vmatprep.subr.bf16.mxu0 %v4318_v43  ;;  %1275 = vmatprep.subr.bf16.mxu1 %v4321_v44  ;;  %v4404_v42 = vld [vmem:[%s6373_s7 + $0xe0] ss:$16 sps:$4 sm:$0xff]   ;;  %v4407_v43 = vld [vmem:[%s6373_s7 + $0xe8] ss:$16 sps:$4 sm:$0xff]   ;;  %v4412_v44 = vld [vmem:[%s6373_s7 + $0xc4] ss:$16 sps:$4 sm:$0xff]  }
  0x4e   : > { %910 = vmatmul.mubr.bf16.gmra.mxu0 %v4334_v45  ;;  %963 = vmatmul.mubr.bf16.gmra.mxu1 %v4334_v45  ;;  %v4415_v45 = vld [vmem:[%s6373_s7 + $0xcc] ss:$16 sps:$4 sm:$0xff]  }
  0x4f   : > { %1223 = vmatpush1.bf16.msra.mxu0 %v4316_v46  ;;  %1276 = vmatpush1.bf16.msra.mxu1 %v4319_v47  ;;  %v4410_v46 = vld [vmem:[%s6373_s7 + $0xc0] ss:$16 sps:$4 sm:$0xff]   ;;  %v4413_v47 = vld [vmem:[%s6373_s7 + $0xc8] ss:$16 sps:$4 sm:$0xff]  }
  0x50   : > { %1224 = vmatprep.subr.bf16.mxu0 %v4324_v48  ;;  %1277 = vmatprep.subr.bf16.mxu1 %v4327_v49  ;;  %v4419_v48 = vld [vmem:[%s6373_s7 + $0xa4] ss:$16 sps:$4 sm:$0xff]   ;;  %v4422_v49 = vld [vmem:[%s6373_s7 + $0xac] ss:$16 sps:$4 sm:$0xff]  }
  0x51   : > { %1250 = vmatprep.mubr.bf16.mxu0 %v6388_v3  ;;  %1303 = vmatprep.mubr.bf16.mxu1 %v6388_v3 }
  0x53   : > { %1225 = vmatpush1.bf16.msra.mxu0 %v4322_v50  ;;  %1278 = vmatpush1.bf16.msra.mxu1 %v4325_v51  ;;  %v4416_v50 = vld [vmem:[%s4881_s23 + $0x8] sm:$0xff]   ;;  %v4417_v51 = vld [vmem:[%s6373_s7 + $0xa0] ss:$16 sps:$4 sm:$0xff]  }
  0x54   : > { %1226 = vmatprep.subr.bf16.mxu0 %v4330_v52  ;;  %1279 = vmatprep.subr.bf16.mxu1 %v4333_v53  ;;  %v4420_v52 = vld [vmem:[%s6373_s7 + $0xa8] ss:$16 sps:$4 sm:$0xff]   ;;  %v4425_v53 = vld [vmem:[%s6373_s7 + $0x84] ss:$16 sps:$4 sm:$0xff]  }
  0x57   : > { %1227 = vmatpush1.bf16.msra.mxu0 %v4328_v54  ;;  %1280 = vmatpush1.bf16.msra.mxu1 %v4331_v55  ;;  %v4428_v54 = vld [vmem:[%s6373_s7 + $0x8c] ss:$16 sps:$4 sm:$0xff]   ;;  %v4423_v55 = vld [vmem:[%s6373_s7 + $0x80] ss:$16 sps:$4 sm:$0xff]  }
  0x58   : > { %1228 = vmatprep.subr.bf16.mxu0 %v4337_v56  ;;  %1281 = vmatprep.subr.bf16.mxu1 %v4340_v57  ;;  %v4426_v56 = vld [vmem:[%s6373_s7 + $0x88] ss:$16 sps:$4 sm:$0xff]   ;;  %v4431_v57 = vld [vmem:[%s6373_s7 + $0x64] ss:$16 sps:$4 sm:$0xff]  }
  0x5b   : > { %1229 = vmatpush1.bf16.msra.mxu0 %v4335_v58  ;;  %1282 = vmatpush1.bf16.msra.mxu1 %v4338_v59  ;;  %v4434_v58 = vld [vmem:[%s6373_s7 + $0x6c] ss:$16 sps:$4 sm:$0xff]   ;;  %v4429_v59 = vld [vmem:[%s6373_s7 + $0x60] ss:$16 sps:$4 sm:$0xff]  }
  0x5c   : > { %1230 = vmatprep.subr.bf16.mxu0 %v4343_v60  ;;  %1283 = vmatprep.subr.bf16.mxu1 %v4346_v61  ;;  %v4432_v60 = vld [vmem:[%s6373_s7 + $0x68] ss:$16 sps:$4 sm:$0xff]   ;;  %v4437_v61 = vld [vmem:[%s6373_s7 + $0x44] ss:$16 sps:$4 sm:$0xff]  }
  0x5f   : > { %1231 = vmatpush1.bf16.msra.mxu0 %v4341_v62  ;;  %1284 = vmatpush1.bf16.msra.mxu1 %v4344_v63  ;;  %v4440_v62 = vld [vmem:[%s6373_s7 + $0x4c] ss:$16 sps:$4 sm:$0xff]   ;;  %v4435_v63 = vld [vmem:[%s6373_s7 + $0x40] ss:$16 sps:$4 sm:$0xff]  }
  0x60   : > { %1232 = vmatprep.subr.bf16.mxu0 %v4349_v0  ;;  %1285 = vmatprep.subr.bf16.mxu1 %v4352_v1  ;;  %v4438_v0 = vld [vmem:[%s6373_s7 + $0x48] ss:$16 sps:$4 sm:$0xff]   ;;  %v4443_v1 = vld [vmem:[%s6373_s7 + $0x24] ss:$16 sps:$4 sm:$0xff]  }
  0x63   : > { %1233 = vmatpush1.bf16.msra.mxu0 %v4347_v2  ;;  %1286 = vmatpush1.bf16.msra.mxu1 %v4350_v4  ;;  %v4446_v2 = vld [vmem:[%s6373_s7 + $0x2c] ss:$16 sps:$4 sm:$0xff]   ;;  %v4441_v4 = vld [vmem:[%s6373_s7 + $0x20] ss:$16 sps:$4 sm:$0xff]  }
  0x64   : > { %1569 = vmatprep.subr.bf16.mxu0 %v4356_v5  ;;  %1622 = vmatprep.subr.bf16.mxu1 %v4359_v6  ;;  %v4444_v5 = vld [vmem:[%s6373_s7 + $0x28] ss:$16 sps:$4 sm:$0xff]   ;;  %v4449_v6 = vld [vmem:[%s6373_s7 + $0x4] ss:$16 sps:$4 sm:$0xff]  }
  0x66   : > { %1251 = vmatmul.mubr.bf16.vlgmr.msra.gmra.mxu0 %v4353_v7  ;;  %1304 = vmatmul.mubr.bf16.vlgmr.msra.gmra.mxu1 %v4353_v7  ;;  %v4452_v7 = vld [vmem:[%s6373_s7 + $0xc] ss:$16 sps:$4 sm:$0xff]  }
  0x67   : > { %1570 = vmatpush1.bf16.msra.mxu0 %v4354_v8  ;;  %1623 = vmatpush1.bf16.msra.mxu1 %v4357_v9  ;;  %v4447_v8 = vld [vmem:[%s6373_s7] ss:$16 sps:$4 sm:$0xff]   ;;  %v4450_v9 = vld [vmem:[%s6373_s7 + $0x8] ss:$16 sps:$4 sm:$0xff]  }
  0x68   : > { %1571 = vmatprep.subr.bf16.mxu0 %v4362_v10  ;;  %1624 = vmatprep.subr.bf16.mxu1 %v4365_v11  ;;  %v5311_v10 = vld [vmem:[%s6374_s8 + $0xe4] ss:$16 sps:$4 sm:$0xff]   ;;  %v5316_v11 = vld [vmem:[%s6374_s8 + $0xec] ss:$16 sps:$4 sm:$0xff]  }
  0x69   : > { %1260 = vmatprep.mubr.bf16.mxu0 %v6388_v3  ;;  %1313 = vmatprep.mubr.bf16.mxu1 %v6388_v3  ;;  %6487 = vst [vmem:[#allocation11_spill] sm:$0xff] %v5311_v10  ;;  %6488 = vst [vmem:[#allocation12_spill] sm:$0xff] %v5316_v11 }
  0x6b   : > { %1572 = vmatpush1.bf16.msra.mxu0 %v4360_v12  ;;  %1625 = vmatpush1.bf16.msra.mxu1 %v4363_v13  ;;  %v4453_v12 = vld [vmem:[%s4896_s18] sm:$0xff]  }
  0x6c   : > { %1573 = vmatprep.subr.bf16.mxu0 %v4368_v14  ;;  %1626 = vmatprep.subr.bf16.mxu1 %v4371_v15  ;;  %v5322_v13 = vld [vmem:[%s6374_s8 + $0xe0] ss:$16 sps:$4 sm:$0xff]   ;;  %v5327_v14 = vld [vmem:[%s6374_s8 + $0xe8] ss:$16 sps:$4 sm:$0xff]   ;;  %v5332_v15 = vld [vmem:[%s6374_s8 + $0xc4] ss:$16 sps:$4 sm:$0xff]  }
  0x6d   : > { %6489 = vst [vmem:[#allocation13_spill] sm:$0xff] %v5322_v13  ;;  %6490 = vst [vmem:[#allocation14_spill] sm:$0xff] %v5327_v14 }
  0x6e   : > { %1261 = vmatmul.mubr.bf16.gmra.mxu0 %v4384_v17  ;;  %1314 = vmatmul.mubr.bf16.gmra.mxu1 %v4384_v17  ;;  %6491 = vst [vmem:[#allocation15_spill] sm:$0xff] %v5332_v15  ;;  %v5344_v17 = vld [vmem:[%s6374_s8 + $0xc0] ss:$16 sps:$4 sm:$0xff]  }
  0x6f   : > { %1574 = vmatpush1.bf16.msra.mxu0 %v4366_v16  ;;  %1627 = vmatpush1.bf16.msra.mxu1 %v4369_v18  ;;  %v5339_v16 = vld [vmem:[%s6374_s8 + $0xcc] ss:$16 sps:$4 sm:$0xff]   ;;  %6493 = vst [vmem:[#allocation17_spill] sm:$0xff] %v5344_v17  ;;  %v5351_v18 = vld [vmem:[%s6374_s8 + $0xc8] ss:$16 sps:$4 sm:$0xff]  }
  0x70   : > { %1575 = vmatprep.subr.bf16.mxu0 %v4374_v19  ;;  %1628 = vmatprep.subr.bf16.mxu1 %v4377_v20  ;;  %6492 = vst [vmem:[#allocation16_spill] sm:$0xff] %v5339_v16  ;;  %6494 = vst [vmem:[#allocation18_spill] sm:$0xff] %v5351_v18  ;;  %v5358_v19 = vld [vmem:[%s6374_s8 + $0xa4] ss:$16 sps:$4 sm:$0xff]   ;;  %v5363_v20 = vld [vmem:[%s6374_s8 + $0xac] ss:$16 sps:$4 sm:$0xff]  }
  0x71   : > { %1601 = vmatprep.mubr.bf16.mxu0 %v6388_v3  ;;  %1654 = vmatprep.mubr.bf16.mxu1 %v6388_v3  ;;  %6495 = vst [vmem:[#allocation19_spill] sm:$0xff] %v5358_v19  ;;  %6496 = vst [vmem:[#allocation20_spill] sm:$0xff] %v5363_v20 }
  0x73   : > { %1576 = vmatpush1.bf16.msra.mxu0 %v4372_v21  ;;  %1629 = vmatpush1.bf16.msra.mxu1 %v4375_v22  ;;  %v4466_v21 = vld [vmem:[%s4896_s18 + $0x8] sm:$0xff]   ;;  %v5373_v22 = vld [vmem:[%s6374_s8 + $0xa0] ss:$16 sps:$4 sm:$0xff]  }
  0x74   : > { %1577 = vmatprep.subr.bf16.mxu0 %v4380_v23  ;;  %1630 = vmatprep.subr.bf16.mxu1 %v4383_v24  ;;  %6497 = vst [vmem:[#allocation21_spill] sm:$0xff] %v5373_v22  ;;  %v5378_v23 = vld [vmem:[%s6374_s8 + $0xa8] ss:$16 sps:$4 sm:$0xff]   ;;  %v5385_v24 = vld [vmem:[%s6374_s8 + $0x84] ss:$16 sps:$4 sm:$0xff]  }
  0x75   : > { %6498 = vst [vmem:[#allocation22_spill] sm:$0xff] %v5378_v23  ;;  %6499 = vst [vmem:[#allocation23_spill] sm:$0xff] %v5385_v24 }
  0x77   : > { %1578 = vmatpush1.bf16.msra.mxu0 %v4378_v25  ;;  %1631 = vmatpush1.bf16.msra.mxu1 %v4381_v26  ;;  %v5390_v25 = vld [vmem:[%s6374_s8 + $0x8c] ss:$16 sps:$4 sm:$0xff]   ;;  %v5397_v26 = vld [vmem:[%s6374_s8 + $0x80] ss:$16 sps:$4 sm:$0xff]  }
  0x78   : > { %1579 = vmatprep.subr.bf16.mxu0 %v4387_v27  ;;  %1632 = vmatprep.subr.bf16.mxu1 %v4390_v28  ;;  %6500 = vst [vmem:[#allocation24_spill] sm:$0xff] %v5390_v25  ;;  %6501 = vst [vmem:[#allocation25_spill] sm:$0xff] %v5397_v26  ;;  %v5402_v27 = vld [vmem:[%s6374_s8 + $0x88] ss:$16 sps:$4 sm:$0xff]   ;;  %v5409_v28 = vld [vmem:[%s6374_s8 + $0x64] ss:$16 sps:$4 sm:$0xff]  }
  0x79   : > { %6502 = vst [vmem:[#allocation26_spill] sm:$0xff] %v5402_v27  ;;  %6503 = vst [vmem:[#allocation27_spill] sm:$0xff] %v5409_v28 }
  0x7b   : > { %1580 = vmatpush1.bf16.msra.mxu0 %v4385_v29  ;;  %1633 = vmatpush1.bf16.msra.mxu1 %v4388_v30  ;;  %v5414_v29 = vld [vmem:[%s6374_s8 + $0x6c] ss:$16 sps:$4 sm:$0xff]   ;;  %v5423_v30 = vld [vmem:[%s6374_s8 + $0x60] ss:$16 sps:$4 sm:$0xff]  }
  0x7c   : > { %1581 = vmatprep.subr.bf16.mxu0 %v4393_v31  ;;  %1634 = vmatprep.subr.bf16.mxu1 %v4396_v32  ;;  %6504 = vst [vmem:[#allocation28_spill] sm:$0xff] %v5414_v29  ;;  %6505 = vst [vmem:[#allocation29_spill] sm:$0xff] %v5423_v30  ;;  %v5428_v31 = vld [vmem:[%s6374_s8 + $0x68] ss:$16 sps:$4 sm:$0xff]   ;;  %v5435_v32 = vld [vmem:[%s6374_s8 + $0x44] ss:$16 sps:$4 sm:$0xff]  }
  0x7d   : > { %6506 = vst [vmem:[#allocation30_spill] sm:$0xff] %v5428_v31  ;;  %6507 = vst [vmem:[#allocation31_spill] sm:$0xff] %v5435_v32 }
  0x7f   : > { %1582 = vmatpush1.bf16.msra.mxu0 %v4391_v33  ;;  %1635 = vmatpush1.bf16.msra.mxu1 %v4394_v34  ;;  %v5440_v33 = vld [vmem:[%s6374_s8 + $0x4c] ss:$16 sps:$4 sm:$0xff]   ;;  %v5447_v34 = vld [vmem:[%s6374_s8 + $0x40] ss:$16 sps:$4 sm:$0xff]  }
  0x80   : > { %1583 = vmatprep.subr.bf16.mxu0 %v4399_v35  ;;  %1636 = vmatprep.subr.bf16.mxu1 %v4402_v36  ;;  %6508 = vst [vmem:[#allocation32_spill] sm:$0xff] %v5440_v33  ;;  %6509 = vst [vmem:[#allocation33_spill] sm:$0xff] %v5447_v34  ;;  %v5452_v35 = vld [vmem:[%s6374_s8 + $0x48] ss:$16 sps:$4 sm:$0xff]   ;;  %v5459_v36 = vld [vmem:[%s6374_s8 + $0x24] ss:$16 sps:$4 sm:$0xff]  }
  0x81   : > { %6510 = vst [vmem:[#allocation34_spill] sm:$0xff] %v5452_v35  ;;  %6511 = vst [vmem:[#allocation35_spill] sm:$0xff] %v5459_v36 }
  0x83   : > { %1584 = vmatpush1.bf16.msra.mxu0 %v4397_v37  ;;  %1637 = vmatpush1.bf16.msra.mxu1 %v4400_v38  ;;  %v5464_v37 = vld [vmem:[%s6374_s8 + $0x2c] ss:$16 sps:$4 sm:$0xff]   ;;  %v5471_v38 = vld [vmem:[%s6374_s8 + $0x20] ss:$16 sps:$4 sm:$0xff]  }
  0x84   : > { %1899 = vmatprep.subr.bf16.mxu0 %v4406_v39  ;;  %1952 = vmatprep.subr.bf16.mxu1 %v4409_v40  ;;  %6512 = vst [vmem:[#allocation36_spill] sm:$0xff] %v5464_v37  ;;  %6513 = vst [vmem:[#allocation37_spill] sm:$0xff] %v5471_v38  ;;  %v5476_v39 = vld [vmem:[%s6374_s8 + $0x28] ss:$16 sps:$4 sm:$0xff]   ;;  %v5483_v40 = vld [vmem:[%s6374_s8 + $0x4] ss:$16 sps:$4 sm:$0xff]  }
  0x85   : > { %6514 = vst [vmem:[#allocation38_spill] sm:$0xff] %v5476_v39  ;;  %6515 = vst [vmem:[#allocation39_spill] sm:$0xff] %v5483_v40 }
  0x86   : > { %1602 = vmatmul.mubr.bf16.vlgmr.msra.gmra.mxu0 %v4403_v41  ;;  %1655 = vmatmul.mubr.bf16.vlgmr.msra.gmra.mxu1 %v4403_v41  ;;  %v5488_v41 = vld [vmem:[%s6374_s8 + $0xc] ss:$16 sps:$4 sm:$0xff]  }
  0x87   : > { %1900 = vmatpush1.bf16.msra.mxu0 %v4404_v42  ;;  %1953 = vmatpush1.bf16.msra.mxu1 %v4407_v43  ;;  %6516 = vst [vmem:[#allocation40_spill] sm:$0xff] %v5488_v41  ;;  %v5495_v42 = vld [vmem:[%s6374_s8] ss:$16 sps:$4 sm:$0xff]   ;;  %v5500_v43 = vld [vmem:[%s6374_s8 + $0x8] ss:$16 sps:$4 sm:$0xff]  }
  0x88   : > { %1901 = vmatprep.subr.bf16.mxu0 %v4412_v44  ;;  %1954 = vmatprep.subr.bf16.mxu1 %v4415_v45  ;;  %6517 = vst [vmem:[#allocation41_spill] sm:$0xff] %v5495_v42  ;;  %6518 = vst [vmem:[#allocation42_spill] sm:$0xff] %v5500_v43  ;;  %v2117_v44 = vld [vmem:[#allocation2] sm:$0xff] }
  0x89   : > { %1611 = vmatprep.mubr.bf16.mxu0 %v6388_v3  ;;  %1664 = vmatprep.mubr.bf16.mxu1 %v6388_v3  ;;  %v5507_v45 = vld [vmem:[%s6375_s9 + $0xe4] ss:$16 sps:$4 sm:$0xff]  }
  0x8a   : > { %6519 = vst [vmem:[#allocation43_spill] sm:$0xff] %v5507_v45 }
  0x8b   : > { %1902 = vmatpush1.bf16.msra.mxu0 %v4410_v46  ;;  %1955 = vmatpush1.bf16.msra.mxu1 %v4413_v47  ;;  %v5512_v46 = vld [vmem:[%s6375_s9 + $0xec] ss:$16 sps:$4 sm:$0xff]   ;;  %v2128_v47 = vpack.c.bf16 %v2117_v44, %v2117_v44 }
  0x8c   : > { %1903 = vmatprep.subr.bf16.mxu0 %v4419_v48  ;;  %1956 = vmatprep.subr.bf16.mxu1 %v4422_v49  ;;  %6520 = vst [vmem:[#allocation44_spill] sm:$0xff] %v5512_v46  ;;  %v5519_v48 = vld [vmem:[%s6375_s9 + $0xe0] ss:$16 sps:$4 sm:$0xff]   ;;  %v5524_v49 = vld [vmem:[%s6375_s9 + $0xe8] ss:$16 sps:$4 sm:$0xff]  }
  0x8d   : > { %v5682_v44 = vld [vmem:[%s6375_s9 + $0xc] ss:$16 sps:$4 sm:$0xff]  }
  0x8e   : > { %1612 = vmatmul.mubr.bf16.gmra.mxu0 %v4416_v50  ;;  %1665 = vmatmul.mubr.bf16.gmra.mxu1 %v4416_v50  ;;  %v5531_v50 = vld [vmem:[%s6375_s9 + $0xc4] ss:$16 sps:$4 sm:$0xff]   ;;  %6544 = vst [vmem:[#allocation68_spill] sm:$0xff] %v5682_v44 }
  0x8f   : > { %1904 = vmatpush1.bf16.msra.mxu0 %v4417_v51  ;;  %1957 = vmatpush1.bf16.msra.mxu1 %v4420_v52  ;;  %v5536_v51 = vld [vmem:[%s6375_s9 + $0xcc] ss:$16 sps:$4 sm:$0xff]   ;;  %v5543_v52 = vld [vmem:[%s6375_s9 + $0xc0] ss:$16 sps:$4 sm:$0xff]  }
  0x90   : > { %1905 = vmatprep.subr.bf16.mxu0 %v4425_v53  ;;  %1958 = vmatprep.subr.bf16.mxu1 %v4428_v54  ;;  %6521 = vst [vmem:[#allocation45_spill] sm:$0xff] %v5543_v52  ;;  %v5548_v53 = vld [vmem:[%s6375_s9 + $0xc8] ss:$16 sps:$4 sm:$0xff]   ;;  %v5555_v54 = vld [vmem:[%s6375_s9 + $0xa4] ss:$16 sps:$4 sm:$0xff]  }
  0x91   : > { %1931 = vmatprep.mubr.bf16.mxu0 %v6388_v3  ;;  %1984 = vmatprep.mubr.bf16.mxu1 %v6388_v3  ;;  %6522 = vst [vmem:[#allocation46_spill] sm:$0xff] %v5548_v53  ;;  %6523 = vst [vmem:[#allocation47_spill] sm:$0xff] %v5555_v54 }
  0x93   : > { %1906 = vmatpush1.bf16.msra.mxu0 %v4423_v55  ;;  %1959 = vmatpush1.bf16.msra.mxu1 %v4426_v56  ;;  %v5560_v55 = vld [vmem:[%s6375_s9 + $0xac] ss:$16 sps:$4 sm:$0xff]   ;;  %v5569_v56 = vld [vmem:[%s6375_s9 + $0xa0] ss:$16 sps:$4 sm:$0xff]  }
  0x94   : > { %1907 = vmatprep.subr.bf16.mxu0 %v4431_v57  ;;  %1960 = vmatprep.subr.bf16.mxu1 %v4434_v58  ;;  %6524 = vst [vmem:[#allocation48_spill] sm:$0xff] %v5560_v55  ;;  %6525 = vst [vmem:[#allocation49_spill] sm:$0xff] %v5569_v56  ;;  %v5574_v57 = vld [vmem:[%s6375_s9 + $0xa8] ss:$16 sps:$4 sm:$0xff]   ;;  %v5581_v58 = vld [vmem:[%s6375_s9 + $0x84] ss:$16 sps:$4 sm:$0xff]  }
  0x95   : > { %6526 = vst [vmem:[#allocation50_spill] sm:$0xff] %v5574_v57  ;;  %6527 = vst [vmem:[#allocation51_spill] sm:$0xff] %v5581_v58 }
  0x97   : > { %1908 = vmatpush1.bf16.msra.mxu0 %v4429_v59  ;;  %1961 = vmatpush1.bf16.msra.mxu1 %v4432_v60  ;;  %v5586_v59 = vld [vmem:[%s6375_s9 + $0x8c] ss:$16 sps:$4 sm:$0xff]   ;;  %v5593_v60 = vld [vmem:[%s6375_s9 + $0x80] ss:$16 sps:$4 sm:$0xff]  }
  0x98   : > { %1909 = vmatprep.subr.bf16.mxu0 %v4437_v61  ;;  %1962 = vmatprep.subr.bf16.mxu1 %v4440_v62  ;;  %6528 = vst [vmem:[#allocation52_spill] sm:$0xff] %v5586_v59  ;;  %6529 = vst [vmem:[#allocation53_spill] sm:$0xff] %v5593_v60  ;;  %v5598_v61 = vld [vmem:[%s6375_s9 + $0x88] ss:$16 sps:$4 sm:$0xff]   ;;  %v5605_v62 = vld [vmem:[%s6375_s9 + $0x64] ss:$16 sps:$4 sm:$0xff]  }
  0x99   : > { %6530 = vst [vmem:[#allocation54_spill] sm:$0xff] %v5598_v61  ;;  %6531 = vst [vmem:[#allocation55_spill] sm:$0xff] %v5605_v62 }
  0x9b   : > { %1910 = vmatpush1.bf16.msra.mxu0 %v4435_v63  ;;  %1963 = vmatpush1.bf16.msra.mxu1 %v4438_v0  ;;  %v5610_v63 = vld [vmem:[%s6375_s9 + $0x6c] ss:$16 sps:$4 sm:$0xff]   ;;  %v5617_v0 = vld [vmem:[%s6375_s9 + $0x60] ss:$16 sps:$4 sm:$0xff]  }
  0x9c   : > { %1911 = vmatprep.subr.bf16.mxu0 %v4443_v1  ;;  %1964 = vmatprep.subr.bf16.mxu1 %v4446_v2  ;;  %6532 = vst [vmem:[#allocation56_spill] sm:$0xff] %v5610_v63  ;;  %6533 = vst [vmem:[#allocation57_spill] sm:$0xff] %v5617_v0  ;;  %v5622_v1 = vld [vmem:[%s6375_s9 + $0x68] ss:$16 sps:$4 sm:$0xff]   ;;  %v5629_v2 = vld [vmem:[%s6375_s9 + $0x44] ss:$16 sps:$4 sm:$0xff]  }
  0x9d   : > { %6534 = vst [vmem:[#allocation58_spill] sm:$0xff] %v5622_v1  ;;  %6535 = vst [vmem:[#allocation59_spill] sm:$0xff] %v5629_v2 }
  0x9f   : > { %1912 = vmatpush1.bf16.msra.mxu0 %v4441_v4  ;;  %1965 = vmatpush1.bf16.msra.mxu1 %v4444_v5  ;;  %v5634_v4 = vld [vmem:[%s6375_s9 + $0x4c] ss:$16 sps:$4 sm:$0xff]   ;;  %v5641_v5 = vld [vmem:[%s6375_s9 + $0x40] ss:$16 sps:$4 sm:$0xff]  }
  0xa0   : > { %1913 = vmatprep.subr.bf16.mxu0 %v4449_v6  ;;  %1966 = vmatprep.subr.bf16.mxu1 %v4452_v7  ;;  %6536 = vst [vmem:[#allocation60_spill] sm:$0xff] %v5634_v4  ;;  %6537 = vst [vmem:[#allocation61_spill] sm:$0xff] %v5641_v5  ;;  %v5646_v6 = vld [vmem:[%s6375_s9 + $0x48] ss:$16 sps:$4 sm:$0xff]   ;;  %v5653_v7 = vld [vmem:[%s6375_s9 + $0x24] ss:$16 sps:$4 sm:$0xff]  }
  0xa1   : > { %6538 = vst [vmem:[#allocation62_spill] sm:$0xff] %v5646_v6  ;;  %6539 = vst [vmem:[#allocation63_spill] sm:$0xff] %v5653_v7 }
  0xa3   : > { %1914 = vmatpush1.bf16.msra.mxu0 %v4447_v8  ;;  %1967 = vmatpush1.bf16.msra.mxu1 %v4450_v9  ;;  %v5658_v8 = vld [vmem:[%s6375_s9 + $0x2c] ss:$16 sps:$4 sm:$0xff]   ;;  %v5665_v9 = vld [vmem:[%s6375_s9 + $0x20] ss:$16 sps:$4 sm:$0xff]  }
  0xa4   : > { %2289 = vmatprep.subr.bf16.mxu0 %v5311_v10  ;;  %2330 = vmatprep.subr.bf16.mxu1 %v5316_v11  ;;  %6540 = vst [vmem:[#allocation64_spill] sm:$0xff] %v5658_v8  ;;  %6541 = vst [vmem:[#allocation65_spill] sm:$0xff] %v5665_v9 }
  0xa6   : > { %1932 = vmatmul.mubr.bf16.vlgmr.msra.gmra.mxu0 %v4453_v12  ;;  %1985 = vmatmul.mubr.bf16.vlgmr.msra.gmra.mxu1 %v4453_v12  ;;  %v5670_v12 = vld [vmem:[%s6375_s9 + $0x28] ss:$16 sps:$4 sm:$0xff]  }
  0xa7   : > { %2290 = vmatpush1.bf16.msra.mxu0 %v5322_v13  ;;  %2331 = vmatpush1.bf16.msra.mxu1 %v5327_v14  ;;  %6542 = vst [vmem:[#allocation66_spill] sm:$0xff] %v5670_v12 }
  0xa8   : > { %2291 = vmatprep.subr.bf16.mxu0 %v5332_v15  ;;  %2332 = vmatprep.subr.bf16.mxu1 %v5339_v16 }
  0xa9   : > { %1941 = vmatprep.mubr.bf16.mxu0 %v6388_v3  ;;  %1994 = vmatprep.mubr.bf16.mxu1 %v6388_v3 }
  0xab   : > { %2292 = vmatpush1.bf16.msra.mxu0 %v5344_v17  ;;  %2333 = vmatpush1.bf16.msra.mxu1 %v5351_v18 }
  0xac   : > { %2293 = vmatprep.subr.bf16.mxu0 %v5358_v19  ;;  %2334 = vmatprep.subr.bf16.mxu1 %v5363_v20 }
  0xae   : > { %1942 = vmatmul.mubr.bf16.gmra.mxu0 %v4466_v21  ;;  %1995 = vmatmul.mubr.bf16.gmra.mxu1 %v4466_v21  ;;  %v5677_v21 = vld [vmem:[%s6375_s9 + $0x4] ss:$16 sps:$4 sm:$0xff]  }
  0xaf   : > { %2294 = vmatpush1.bf16.msra.mxu0 %v5373_v22  ;;  %2335 = vmatpush1.bf16.msra.mxu1 %v5378_v23  ;;  %6543 = vst [vmem:[#allocation67_spill] sm:$0xff] %v5677_v21 }
  0xb0   : > { %2295 = vmatprep.subr.bf16.mxu0 %v5385_v24  ;;  %2336 = vmatprep.subr.bf16.mxu1 %v5390_v25 }
  0xb1   : > { %2321 = vmatprep.mubr.bf16.mxu0 %v6388_v3  ;;  %2362 = vmatprep.mubr.bf16.mxu1 %v6388_v3 }
  0xb3   : > { %2296 = vmatpush1.bf16.msra.mxu0 %v5397_v26  ;;  %2337 = vmatpush1.bf16.msra.mxu1 %v5402_v27 }
  0xb4   : > { %2297 = vmatprep.subr.bf16.mxu0 %v5409_v28  ;;  %2338 = vmatprep.subr.bf16.mxu1 %v5414_v29 }
  0xb7   : > { %2298 = vmatpush1.bf16.msra.mxu0 %v5423_v30  ;;  %2339 = vmatpush1.bf16.msra.mxu1 %v5428_v31 }
  0xb8   : > { %2299 = vmatprep.subr.bf16.mxu0 %v5435_v32  ;;  %2340 = vmatprep.subr.bf16.mxu1 %v5440_v33 }
  0xbb   : > { %2300 = vmatpush1.bf16.msra.mxu0 %v5447_v34  ;;  %2341 = vmatpush1.bf16.msra.mxu1 %v5452_v35 }
  0xbc   : > { %2301 = vmatprep.subr.bf16.mxu0 %v5459_v36  ;;  %2342 = vmatprep.subr.bf16.mxu1 %v5464_v37 }
  0xbf   : > { %2302 = vmatpush1.bf16.msra.mxu0 %v5471_v38  ;;  %2343 = vmatpush1.bf16.msra.mxu1 %v5476_v39 }
  0xc0   : > { %2303 = vmatprep.subr.bf16.mxu0 %v5483_v40  ;;  %2344 = vmatprep.subr.bf16.mxu1 %v5488_v41 }
  0xc3   : > { %2304 = vmatpush1.bf16.msra.mxu0 %v5495_v42  ;;  %2345 = vmatpush1.bf16.msra.mxu1 %v5500_v43 }
  0xc4   : > { %2543 = vmatprep.subr.bf16.mxu0 %v5507_v45  ;;  %2584 = vmatprep.subr.bf16.mxu1 %v5512_v46 }
  0xc6   : > { %2322 = vmatmul.mubr.bf16.vlgmr.msra.gmra.mxu0 %v2128_v47  ;;  %2363 = vmatmul.mubr.bf16.vlgmr.msra.gmra.mxu1 %v2128_v47  ;;  %v5689_v47 = vld [vmem:[%s6375_s9] ss:$16 sps:$4 sm:$0xff]  }
  0xc7   : > { %2544 = vmatpush1.bf16.msra.mxu0 %v5519_v48  ;;  %2585 = vmatpush1.bf16.msra.mxu1 %v5524_v49  ;;  %6545 = vst [vmem:[#allocation69_spill] sm:$0xff] %v5689_v47 }
  0xc8   : > { %2545 = vmatprep.subr.bf16.mxu0 %v5531_v50  ;;  %2586 = vmatprep.subr.bf16.mxu1 %v5536_v51 }
  0xc9   : > { %2575 = vmatprep.mubr.bf16.mxu0 %v6388_v3  ;;  %2616 = vmatprep.mubr.bf16.mxu1 %v6388_v3  ;;  %v5694_v3 = vld [vmem:[%s6375_s9 + $0x8] ss:$16 sps:$4 sm:$0xff]  }
  0xca   : > { %6546 = vst [vmem:[#allocation70_spill] sm:$0xff] %v5694_v3 }
  0xcb   : > { %2546 = vmatpush1.bf16.msra.mxu0 %v5543_v52  ;;  %2587 = vmatpush1.bf16.msra.mxu1 %v5548_v53 }
  0xcc   : > { %2547 = vmatprep.subr.bf16.mxu0 %v5555_v54  ;;  %2588 = vmatprep.subr.bf16.mxu1 %v5560_v55 }
  0xcf   : > { %2548 = vmatpush1.bf16.msra.mxu0 %v5569_v56  ;;  %2589 = vmatpush1.bf16.msra.mxu1 %v5574_v57 }
  0xd0   : > { %2549 = vmatprep.subr.bf16.mxu0 %v5581_v58  ;;  %2590 = vmatprep.subr.bf16.mxu1 %v5586_v59 }
  0xd3   : > { %2550 = vmatpush1.bf16.msra.mxu0 %v5593_v60  ;;  %2591 = vmatpush1.bf16.msra.mxu1 %v5598_v61 }
  0xd4   : > { %2551 = vmatprep.subr.bf16.mxu0 %v5605_v62  ;;  %2592 = vmatprep.subr.bf16.mxu1 %v5610_v63 }
  0xd7   : > { %2552 = vmatpush1.bf16.msra.mxu0 %v5617_v0  ;;  %2593 = vmatpush1.bf16.msra.mxu1 %v5622_v1 }
  0xd8   : > { %2553 = vmatprep.subr.bf16.mxu0 %v5629_v2  ;;  %2594 = vmatprep.subr.bf16.mxu1 %v5634_v4 }
  0xdb   : > { %2554 = vmatpush1.bf16.msra.mxu0 %v5641_v5  ;;  %2595 = vmatpush1.bf16.msra.mxu1 %v5646_v6 }
  0xdc   : > { %2555 = vmatprep.subr.bf16.mxu0 %v5653_v7  ;;  %2596 = vmatprep.subr.bf16.mxu1 %v5658_v8  ;;  %v2119_v8 = vld [vmem:[#allocation4] sm:$0xff] }
  0xdd   : > { %v2382_v7 = vpack.c.bf16 %v2119_v8, %v2119_v8 }
  0xdf   : > { %2556 = vmatpush1.bf16.msra.mxu0 %v5665_v9  ;;  %2597 = vmatpush1.bf16.msra.mxu1 %v5670_v12 }
  0xe0   : > { %2557 = vmatprep.subr.bf16.mxu0 %v5677_v21  ;;  %2598 = vmatprep.subr.bf16.mxu1 %v5682_v44  ;;  %v6547_v44 = vmov 0  }
  0xe3   : > { %2558 = vmatpush1.bf16.msra.mxu0 %v5689_v47  ;;  %2599 = vmatpush1.bf16.msra.mxu1 %v5694_v3 }
  0xe4   : > { %2688 = vmatprep.subr.bf16.mxu0 %v5311_v10  ;;  %2729 = vmatprep.subr.bf16.mxu1 %v5316_v11 }
  0xe6   : > { %2576 = vmatmul.mubr.bf16.vlgmr.msra.gmra.mxu0 %v2382_v7  ;;  %2617 = vmatmul.mubr.bf16.vlgmr.msra.gmra.mxu1 %v2382_v7  ;;  %v974_v7 = vlaneseq }
  0xe7   : > { %2689 = vmatpush1.bf16.msra.mxu0 %v5322_v13  ;;  %2730 = vmatpush1.bf16.msra.mxu1 %v5327_v14 }
  0xe8   : > { %2690 = vmatprep.subr.bf16.mxu0 %v5332_v15  ;;  %2731 = vmatprep.subr.bf16.mxu1 %v5339_v16  ;;  %v975_v8 = vshrl.u32 %v974_v7, 7 }
  0xe9   : > { %2720 = vmatprep.mubr.bf16.mxu0 %v6547_v44  ;;  %2761 = vmatprep.mubr.bf16.mxu1 %v6547_v44 }
  0xea   : > { %v980_v7 = vsub.s32 1, %v975_v8 }
  0xeb   : > { %2691 = vmatpush1.bf16.msra.mxu0 %v5344_v17  ;;  %2732 = vmatpush1.bf16.msra.mxu1 %v5351_v18 }
  0xec   : > { %2692 = vmatprep.subr.bf16.mxu0 %v5358_v19  ;;  %2733 = vmatprep.subr.bf16.mxu1 %v5363_v20 }
  0xef   : > { %2693 = vmatpush1.bf16.msra.mxu0 %v5373_v22  ;;  %2734 = vmatpush1.bf16.msra.mxu1 %v5378_v23 }
  0xf0   : > { %2694 = vmatprep.subr.bf16.mxu0 %v5385_v24  ;;  %2735 = vmatprep.subr.bf16.mxu1 %v5390_v25 }
  0xf3   : > { %2695 = vmatpush1.bf16.msra.mxu0 %v5397_v26  ;;  %2736 = vmatpush1.bf16.msra.mxu1 %v5402_v27 }
  0xf4   : > { %2696 = vmatprep.subr.bf16.mxu0 %v5409_v28  ;;  %2737 = vmatprep.subr.bf16.mxu1 %v5414_v29 }
  0xf7   : > { %2697 = vmatpush1.bf16.msra.mxu0 %v5423_v30  ;;  %2738 = vmatpush1.bf16.msra.mxu1 %v5428_v31 }
  0xf8   : > { %2698 = vmatprep.subr.bf16.mxu0 %v5435_v32  ;;  %2739 = vmatprep.subr.bf16.mxu1 %v5440_v33  ;;  %v984_v32 = vsub.s32 2, %v975_v8 }
  0xfb   : > { %2699 = vmatpush1.bf16.msra.mxu0 %v5447_v34  ;;  %2740 = vmatpush1.bf16.msra.mxu1 %v5452_v35 }
  0xfc   : > { %2700 = vmatprep.subr.bf16.mxu0 %v5459_v36  ;;  %2741 = vmatprep.subr.bf16.mxu1 %v5464_v37  ;;  %v976_v37 = vsub.s32 0, %v975_v8  ;;  %v988_v36 = vsub.s32 3, %v975_v8 }
  0xff   : > { %2701 = vmatpush1.bf16.msra.mxu0 %v5471_v38  ;;  %2742 = vmatpush1.bf16.msra.mxu1 %v5476_v39  ;;  %v657_v39 = vld [vmem:[%s6376_s10] sm:$0xf] }
 0x100   : > { %2702 = vmatprep.subr.bf16.mxu0 %v5483_v40  ;;  %2743 = vmatprep.subr.bf16.mxu1 %v5488_v41  ;;  %v5743_v41 = vrot.slane %v657_v39, %v984_v32  ;;  %v5753_v33 = vrot.slane %v657_v39, %v980_v7 }
 0x103   : > { %2703 = vmatpush1.bf16.msra.mxu0 %v5495_v42  ;;  %2744 = vmatpush1.bf16.msra.mxu1 %v5500_v43 }
 0x104   : > { %2782 = vmatprep.subr.bf16.mxu0 %v5507_v45  ;;  %2823 = vmatprep.subr.bf16.mxu1 %v5512_v46  ;;  %v5749_v45 = vrot.slane %v657_v39, %v976_v37  ;;  %v5751_v46 = vrot.slane %v657_v39, %v988_v36 }
 0x106   : > { %v5739_v38 = vpop.f32.mrf.mxu0  ;;  %v5741_v40 = vpop.f32.mrf.mxu1 }
 0x108   : > { %v5745_v42 = vpop.f32.mrf.mxu0  ;;  %v5747_v43 = vpop.f32.mrf.mxu1 }
 0x10a   : > { %v905_v35 = vpop.f32.mrf.mxu0  ;;  %v958_v34 = vpop.f32.mrf.mxu1 }
 0x10b   : > { %v998_v31 = vadd.f32 %v5749_v45, %v905_v35  ;;  %v1000_v30 = vadd.f32 %v5743_v41, %v958_v34 }
 0x10c   : > { %v907_v29 = vpop.f32.mrf.mxu0  ;;  %v960_v8 = vpop.f32.mrf.mxu1 }
 0x10d   : > { %v999_v28 = vadd.f32 %v5753_v33, %v907_v29  ;;  %v1001_v27 = vadd.f32 %v5751_v46, %v960_v8 }
 0x10e   : > { %v911_v26 = vpop.f32.mrf.mxu0  ;;  %v964_v25 = vpop.f32.mrf.mxu1 }
 0x10f   : > { %v1002_v24 = vadd.f32 %v5749_v45, %v911_v26  ;;  %v1004_v23 = vadd.f32 %v5743_v41, %v964_v25  ;;  %v658_v25 = vld [vmem:[%s6548_s20] sm:$0xf] }
 0x110   : > { %v913_v22 = vpop.f32.mrf.mxu0  ;;  %v966_v20 = vpop.f32.mrf.mxu1  ;;  %v5770_v15 = vrot.slane %v658_v25, %v976_v37  ;;  %v5776_v14 = vrot.slane %v658_v25, %v988_v36 }
 0x111   : > { %v1003_v39 = vadd.f32 %v5753_v33, %v913_v22  ;;  %v1005_v35 = vadd.f32 %v5751_v46, %v966_v20  ;;  %v5772_v22 = vrot.slane %v658_v25, %v984_v32  ;;  %v5774_v20 = vrot.slane %v658_v25, %v980_v7 }
 0x112   : > { %v915_v19 = vpop.f32.mrf.mxu0  ;;  %v968_v34 = vpop.f32.mrf.mxu1 }
 0x113   : > { %v1006_v18 = vadd.f32 %v5749_v45, %v915_v19  ;;  %v1008_v29 = vadd.f32 %v5743_v41, %v968_v34 }
 0x114   : > { %v917_v17 = vpop.f32.mrf.mxu0  ;;  %v970_v8 = vpop.f32.mrf.mxu1 }
 0x115   : > { %v1007_v16 = vadd.f32 %v5753_v33, %v917_v17  ;;  %v1009_v26 = vadd.f32 %v5751_v46, %v970_v8 }
 0x126   : > { %v1252_v19 = vpop.f32.mrf.mxu0  ;;  %v1305_v34 = vpop.f32.mrf.mxu1 }
 0x127   : > { %v1345_v13 = vadd.f32 %v5770_v15, %v1252_v19  ;;  %v1347_v17 = vadd.f32 %v5772_v22, %v1305_v34 }
 0x128   : > { %v1254_v11 = vpop.f32.mrf.mxu0  ;;  %v1307_v8 = vpop.f32.mrf.mxu1 }
 0x129   : > { %v1346_v10 = vadd.f32 %v5774_v20, %v1254_v11  ;;  %v1348_v3 = vadd.f32 %v5776_v14, %v1307_v8 }
 0x12a   : > { %v1256_v37 = vpop.f32.mrf.mxu0  ;;  %v1309_v47 = vpop.f32.mrf.mxu1 }
 0x12b   : > { %v1349_v32 = vadd.f32 %v5770_v15, %v1256_v37  ;;  %v1351_v7 = vadd.f32 %v5772_v22, %v1309_v47 }
 0x12c   : > { %v1258_v36 = vpop.f32.mrf.mxu0  ;;  %v1311_v25 = vpop.f32.mrf.mxu1 }
 0x12d   : > { %v1350_v21 = vadd.f32 %v5774_v20, %v1258_v36  ;;  %v1352_v19 = vadd.f32 %v5776_v14, %v1311_v25 }
 0x12e   : > { %v1262_v12 = vpop.f32.mrf.mxu0  ;;  %v1315_v34 = vpop.f32.mrf.mxu1 }
 0x12f   : > { %v1353_v9 = vadd.f32 %v5770_v15, %v1262_v12  ;;  %v1355_v11 = vadd.f32 %v5772_v22, %v1315_v34 }
 0x130   : > { %v1264_v6 = vpop.f32.mrf.mxu0  ;;  %v1317_v8 = vpop.f32.mrf.mxu1 }
 0x131   : > { %v1354_v5 = vadd.f32 %v5774_v20, %v1264_v6  ;;  %v1356_v37 = vadd.f32 %v5776_v14, %v1317_v8 }
 0x132   : > { %v5790_v4 = vpop.f32.mrf.mxu1  ;;  %v5792_v47 = vpop.f32.mrf.mxu0 }
 0x134   : > { %v5794_v2 = vpop.f32.mrf.mxu1  ;;  %v5796_v36 = vpop.f32.mrf.mxu0 }
 0x146   : > { %v1603_v25 = vpop.f32.mrf.mxu0  ;;  %v5798_v1 = vpop.f32.mrf.mxu1 }
 0x148   : > { %v1605_v12 = vpop.f32.mrf.mxu0  ;;  %v5800_v0 = vpop.f32.mrf.mxu1 }
 0x14a   : > { %v1607_v34 = vpop.f32.mrf.mxu0  ;;  %v1660_v63 = vpop.f32.mrf.mxu1 }
 0x14b   : > { %v5802_v62 = vadd.f32 %v1607_v34, %v998_v31  ;;  %v5804_v6 = vadd.f32 %v1660_v63, %v1000_v30 }
 0x14c   : > { %v1609_v8 = vpop.f32.mrf.mxu0  ;;  %v1662_v61 = vpop.f32.mrf.mxu1 }
 0x14d   : > { %v5806_v60 = vadd.f32 %v1609_v8, %v999_v28  ;;  %v5808_v59 = vadd.f32 %v1662_v61, %v1001_v27 }
 0x14e   : > { %v1613_v58 = vpop.f32.mrf.mxu0  ;;  %v1666_v57 = vpop.f32.mrf.mxu1 }
 0x14f   : > { %v5810_v56 = vadd.f32 %v1613_v58, %v1002_v24  ;;  %v5812_v55 = vadd.f32 %v1666_v57, %v1004_v23 }
 0x150   : > { %v1615_v54 = vpop.f32.mrf.mxu0  ;;  %v1668_v53 = vpop.f32.mrf.mxu1 }
 0x151   : > { %v5814_v52 = vadd.f32 %v1615_v54, %v1003_v39  ;;  %v5816_v31 = vadd.f32 %v1668_v53, %v1005_v35 }
 0x152   : > { %v1617_v30 = vpop.f32.mrf.mxu0  ;;  %v1670_v63 = vpop.f32.mrf.mxu1 }
 0x153   : > { %v5818_v34 = vadd.f32 %v1617_v30, %v1006_v18  ;;  %v5820_v28 = vadd.f32 %v1670_v63, %v1008_v29 }
 0x154   : > { %v1619_v27 = vpop.f32.mrf.mxu0  ;;  %v1672_v61 = vpop.f32.mrf.mxu1 }
 0x155   : > { %6549 = vst [vmem:[#allocation71_spill] sm:$0xff] %v5818_v34  ;;  %6550 = vst [vmem:[#allocation72_spill] sm:$0xff] %v5820_v28  ;;  %v5822_v8 = vadd.f32 %v1619_v27, %v1007_v16  ;;  %v5824_v24 = vadd.f32 %v1672_v61, %v1009_v26 }
 0x157   : > { %6551 = vst [vmem:[#allocation73_spill] sm:$0xff] %v5822_v8  ;;  %6552 = vst [vmem:[#allocation74_spill] sm:$0xff] %v5824_v24 }
 0x166   : > { %v1933_v23 = vpop.f32.mrf.mxu0  ;;  %v1986_v57 = vpop.f32.mrf.mxu1 }
 0x167   : > { %v5826_v58 = vadd.f32 %v1933_v23, %v1345_v13  ;;  %v5828_v54 = vadd.f32 %v1986_v57, %v1347_v17 }
 0x168   : > { %v1935_v53 = vpop.f32.mrf.mxu0  ;;  %v1988_v39 = vpop.f32.mrf.mxu1 }
 0x169   : > { %6553 = vst [vmem:[#allocation75_spill] sm:$0xff] %v5826_v58  ;;  %6554 = vst [vmem:[#allocation76_spill] sm:$0xff] %v5828_v54  ;;  %v5830_v35 = vadd.f32 %v1935_v53, %v1346_v10  ;;  %v5832_v18 = vadd.f32 %v1988_v39, %v1348_v3  ;;  %v997_v58 = vadd.f32 %v5751_v46, %v5747_v43 }
 0x16a   : > { %v1937_v29 = vpop.f32.mrf.mxu0  ;;  %v1990_v30 = vpop.f32.mrf.mxu1  ;;  %v1357_v43 = vadd.f32 %v5770_v15, %v5792_v47  ;;  %v1358_v46 = vadd.f32 %v5774_v20, %v5796_v36 }
 0x16b   : > { %6555 = vst [vmem:[#allocation77_spill] sm:$0xff] %v5830_v35  ;;  %6556 = vst [vmem:[#allocation78_spill] sm:$0xff] %v5832_v18  ;;  %v5834_v63 = vadd.f32 %v1937_v29, %v1349_v32  ;;  %v5836_v16 = vadd.f32 %v1990_v30, %v1351_v7 }
 0x16c   : > { %v1939_v26 = vpop.f32.mrf.mxu0  ;;  %v1992_v27 = vpop.f32.mrf.mxu1 }
 0x16d   : > { %6557 = vst [vmem:[#allocation79_spill] sm:$0xff] %v5836_v16  ;;  %v5838_v61 = vadd.f32 %v1939_v26, %v1350_v21  ;;  %v5840_v13 = vadd.f32 %v1992_v27, %v1352_v19  ;;  %v994_v21 = vadd.f32 %v5749_v45, %v5739_v38 }
 0x16e   : > { %v1943_v17 = vpop.f32.mrf.mxu0  ;;  %v1996_v23 = vpop.f32.mrf.mxu1 }
 0x16f   : > { %6558 = vst [vmem:[#allocation80_spill] sm:$0xff] %v5840_v13  ;;  %v5842_v57 = vadd.f32 %v1943_v17, %v1353_v9  ;;  %v5844_v10 = vadd.f32 %v1996_v23, %v1355_v11  ;;  %v995_v9 = vadd.f32 %v5753_v33, %v5745_v42  ;;  %v1675_v11 = vadd.f32 %v1603_v25, %v994_v21 }
 0x170   : > { %v1945_v3 = vpop.f32.mrf.mxu0  ;;  %v1998_v53 = vpop.f32.mrf.mxu1  ;;  %v1678_v33 = vadd.f32 %v5800_v0, %v997_v58  ;;  %v996_v25 = vadd.f32 %v5743_v41, %v5741_v40 }
 0x171   : > { %v5846_v39 = vadd.f32 %v1945_v3, %v1354_v5  ;;  %v5848_v32 = vadd.f32 %v1998_v53, %v1356_v37  ;;  %v1676_v17 = vadd.f32 %v1605_v12, %v995_v9 }
 0x172   : > { %v1947_v7 = vpop.f32.mrf.mxu0  ;;  %v5850_v29 = vpop.f32.mrf.mxu1  ;;  %v1677_v12 = vadd.f32 %v5798_v1, %v996_v25 }
 0x173   : > { %v2017_v0 = vadd.f32 %v1947_v7, %v1357_v43 }
 0x174   : > { %v1949_v19 = vpop.f32.mrf.mxu0  ;;  %v5854_v30 = vpop.f32.mrf.mxu1 }
 0x175   : > { %v2018_v58 = vadd.f32 %v1949_v19, %v1358_v46  ;;  %v1360_v19 = vadd.f32 %v5776_v14, %v5794_v2 }
 0x186   : > { %v2323_v26 = vpop.f32.mrf.mxu0  ;;  %v2364_v27 = vpop.f32.mrf.mxu1 }
 0x187   : > { %v2371_v5 = vadd.f32 %v2323_v26, %v1675_v11 }
 0x188   : > { %v2325_v23 = vpop.f32.mrf.mxu0  ;;  %v2366_v37 = vpop.f32.mrf.mxu1 }
 0x189   : > { %v4082_v3 = vmul.f32 -1.442695, %v2371_v5  ;;  %v2372_v53 = vadd.f32 %v2325_v23, %v1676_v17  ;;  %v2374_v42 = vadd.f32 %v2366_v37, %v1678_v33  ;;  %v2118_v17 = vld [vmem:[#allocation3] sm:$0xff] }
 0x18a   : > { %v2327_v54 = vpop.f32.mrf.mxu0  ;;  %v2368_v18 = vpop.f32.mrf.mxu1 }
 0x18b   : > { %4551 = vpow2.f32 %v4082_v3  ;;  %v4083_v35 = vmul.f32 -1.442695, %v2372_v53  ;;  %v4084_v21 = vmul.f32 -1.442695, %v2374_v42  ;;  %v2373_v54 = vadd.f32 %v2364_v27, %v1677_v12 }
 0x18c   : > { %v2328_v38 = vpop.f32.mrf.mxu0  ;;  %v2369_v45 = vpop.f32.mrf.mxu1  ;;  %v2020_v12 = vadd.f32 %v5854_v30, %v1360_v19  ;;  %v6573_v19 = vld [vmem:[#allocation59_spill] sm:$0xff] }
 0x18d   : > { %4553 = vpow2.f32 %v4083_v35 }
 0x18e   : > { %4555 = vpow2.f32 %v4084_v21  ;;  %v1359_v21 = vadd.f32 %v5772_v22, %v5790_v4  ;;  %v6559_v22 = vld [vmem:[#allocation45_spill] sm:$0xff] }
 0x198   : > { %v4552_v9 = vpop.eup %4551 }
 0x199   : > { %v2632_v18 = vadd.f32 1.0, %v4552_v9 }
 0x19a   : > { %v4554_v11 = vpop.eup %4553 }
 0x19b   : > { %4557 = vrcp.f32 %v2632_v18  ;;  %v2638_v26 = vadd.f32 1.0, %v4554_v11  ;;  %v4556_v1 = vpop.eup %4555 }
 0x19c   : > { %4559 = vtanh.f32 %v2373_v54  ;;  %v2645_v45 = vadd.f32 1.0, %v4556_v1  ;;  %v2019_v54 = vadd.f32 %v5850_v29, %v1359_v21  ;;  %v6560_v29 = vld [vmem:[#allocation46_spill] sm:$0xff]  ;;  %v6561_v1 = vld [vmem:[#allocation47_spill] sm:$0xff]  ;;  %v6575_v21 = vld [vmem:[#allocation61_spill] sm:$0xff] }
 0x19d   : > { %4561 = vrcp.f32 %v2638_v26 }
 0x1a6   : > { %v2577_v40 = vpop.f32.mrf.mxu0  ;;  %v2618_v41 = vpop.f32.mrf.mxu1 }
 0x1a7   : > { %v2625_v35 = vadd.f32 %v2577_v40, %v2017_v0  ;;  %v2627_v18 = vadd.f32 %v2618_v41, %v2019_v54  ;;  %v6577_v54 = vld [vmem:[#allocation63_spill] sm:$0xff] }
 0x1a8   : > { %v4558_v27 = vpop.eup %4557  ;;  %v2579_v5 = vpop.f32.mrf.mxu0 }
 0x1a9   : > { %v2620_v23 = vpop.f32.mrf.mxu1  ;;  %v4560_v37 = vpop.eup %4559  ;;  %v4085_v3 = vmul.f32 -1.442695, %v2625_v35  ;;  %v2626_v53 = vadd.f32 %v2579_v5, %v2018_v58  ;;  %v6562_v58 = vld [vmem:[#allocation48_spill] sm:$0xff] }
 0x1aa   : > { %v4562_v38 = vpop.eup %4561  ;;  %v2581_v33 = vpop.f32.mrf.mxu0  ;;  %v2649_v47 = vmul.f32 %v4560_v37, %v4558_v27  ;;  %v2628_v9 = vadd.f32 %v2620_v23, %v2020_v12  ;;  %v2120_v27 = vld [vmem:[#allocation5] sm:$0xff]  ;;  %v6563_v37 = vld [vmem:[#allocation49_spill] sm:$0xff]  ;;  %v6574_v12 = vld [vmem:[#allocation60_spill] sm:$0xff] }
 0x1ab   : > { %v2622_v15 = vpop.f32.mrf.mxu1  ;;  %v2648_v42 = vmul.f32 %v4562_v38, %v2118_v17  ;;  %4563 = vpow2.f32 %v4085_v3  ;;  %v4086_v20 = vmul.f32 -1.442695, %v2626_v53  ;;  %v6564_v3 = vld [vmem:[#allocation50_spill] sm:$0xff]  ;;  %v6565_v38 = vld [vmem:[#allocation51_spill] sm:$0xff] }
 0x1ac   : > { %v2582_v36 = vpop.f32.mrf.mxu0  ;;  %v4087_v11 = vmul.f32 -1.442695, %v2628_v9  ;;  %v6567_v15 = vld [vmem:[#allocation53_spill] sm:$0xff]  ;;  %v6576_v9 = vld [vmem:[#allocation62_spill] sm:$0xff] }
 0x1ad   : > { %v2623_v7 = vpop.f32.mrf.mxu1  ;;  %v5868_v25 = vadd.f32 %v2649_v47, %v2648_v42  ;;  %4565 = vpow2.f32 %v4086_v20  ;;  %v6568_v47 = vld [vmem:[#allocation54_spill] sm:$0xff]  ;;  %v6569_v42 = vld [vmem:[#allocation55_spill] sm:$0xff]  ;;  %v6570_v20 = vld [vmem:[#allocation56_spill] sm:$0xff] }
 0x1ae   : > { %4567 = vrcp.f32 %v2645_v45  ;;  %v6566_v45 = vld [vmem:[#allocation52_spill] sm:$0xff]  ;;  %v6571_v36 = vld [vmem:[#allocation57_spill] sm:$0xff]  ;;  %v6572_v7 = vld [vmem:[#allocation58_spill] sm:$0xff] }
 0x1af   : > { %4569 = vtanh.f32 %v5868_v25 }
 0x1b0   : > { %4571 = vtanh.f32 %v2627_v18  ;;  %v6578_v18 = vld [vmem:[#allocation64_spill] sm:$0xff] }
 0x1b1   : > { %4573 = vpow2.f32 %v4087_v11  ;;  %v6579_v11 = vld [vmem:[#allocation65_spill] sm:$0xff] }
 0x1b8   : > { %v4564_v26 = vpop.eup %4563 }
 0x1b9   : > { %v2656_v43 = vadd.f32 1.0, %v4564_v26  ;;  %v6580_v26 = vld [vmem:[#allocation66_spill] sm:$0xff] }
 0x1ba   : > { %v4566_v46 = vpop.eup %4565 }
 0x1bb   : > { %v4568_v14 = vpop.eup %4567  ;;  %4575 = vrcp.f32 %v2656_v43  ;;  %v2662_v2 = vadd.f32 1.0, %v4566_v46  ;;  %v6581_v46 = vld [vmem:[#allocation67_spill] sm:$0xff] }
 0x1bc   : > { %v4570_v0 = vpop.eup %4569 }
 0x1bd   : > { %4577 = vrcp.f32 %v2662_v2  ;;  %v2652_v30 = vmul.f32 %v4570_v0, %v4568_v14  ;;  %v4572_v4 = vpop.eup %4571  ;;  %v6582_v14 = vld [vmem:[#allocation68_spill] sm:$0xff] }
 0x1be   : > { %v4574_v41 = vpop.eup %4573 }
 0x1bf   : > { %v2687_v40 = vpack.c.bf16 %v2652_v30, %v2652_v30  ;;  %3403 = vst [vmem:[%s4886_s27] sm:$0xff] %v2652_v30  ;;  %v2669_v23 = vadd.f32 1.0, %v4574_v41  ;;  %v6584_v30 = vld [vmem:[#allocation69_spill] sm:$0xff]  ;;  %v6586_v41 = vld [vmem:[#allocation11_spill] sm:$0xff] }
 0x1c1   : > { %2721 = vmatmul.mubr.bf16.vlgmr.msra.gmra.mxu0 %v2687_v40  ;;  %2762 = vmatmul.mubr.bf16.vlgmr.msra.gmra.mxu1 %v2687_v40  ;;  %4579 = vrcp.f32 %v2669_v23  ;;  %v6585_v40 = vld [vmem:[#allocation70_spill] sm:$0xff]  ;;  %v6591_v23 = vld [vmem:[#allocation16_spill] sm:$0xff] }
 0x1c2   : > { %2783 = vmatpush1.bf16.msra.mxu0 %v5519_v48  ;;  %2824 = vmatpush1.bf16.msra.mxu1 %v5524_v49 }
 0x1c3   : > { %2784 = vmatprep.subr.bf16.mxu0 %v5531_v50  ;;  %2825 = vmatprep.subr.bf16.mxu1 %v5536_v51 }
 0x1c4   : > { %2814 = vmatprep.mubr.bf16.mxu0 %v6547_v44  ;;  %2855 = vmatprep.mubr.bf16.mxu1 %v6547_v44 }
 0x1c6   : > { %2785 = vmatpush1.bf16.msra.mxu0 %v6559_v22  ;;  %2826 = vmatpush1.bf16.msra.mxu1 %v6560_v29 }
 0x1c7   : > { %2786 = vmatprep.subr.bf16.mxu0 %v6561_v1  ;;  %2827 = vmatprep.subr.bf16.mxu1 %v6562_v58 }
 0x1c8   : > { %v4576_v35 = vpop.eup %4575 }
 0x1c9   : > { %v2673_v17 = vmul.f32 %v4576_v35, %v4572_v4  ;;  %v6587_v35 = vld [vmem:[#allocation12_spill] sm:$0xff] }
 0x1ca   : > { %v4578_v5 = vpop.eup %4577  ;;  %2787 = vmatpush1.bf16.msra.mxu0 %v6563_v37  ;;  %2828 = vmatpush1.bf16.msra.mxu1 %v6564_v3 }
 0x1cb   : > { %v2672_v53 = vmul.f32 %v4578_v5, %v2120_v27  ;;  %2788 = vmatprep.subr.bf16.mxu0 %v6565_v38  ;;  %2829 = vmatprep.subr.bf16.mxu1 %v6566_v45  ;;  %v6588_v27 = vld [vmem:[#allocation13_spill] sm:$0xff]  ;;  %v6590_v5 = vld [vmem:[#allocation15_spill] sm:$0xff] }
 0x1cd   : > { %v5892_v33 = vadd.f32 %v2673_v17, %v2672_v53  ;;  %v6589_v17 = vld [vmem:[#allocation14_spill] sm:$0xff]  ;;  %v6592_v53 = vld [vmem:[#allocation17_spill] sm:$0xff] }
 0x1ce   : > { %2789 = vmatpush1.bf16.msra.mxu0 %v6567_v15  ;;  %2830 = vmatpush1.bf16.msra.mxu1 %v6568_v47  ;;  %v4580_v43 = vpop.eup %4579 }
 0x1cf   : > { %2790 = vmatprep.subr.bf16.mxu0 %v6569_v42  ;;  %2831 = vmatprep.subr.bf16.mxu1 %v6570_v20  ;;  %4581 = vtanh.f32 %v5892_v33 }
 0x1d2   : > { %2791 = vmatpush1.bf16.msra.mxu0 %v6571_v36  ;;  %2832 = vmatpush1.bf16.msra.mxu1 %v6572_v7 }
 0x1d3   : > { %2792 = vmatprep.subr.bf16.mxu0 %v6573_v19  ;;  %2833 = vmatprep.subr.bf16.mxu1 %v6574_v12 }
 0x1d6   : > { %2793 = vmatpush1.bf16.msra.mxu0 %v6575_v21  ;;  %2834 = vmatpush1.bf16.msra.mxu1 %v6576_v9 }
 0x1d7   : > { %2794 = vmatprep.subr.bf16.mxu0 %v6577_v54  ;;  %2835 = vmatprep.subr.bf16.mxu1 %v6578_v18 }
 0x1da   : > { %2795 = vmatpush1.bf16.msra.mxu0 %v6579_v11  ;;  %2836 = vmatpush1.bf16.msra.mxu1 %v6580_v26 }
 0x1db   : > { %2796 = vmatprep.subr.bf16.mxu0 %v6581_v46  ;;  %2837 = vmatprep.subr.bf16.mxu1 %v6582_v14 }
 0x1dc   : > { %v4582_v2 = vpop.eup %4581 }
 0x1dd   : > { %v5911_v0 = vmul.f32 %v4582_v2, %v4580_v43  ;;  %v6593_v43 = vld [vmem:[#allocation18_spill] sm:$0xff]  ;;  %v6594_v2 = vld [vmem:[#allocation19_spill] sm:$0xff] }
 0x1de   : > { %2797 = vmatpush1.bf16.msra.mxu0 %v6584_v30  ;;  %2838 = vmatpush1.bf16.msra.mxu1 %v6585_v40 }
 0x1df   : > { %6583 = vst [vmem:[#allocation45_spill] sm:$0xff] %v5911_v0  ;;  %v2781_v4 = vpack.c.bf16 %v5911_v0, %v5911_v0  ;;  %2927 = vmatprep.subr.bf16.mxu0 %v6586_v41  ;;  %2968 = vmatprep.subr.bf16.mxu1 %v6587_v35  ;;  %v6595_v41 = vld [vmem:[#allocation20_spill] sm:$0xff]  ;;  %v6597_v35 = vld [vmem:[#allocation22_spill] sm:$0xff]  ;;  %v6602_v0 = vld [vmem:[#allocation27_spill] sm:$0xff] }
 0x1e1   : > { %2815 = vmatmul.mubr.bf16.vlgmr.msra.gmra.mxu0 %v2781_v4  ;;  %2856 = vmatmul.mubr.bf16.vlgmr.msra.gmra.mxu1 %v2781_v4  ;;  %v6596_v4 = vld [vmem:[#allocation21_spill] sm:$0xff] }
 0x1e2   : > { %2928 = vmatpush1.bf16.msra.mxu0 %v6588_v27  ;;  %2969 = vmatpush1.bf16.msra.mxu1 %v6589_v17  ;;  %v6598_v27 = vld [vmem:[#allocation23_spill] sm:$0xff]  ;;  %v6599_v17 = vld [vmem:[#allocation24_spill] sm:$0xff] }
 0x1e3   : > { %2929 = vmatprep.subr.bf16.mxu0 %v6590_v5  ;;  %2970 = vmatprep.subr.bf16.mxu1 %v6591_v23  ;;  %v6600_v5 = vld [vmem:[#allocation25_spill] sm:$0xff]  ;;  %v6601_v23 = vld [vmem:[#allocation26_spill] sm:$0xff] }
 0x1e4   : > { %2959 = vmatprep.mubr.bf16.mxu0 %v6547_v44  ;;  %3000 = vmatprep.mubr.bf16.mxu1 %v6547_v44 }
 0x1e6   : > { %2930 = vmatpush1.bf16.msra.mxu0 %v6592_v53  ;;  %2971 = vmatpush1.bf16.msra.mxu1 %v6593_v43  ;;  %v6603_v53 = vld [vmem:[#allocation28_spill] sm:$0xff]  ;;  %v6604_v43 = vld [vmem:[#allocation29_spill] sm:$0xff] }
 0x1e7   : > { %2931 = vmatprep.subr.bf16.mxu0 %v6594_v2  ;;  %2972 = vmatprep.subr.bf16.mxu1 %v6595_v41  ;;  %v6605_v2 = vld [vmem:[#allocation30_spill] sm:$0xff]  ;;  %v6606_v41 = vld [vmem:[#allocation31_spill] sm:$0xff] }
 0x1ea   : > { %2932 = vmatpush1.bf16.msra.mxu0 %v6596_v4  ;;  %2973 = vmatpush1.bf16.msra.mxu1 %v6597_v35  ;;  %v6607_v4 = vld [vmem:[#allocation32_spill] sm:$0xff]  ;;  %v6608_v35 = vld [vmem:[#allocation33_spill] sm:$0xff] }
 0x1eb   : > { %2933 = vmatprep.subr.bf16.mxu0 %v6598_v27  ;;  %2974 = vmatprep.subr.bf16.mxu1 %v6599_v17  ;;  %v6609_v27 = vld [vmem:[#allocation34_spill] sm:$0xff]  ;;  %v6610_v17 = vld [vmem:[#allocation35_spill] sm:$0xff] }
 0x1ee   : > { %2934 = vmatpush1.bf16.msra.mxu0 %v6600_v5  ;;  %2975 = vmatpush1.bf16.msra.mxu1 %v6601_v23  ;;  %v6611_v5 = vld [vmem:[#allocation36_spill] sm:$0xff]  ;;  %v6612_v23 = vld [vmem:[#allocation37_spill] sm:$0xff] }
 0x1ef   : > { %2935 = vmatprep.subr.bf16.mxu0 %v6602_v0  ;;  %2976 = vmatprep.subr.bf16.mxu1 %v6603_v53  ;;  %v6613_v0 = vld [vmem:[#allocation38_spill] sm:$0xff]  ;;  %v6614_v53 = vld [vmem:[#allocation39_spill] sm:$0xff] }
 0x1f2   : > { %2936 = vmatpush1.bf16.msra.mxu0 %v6604_v43  ;;  %2977 = vmatpush1.bf16.msra.mxu1 %v6605_v2  ;;  %v6615_v43 = vld [vmem:[#allocation40_spill] sm:$0xff]  ;;  %v6616_v2 = vld [vmem:[#allocation41_spill] sm:$0xff] }
 0x1f3   : > { %2937 = vmatprep.subr.bf16.mxu0 %v6606_v41  ;;  %2978 = vmatprep.subr.bf16.mxu1 %v6607_v4  ;;  %v6617_v41 = vld [vmem:[#allocation42_spill] sm:$0xff]  ;;  %v6618_v4 = vld [vmem:[#allocation43_spill] sm:$0xff] }
 0x1f6   : > { %2938 = vmatpush1.bf16.msra.mxu0 %v6608_v35  ;;  %2979 = vmatpush1.bf16.msra.mxu1 %v6609_v27  ;;  %v6619_v35 = vld [vmem:[#allocation44_spill] sm:$0xff] }
 0x1f7   : > { %2939 = vmatprep.subr.bf16.mxu0 %v6610_v17  ;;  %2980 = vmatprep.subr.bf16.mxu1 %v6611_v5 }
 0x1fa   : > { %2940 = vmatpush1.bf16.msra.mxu0 %v6612_v23  ;;  %2981 = vmatpush1.bf16.msra.mxu1 %v6613_v0 }
 0x1fb   : > { %2941 = vmatprep.subr.bf16.mxu0 %v6614_v53  ;;  %2982 = vmatprep.subr.bf16.mxu1 %v6615_v43 }
 0x1fe   : > { %2942 = vmatpush1.bf16.msra.mxu0 %v6616_v2  ;;  %2983 = vmatpush1.bf16.msra.mxu1 %v6617_v41 }
 0x1ff   : > { %3020 = vmatprep.subr.bf16.mxu0 %v6618_v4  ;;  %3061 = vmatprep.subr.bf16.mxu1 %v6619_v35 }
 0x281   : > { %v2722_v27 = vpop.f32.mrf.mxu0  ;;  %v2763_v17 = vpop.f32.mrf.mxu1 }
 0x282   : > { %v2770_v5 = vadd.f32 %v2722_v27, %v5802_v62  ;;  %v2772_v4 = vadd.f32 %v2763_v17, %v5804_v6 }
 0x283   : > { %v2724_v28 = vpop.f32.mrf.mxu0  ;;  %v2765_v23 = vpop.f32.mrf.mxu1 }
 0x284   : > { %v4088_v24 = vmul.f32 -1.442695, %v2770_v5  ;;  %v2771_v0 = vadd.f32 %v2724_v28, %v5806_v60  ;;  %v2773_v41 = vadd.f32 %v2765_v23, %v5808_v59 }
 0x285   : > { %v2726_v53 = vpop.f32.mrf.mxu0  ;;  %v2767_v8 = vpop.f32.mrf.mxu1 }
 0x286   : > { %4583 = vpow2.f32 %v4088_v24  ;;  %v4089_v43 = vmul.f32 -1.442695, %v2771_v0  ;;  %v4090_v35 = vmul.f32 -1.442695, %v2773_v41 }
 0x287   : > { %v2727_v2 = vpop.f32.mrf.mxu0  ;;  %v2768_v34 = vpop.f32.mrf.mxu1 }
 0x288   : > { %4585 = vpow2.f32 %v4089_v43 }
 0x289   : > { %4587 = vtanh.f32 %v2772_v4 }
 0x28a   : > { %4589 = vpow2.f32 %v4090_v35 }
 0x293   : > { %v4584_v16 = vpop.eup %4583 }
 0x294   : > { %v2871_v13 = vadd.f32 1.0, %v4584_v16 }
 0x295   : > { %v4586_v62 = vpop.eup %4585 }
 0x296   : > { %4591 = vrcp.f32 %v2871_v13  ;;  %v2877_v27 = vadd.f32 1.0, %v4586_v62  ;;  %v4588_v60 = vpop.eup %4587 }
 0x297   : > { %v4590_v24 = vpop.eup %4589 }
 0x298   : > { %4593 = vrcp.f32 %v2877_v27  ;;  %v2884_v53 = vadd.f32 1.0, %v4590_v24 }
 0x2a1   : > { %v2816_v28 = vpop.f32.mrf.mxu0  ;;  %v2857_v8 = vpop.f32.mrf.mxu1 }
 0x2a2   : > { %v2864_v34 = vadd.f32 %v2816_v28, %v5842_v57 }
 0x2a3   : > { %v4592_v5 = vpop.eup %4591  ;;  %v2818_v0 = vpop.f32.mrf.mxu0 }
 0x2a4   : > { %v2859_v59 = vpop.f32.mrf.mxu1  ;;  %v2888_v23 = vmul.f32 %v4592_v5, %v4588_v60  ;;  %v4091_v6 = vmul.f32 -1.442695, %v2864_v34  ;;  %v2865_v17 = vadd.f32 %v2818_v0, %v5846_v39  ;;  %v2866_v39 = vadd.f32 %v2857_v8, %v5844_v10 }
 0x2a5   : > { %v4594_v16 = vpop.eup %4593  ;;  %v2820_v43 = vpop.f32.mrf.mxu0  ;;  %v2867_v57 = vadd.f32 %v2859_v59, %v5848_v32  ;;  %v4701_v59 = vld [vmem:[%s6374_s8 + $0x40] ss:$16 sps:$4 sm:$0xff]  }
 0x2a6   : > { %v2861_v2 = vpop.f32.mrf.mxu1  ;;  %v2887_v13 = vmul.f32 %v4594_v16, %v5868_v25  ;;  %4595 = vpow2.f32 %v4091_v6  ;;  %v4092_v41 = vmul.f32 -1.442695, %v2865_v17  ;;  %v4702_v6 = vld [vmem:[%s6374_s8 + $0x48] ss:$16 sps:$4 sm:$0xff]   ;;  %v4703_v17 = vld [vmem:[%s6374_s8 + $0x24] ss:$16 sps:$4 sm:$0xff]  }
 0x2a7   : > { %v2821_v4 = vpop.f32.mrf.mxu0  ;;  %v4093_v27 = vmul.f32 -1.442695, %v2867_v57  ;;  %v4704_v16 = vld [vmem:[%s6374_s8 + $0x2c] ss:$16 sps:$4 sm:$0xff]   ;;  %v4706_v43 = vld [vmem:[%s6374_s8 + $0x28] ss:$16 sps:$4 sm:$0xff]  }
 0x2a8   : > { %v2862_v35 = vpop.f32.mrf.mxu1  ;;  %v5960_v62 = vadd.f32 %v2888_v23, %v2887_v13  ;;  %4597 = vpow2.f32 %v4092_v41  ;;  %v4707_v2 = vld [vmem:[%s6374_s8 + $0x4] ss:$16 sps:$4 sm:$0xff]   ;;  %v4708_v13 = vld [vmem:[%s6374_s8 + $0xc] ss:$16 sps:$4 sm:$0xff]   ;;  %v4709_v41 = vld [vmem:[%s6374_s8] ss:$16 sps:$4 sm:$0xff]  }
 0x2a9   : > { %4599 = vrcp.f32 %v2884_v53  ;;  %v4705_v53 = vld [vmem:[%s6374_s8 + $0x20] ss:$16 sps:$4 sm:$0xff]   ;;  %v4710_v4 = vld [vmem:[%s6374_s8 + $0x8] ss:$16 sps:$4 sm:$0xff]   ;;  %v4711_v35 = vld [vmem:[%s6375_s9 + $0xe4] ss:$16 sps:$4 sm:$0xff]  }
 0x2aa   : > { %4601 = vtanh.f32 %v5960_v62  ;;  %v4712_v57 = vld [vmem:[%s6375_s9 + $0xec] ss:$16 sps:$4 sm:$0xff]  }
 0x2ab   : > { %4603 = vtanh.f32 %v2866_v39 }
 0x2ac   : > { %4605 = vpow2.f32 %v4093_v27 }
 0x2b3   : > { %v4596_v60 = vpop.eup %4595 }
 0x2b4   : > { %v2895_v28 = vadd.f32 1.0, %v4596_v60 }
 0x2b5   : > { %v4598_v25 = vpop.eup %4597 }
 0x2b6   : > { %v4600_v24 = vpop.eup %4599  ;;  %4607 = vrcp.f32 %v2895_v28  ;;  %v2901_v34 = vadd.f32 1.0, %v4598_v25 }
 0x2b7   : > { %v4602_v5 = vpop.eup %4601 }
 0x2b8   : > { %4609 = vrcp.f32 %v2901_v34  ;;  %v2891_v0 = vmul.f32 %v4602_v5, %v4600_v24  ;;  %v4604_v10 = vpop.eup %4603 }
 0x2b9   : > { %v4606_v32 = vpop.eup %4605 }
 0x2ba   : > { %v2926_v23 = vpack.c.bf16 %v2891_v0, %v2891_v0  ;;  %3404 = vst [vmem:[%s4886_s27 + $0x8] sm:$0xff] %v2891_v0 }
 0x2bc   : > { %2960 = vmatmul.mubr.bf16.vlgmr.msra.gmra.mxu0 %v2926_v23  ;;  %3001 = vmatmul.mubr.bf16.vlgmr.msra.gmra.mxu1 %v2926_v23 }
 0x2bd   : > { %3021 = vmatpush1.bf16.msra.mxu0 %v5519_v48  ;;  %3062 = vmatpush1.bf16.msra.mxu1 %v5524_v49 }
 0x2be   : > { %3022 = vmatprep.subr.bf16.mxu0 %v5531_v50  ;;  %3063 = vmatprep.subr.bf16.mxu1 %v5536_v51  ;;  %v2908_v50 = vadd.f32 1.0, %v4606_v32 }
 0x2bf   : > { %3052 = vmatprep.mubr.bf16.mxu0 %v6547_v44  ;;  %3093 = vmatprep.mubr.bf16.mxu1 %v6547_v44 }
 0x2c0   : > { %4611 = vrcp.f32 %v2908_v50 }
 0x2c1   : > { %3023 = vmatpush1.bf16.msra.mxu0 %v6559_v22  ;;  %3064 = vmatpush1.bf16.msra.mxu1 %v6560_v29 }
 0x2c2   : > { %3024 = vmatprep.subr.bf16.mxu0 %v6561_v1  ;;  %3065 = vmatprep.subr.bf16.mxu1 %v6562_v58 }
 0x2c3   : > { %v4608_v48 = vpop.eup %4607 }
 0x2c4   : > { %v2912_v49 = vmul.f32 %v4608_v48, %v4604_v10 }
 0x2c5   : > { %v4610_v8 = vpop.eup %4609  ;;  %3025 = vmatpush1.bf16.msra.mxu0 %v6563_v37  ;;  %3066 = vmatpush1.bf16.msra.mxu1 %v6564_v3  ;;  %v4679_v3 = vld [vmem:[%s6374_s8 + $0xe4] ss:$16 sps:$4 sm:$0xff]  }
 0x2c6   : > { %v2911_v51 = vmul.f32 %v4610_v8, %v5892_v33  ;;  %3026 = vmatprep.subr.bf16.mxu0 %v6565_v38  ;;  %3067 = vmatprep.subr.bf16.mxu1 %v6566_v45  ;;  %v4680_v38 = vld [vmem:[%s6374_s8 + $0xec] ss:$16 sps:$4 sm:$0xff]   ;;  %v4681_v45 = vld [vmem:[%s6374_s8 + $0xe0] ss:$16 sps:$4 sm:$0xff]   ;;  %v4682_v33 = vld [vmem:[%s6374_s8 + $0xe8] ss:$16 sps:$4 sm:$0xff]  }
 0x2c8   : > { %v5981_v22 = vadd.f32 %v2912_v49, %v2911_v51 }
 0x2c9   : > { %3027 = vmatpush1.bf16.msra.mxu0 %v6567_v15  ;;  %3068 = vmatpush1.bf16.msra.mxu1 %v6568_v47  ;;  %v4683_v15 = vld [vmem:[%s6374_s8 + $0xc4] ss:$16 sps:$4 sm:$0xff]   ;;  %v4684_v47 = vld [vmem:[%s6374_s8 + $0xcc] ss:$16 sps:$4 sm:$0xff]  }
 0x2ca   : > { %3028 = vmatprep.subr.bf16.mxu0 %v6569_v42  ;;  %3069 = vmatprep.subr.bf16.mxu1 %v6570_v20  ;;  %4613 = vtanh.f32 %v5981_v22  ;;  %v4685_v42 = vld [vmem:[%s6374_s8 + $0xc0] ss:$16 sps:$4 sm:$0xff]   ;;  %v4686_v20 = vld [vmem:[%s6374_s8 + $0xc8] ss:$16 sps:$4 sm:$0xff]  }
 0x2cd   : > { %3029 = vmatpush1.bf16.msra.mxu0 %v6571_v36  ;;  %3070 = vmatpush1.bf16.msra.mxu1 %v6572_v7  ;;  %v4612_v29 = vpop.eup %4611  ;;  %v4687_v36 = vld [vmem:[%s6374_s8 + $0xa4] ss:$16 sps:$4 sm:$0xff]   ;;  %v4688_v7 = vld [vmem:[%s6374_s8 + $0xac] ss:$16 sps:$4 sm:$0xff]  }
 0x2ce   : > { %3030 = vmatprep.subr.bf16.mxu0 %v6573_v19  ;;  %3071 = vmatprep.subr.bf16.mxu1 %v6574_v12  ;;  %v4689_v19 = vld [vmem:[%s6374_s8 + $0xa0] ss:$16 sps:$4 sm:$0xff]   ;;  %v4690_v12 = vld [vmem:[%s6374_s8 + $0xa8] ss:$16 sps:$4 sm:$0xff]  }
 0x2d1   : > { %3031 = vmatpush1.bf16.msra.mxu0 %v6575_v21  ;;  %3072 = vmatpush1.bf16.msra.mxu1 %v6576_v9  ;;  %v4691_v21 = vld [vmem:[%s6374_s8 + $0x84] ss:$16 sps:$4 sm:$0xff]   ;;  %v4692_v9 = vld [vmem:[%s6374_s8 + $0x8c] ss:$16 sps:$4 sm:$0xff]  }
 0x2d2   : > { %3032 = vmatprep.subr.bf16.mxu0 %v6577_v54  ;;  %3073 = vmatprep.subr.bf16.mxu1 %v6578_v18  ;;  %v4693_v54 = vld [vmem:[%s6374_s8 + $0x80] ss:$16 sps:$4 sm:$0xff]   ;;  %v4694_v18 = vld [vmem:[%s6374_s8 + $0x88] ss:$16 sps:$4 sm:$0xff]  }
 0x2d5   : > { %3033 = vmatpush1.bf16.msra.mxu0 %v6579_v11  ;;  %3074 = vmatpush1.bf16.msra.mxu1 %v6580_v26  ;;  %v4695_v11 = vld [vmem:[%s6374_s8 + $0x64] ss:$16 sps:$4 sm:$0xff]   ;;  %v4696_v26 = vld [vmem:[%s6374_s8 + $0x6c] ss:$16 sps:$4 sm:$0xff]  }
 0x2d6   : > { %3034 = vmatprep.subr.bf16.mxu0 %v6581_v46  ;;  %3075 = vmatprep.subr.bf16.mxu1 %v6582_v14  ;;  %v4697_v46 = vld [vmem:[%s6374_s8 + $0x60] ss:$16 sps:$4 sm:$0xff]   ;;  %v4698_v14 = vld [vmem:[%s6374_s8 + $0x68] ss:$16 sps:$4 sm:$0xff]  }
 0x2d7   : > { %v4614_v1 = vpop.eup %4613 }
 0x2d8   : > { %v6000_v58 = vmul.f32 %v4614_v1, %v4612_v29 }
 0x2d9   : > { %3035 = vmatpush1.bf16.msra.mxu0 %v6584_v30  ;;  %3076 = vmatpush1.bf16.msra.mxu1 %v6585_v40  ;;  %v4699_v30 = vld [vmem:[%s6374_s8 + $0x44] ss:$16 sps:$4 sm:$0xff]   ;;  %v4700_v40 = vld [vmem:[%s6374_s8 + $0x4c] ss:$16 sps:$4 sm:$0xff]  }
 0x2da   : > { %v3019_v37 = vpack.c.bf16 %v6000_v58, %v6000_v58  ;;  %3165 = vmatprep.subr.bf16.mxu0 %v4679_v3  ;;  %3206 = vmatprep.subr.bf16.mxu1 %v4680_v38  ;;  %3413 = vst [vmem:[%s4901_s21 + $0x10] sm:$0xff] %v6000_v58 }
 0x2dc   : > { %3053 = vmatmul.mubr.bf16.vlgmr.msra.gmra.mxu0 %v3019_v37  ;;  %3094 = vmatmul.mubr.bf16.vlgmr.msra.gmra.mxu1 %v3019_v37 }
 0x2dd   : > { %3166 = vmatpush1.bf16.msra.mxu0 %v4681_v45  ;;  %3207 = vmatpush1.bf16.msra.mxu1 %v4682_v33 }
 0x2de   : > { %3167 = vmatprep.subr.bf16.mxu0 %v4683_v15  ;;  %3208 = vmatprep.subr.bf16.mxu1 %v4684_v47 }
 0x2df   : > { %3197 = vmatprep.mubr.bf16.mxu0 %v6547_v44  ;;  %3238 = vmatprep.mubr.bf16.mxu1 %v6547_v44 }
 0x2e1   : > { %3168 = vmatpush1.bf16.msra.mxu0 %v4685_v42  ;;  %3209 = vmatpush1.bf16.msra.mxu1 %v4686_v20 }
 0x2e2   : > { %3169 = vmatprep.subr.bf16.mxu0 %v4687_v36  ;;  %3210 = vmatprep.subr.bf16.mxu1 %v4688_v7 }
 0x2e5   : > { %3170 = vmatpush1.bf16.msra.mxu0 %v4689_v19  ;;  %3211 = vmatpush1.bf16.msra.mxu1 %v4690_v12 }
 0x2e6   : > { %3171 = vmatprep.subr.bf16.mxu0 %v4691_v21  ;;  %3212 = vmatprep.subr.bf16.mxu1 %v4692_v9 }
 0x2e9   : > { %3172 = vmatpush1.bf16.msra.mxu0 %v4693_v54  ;;  %3213 = vmatpush1.bf16.msra.mxu1 %v4694_v18 }
 0x2ea   : > { %3173 = vmatprep.subr.bf16.mxu0 %v4695_v11  ;;  %3214 = vmatprep.subr.bf16.mxu1 %v4696_v26 }
 0x2ed   : > { %3174 = vmatpush1.bf16.msra.mxu0 %v4697_v46  ;;  %3215 = vmatpush1.bf16.msra.mxu1 %v4698_v14 }
 0x2ee   : > { %3175 = vmatprep.subr.bf16.mxu0 %v4699_v30  ;;  %3216 = vmatprep.subr.bf16.mxu1 %v4700_v40 }
 0x2f1   : > { %3176 = vmatpush1.bf16.msra.mxu0 %v4701_v59  ;;  %3217 = vmatpush1.bf16.msra.mxu1 %v4702_v6 }
 0x2f2   : > { %3177 = vmatprep.subr.bf16.mxu0 %v4703_v17  ;;  %3218 = vmatprep.subr.bf16.mxu1 %v4704_v16  ;;  %v4713_v16 = vld [vmem:[%s6375_s9 + $0xe0] ss:$16 sps:$4 sm:$0xff]  }
 0x2f5   : > { %3178 = vmatpush1.bf16.msra.mxu0 %v4705_v53  ;;  %3219 = vmatpush1.bf16.msra.mxu1 %v4706_v43  ;;  %v4714_v53 = vld [vmem:[%s6375_s9 + $0xe8] ss:$16 sps:$4 sm:$0xff]   ;;  %v4715_v43 = vld [vmem:[%s6375_s9 + $0xc4] ss:$16 sps:$4 sm:$0xff]  }
 0x2f6   : > { %3179 = vmatprep.subr.bf16.mxu0 %v4707_v2  ;;  %3220 = vmatprep.subr.bf16.mxu1 %v4708_v13  ;;  %v4716_v2 = vld [vmem:[%s6375_s9 + $0xcc] ss:$16 sps:$4 sm:$0xff]  }
 0x2f9   : > { %3180 = vmatpush1.bf16.msra.mxu0 %v4709_v41  ;;  %3221 = vmatpush1.bf16.msra.mxu1 %v4710_v4  ;;  %v4717_v41 = vld [vmem:[%s6375_s9 + $0xc0] ss:$16 sps:$4 sm:$0xff]   ;;  %v4718_v4 = vld [vmem:[%s6375_s9 + $0xc8] ss:$16 sps:$4 sm:$0xff]  }
 0x2fa   : > { %3258 = vmatprep.subr.bf16.mxu0 %v4711_v35  ;;  %3299 = vmatprep.subr.bf16.mxu1 %v4712_v57  ;;  %v4719_v57 = vld [vmem:[%s6375_s9 + $0xa4] ss:$16 sps:$4 sm:$0xff]  }
 0x37c   : > { %v2961_v39 = vpop.f32.mrf.mxu0  ;;  %v3002_v27 = vpop.f32.mrf.mxu1 }
 0x37d   : > { %v3009_v60 = vadd.f32 %v2961_v39, %v5810_v56  ;;  %v3011_v49 = vadd.f32 %v3002_v27, %v5812_v55 }
 0x37e   : > { %v2963_v28 = vpop.f32.mrf.mxu0  ;;  %v3004_v25 = vpop.f32.mrf.mxu1 }
 0x37f   : > { %v4094_v24 = vmul.f32 -1.442695, %v3009_v60  ;;  %v3010_v34 = vadd.f32 %v2963_v28, %v5814_v52  ;;  %v3012_v48 = vadd.f32 %v3004_v25, %v5816_v31  ;;  %v4721_v25 = vld [vmem:[%s6375_s9 + $0xa0] ss:$16 sps:$4 sm:$0xff]  }
 0x380   : > { %v2965_v5 = vpop.f32.mrf.mxu0  ;;  %v3006_v0 = vpop.f32.mrf.mxu1 }
 0x381   : > { %4615 = vpow2.f32 %v4094_v24  ;;  %v4095_v23 = vmul.f32 -1.442695, %v3010_v34  ;;  %v4096_v8 = vmul.f32 -1.442695, %v3012_v48  ;;  %v4722_v24 = vld [vmem:[%s6375_s9 + $0xa8] ss:$16 sps:$4 sm:$0xff]  }
 0x382   : > { %v2966_v10 = vpop.f32.mrf.mxu0  ;;  %v3007_v32 = vpop.f32.mrf.mxu1  ;;  %v4723_v5 = vld [vmem:[%s6375_s9 + $0x84] ss:$16 sps:$4 sm:$0xff]   ;;  %v4724_v0 = vld [vmem:[%s6375_s9 + $0x8c] ss:$16 sps:$4 sm:$0xff]  }
 0x383   : > { %4617 = vpow2.f32 %v4095_v23  ;;  %v4725_v10 = vld [vmem:[%s6375_s9 + $0x80] ss:$16 sps:$4 sm:$0xff]   ;;  %v4727_v32 = vld [vmem:[%s6375_s9 + $0x64] ss:$16 sps:$4 sm:$0xff]   ;;  %v4728_v48 = vld [vmem:[%s6375_s9 + $0x6c] ss:$16 sps:$4 sm:$0xff]  }
 0x384   : > { %4619 = vtanh.f32 %v3011_v49  ;;  %v4729_v49 = vld [vmem:[%s6375_s9 + $0x60] ss:$16 sps:$4 sm:$0xff]  }
 0x385   : > { %4621 = vpow2.f32 %v4096_v8  ;;  %v4730_v8 = vld [vmem:[%s6375_s9 + $0x68] ss:$16 sps:$4 sm:$0xff]  }
 0x38e   : > { %v4616_v50 = vpop.eup %4615 }
 0x38f   : > { %v3109_v51 = vadd.f32 1.0, %v4616_v50  ;;  %v4731_v50 = vld [vmem:[%s6375_s9 + $0x44] ss:$16 sps:$4 sm:$0xff]  }
 0x390   : > { %v4618_v56 = vpop.eup %4617 }
 0x391   : > { %4623 = vrcp.f32 %v3109_v51  ;;  %v3115_v29 = vadd.f32 1.0, %v4618_v56  ;;  %v4620_v52 = vpop.eup %4619  ;;  %v4732_v51 = vld [vmem:[%s6375_s9 + $0x4c] ss:$16 sps:$4 sm:$0xff]   ;;  %v4733_v56 = vld [vmem:[%s6375_s9 + $0x40] ss:$16 sps:$4 sm:$0xff]  }
 0x392   : > { %v4622_v3 = vpop.eup %4621 }
 0x393   : > { %4625 = vrcp.f32 %v3115_v29  ;;  %v3122_v20 = vadd.f32 1.0, %v4622_v3  ;;  %v4734_v29 = vld [vmem:[%s6375_s9 + $0x48] ss:$16 sps:$4 sm:$0xff]  }
 0x394   : > { %v4738_v3 = vld [vmem:[%s6375_s9 + $0x28] ss:$16 sps:$4 sm:$0xff]  }
 0x39c   : > { %v3054_v1 = vpop.f32.mrf.mxu0  ;;  %v3095_v37 = vpop.f32.mrf.mxu1 }
 0x39d   : > { %v3102_v38 = vadd.f32 %v3054_v1, %v5834_v63  ;;  %v6620_v63 = vld [vmem:[#allocation80_spill] sm:$0xff] }
 0x39e   : > { %v4624_v45 = vpop.eup %4623  ;;  %v3056_v33 = vpop.f32.mrf.mxu0  ;;  %v4736_v1 = vld [vmem:[%s6375_s9 + $0x2c] ss:$16 sps:$4 sm:$0xff]  }
 0x39f   : > { %v3097_v31 = vpop.f32.mrf.mxu1  ;;  %v3126_v15 = vmul.f32 %v4624_v45, %v4620_v52  ;;  %v4097_v55 = vmul.f32 -1.442695, %v3102_v38  ;;  %v3103_v47 = vadd.f32 %v3056_v33, %v5838_v61  ;;  %v6621_v61 = vld [vmem:[#allocation79_spill] sm:$0xff]  ;;  %v4740_v33 = vld [vmem:[%s6375_s9 + $0xc] ss:$16 sps:$4 sm:$0xff]  }
 0x3a0   : > { %v4626_v42 = vpop.eup %4625  ;;  %v3058_v36 = vpop.f32.mrf.mxu0  ;;  %v3105_v18 = vadd.f32 %v3097_v31, %v6620_v63  ;;  %v3104_v11 = vadd.f32 %v3095_v37, %v6621_v61  ;;  %v4735_v52 = vld [vmem:[%s6375_s9 + $0x24] ss:$16 sps:$4 sm:$0xff]   ;;  %v4737_v37 = vld [vmem:[%s6375_s9 + $0x20] ss:$16 sps:$4 sm:$0xff]  }
 0x3a1   : > { %v3099_v7 = vpop.f32.mrf.mxu1  ;;  %v3125_v19 = vmul.f32 %v4626_v42, %v5960_v62  ;;  %4627 = vpow2.f32 %v4097_v55  ;;  %v4098_v12 = vmul.f32 -1.442695, %v3103_v47  ;;  %v4739_v45 = vld [vmem:[%s6375_s9 + $0x4] ss:$16 sps:$4 sm:$0xff]   ;;  %v4741_v55 = vld [vmem:[%s6375_s9] ss:$16 sps:$4 sm:$0xff]  }
 0x3a2   : > { %v3059_v21 = vpop.f32.mrf.mxu0  ;;  %v4099_v26 = vmul.f32 -1.442695, %v3105_v18  ;;  %v4742_v47 = vld [vmem:[%s6375_s9 + $0x8] ss:$16 sps:$4 sm:$0xff]   ;;  %v6622_v7 = vld [vmem:[#allocation71_spill] sm:$0xff]  ;;  %v6623_v63 = vld [vmem:[#allocation73_spill] sm:$0xff] }
 0x3a3   : > { %v3100_v9 = vpop.f32.mrf.mxu1  ;;  %v6117_v54 = vadd.f32 %v3126_v15, %v3125_v19  ;;  %4629 = vpow2.f32 %v4098_v12 }
 0x3a4   : > { %4631 = vrcp.f32 %v3122_v20 }
 0x3a5   : > { %4633 = vtanh.f32 %v6117_v54 }
 0x3a6   : > { %4635 = vtanh.f32 %v3104_v11 }
 0x3a7   : > { %4637 = vpow2.f32 %v4099_v26 }
 0x3ae   : > { %v4628_v46 = vpop.eup %4627 }
 0x3af   : > { %v3133_v14 = vadd.f32 1.0, %v4628_v46 }
 0x3b0   : > { %v4630_v62 = vpop.eup %4629 }
 0x3b1   : > { %v4632_v30 = vpop.eup %4631  ;;  %4639 = vrcp.f32 %v3133_v14  ;;  %v3139_v40 = vadd.f32 1.0, %v4630_v62  ;;  %v6624_v62 = vld [vmem:[#allocation74_spill] sm:$0xff] }
 0x3b2   : > { %v4634_v59 = vpop.eup %4633 }
 0x3b3   : > { %4641 = vrcp.f32 %v3139_v40  ;;  %v3129_v6 = vmul.f32 %v4634_v59, %v4632_v30  ;;  %v4636_v13 = vpop.eup %4635  ;;  %v6625_v40 = vld [vmem:[#allocation72_spill] sm:$0xff] }
 0x3b4   : > { %v4638_v35 = vpop.eup %4637 }
 0x3b5   : > { %v3164_v17 = vpack.c.bf16 %v3129_v6, %v3129_v6  ;;  %3405 = vst [vmem:[%s4886_s27 + $0x10] sm:$0xff] %v3129_v6  ;;  %v3146_v28 = vadd.f32 1.0, %v4638_v35  ;;  %v6626_v35 = vld [vmem:[#allocation75_spill] sm:$0xff] }
 0x3b7   : > { %3198 = vmatmul.mubr.bf16.vlgmr.msra.gmra.mxu0 %v3164_v17  ;;  %3239 = vmatmul.mubr.bf16.vlgmr.msra.gmra.mxu1 %v3164_v17  ;;  %4643 = vrcp.f32 %v3146_v28 }
 0x3b8   : > { %3259 = vmatpush1.bf16.msra.mxu0 %v4713_v16  ;;  %3300 = vmatpush1.bf16.msra.mxu1 %v4714_v53 }
 0x3b9   : > { %3260 = vmatprep.subr.bf16.mxu0 %v4715_v43  ;;  %3301 = vmatprep.subr.bf16.mxu1 %v4716_v2 }
 0x3ba   : > { %3290 = vmatprep.mubr.bf16.mxu0 %v6547_v44  ;;  %3331 = vmatprep.mubr.bf16.mxu1 %v6547_v44  ;;  %v4720_v44 = vld [vmem:[%s6375_s9 + $0xac] ss:$16 sps:$4 sm:$0xff]  }
 0x3bc   : > { %3261 = vmatpush1.bf16.msra.mxu0 %v4717_v41  ;;  %3302 = vmatpush1.bf16.msra.mxu1 %v4718_v4 }
 0x3bd   : > { %3262 = vmatprep.subr.bf16.mxu0 %v4719_v57  ;;  %3303 = vmatprep.subr.bf16.mxu1 %v4720_v44 }
 0x3be   : > { %v4640_v39 = vpop.eup %4639 }
 0x3bf   : > { %v3150_v27 = vmul.f32 %v4640_v39, %v4636_v13 }
 0x3c0   : > { %v4642_v60 = vpop.eup %4641  ;;  %3263 = vmatpush1.bf16.msra.mxu0 %v4721_v25  ;;  %3304 = vmatpush1.bf16.msra.mxu1 %v4722_v24  ;;  %v6627_v25 = vld [vmem:[#allocation77_spill] sm:$0xff] }
 0x3c1   : > { %v3149_v34 = vmul.f32 %v4642_v60, %v5981_v22  ;;  %3264 = vmatprep.subr.bf16.mxu0 %v4723_v5  ;;  %3305 = vmatprep.subr.bf16.mxu1 %v4724_v0  ;;  %v4726_v22 = vld [vmem:[%s6375_s9 + $0x88] ss:$16 sps:$4 sm:$0xff]  }
 0x3c3   : > { %v6162_v23 = vadd.f32 %v3150_v27, %v3149_v34 }
 0x3c4   : > { %3265 = vmatpush1.bf16.msra.mxu0 %v4725_v10  ;;  %3306 = vmatpush1.bf16.msra.mxu1 %v4726_v22  ;;  %v4644_v38 = vpop.eup %4643 }
 0x3c5   : > { %3266 = vmatprep.subr.bf16.mxu0 %v4727_v32  ;;  %3307 = vmatprep.subr.bf16.mxu1 %v4728_v48  ;;  %4645 = vtanh.f32 %v6162_v23 }
 0x3c8   : > { %3267 = vmatpush1.bf16.msra.mxu0 %v4729_v49  ;;  %3308 = vmatpush1.bf16.msra.mxu1 %v4730_v8 }
 0x3c9   : > { %3268 = vmatprep.subr.bf16.mxu0 %v4731_v50  ;;  %3309 = vmatprep.subr.bf16.mxu1 %v4732_v51  ;;  %v6628_v50 = vld [vmem:[#allocation78_spill] sm:$0xff] }
 0x3cc   : > { %3269 = vmatpush1.bf16.msra.mxu0 %v4733_v56  ;;  %3310 = vmatpush1.bf16.msra.mxu1 %v4734_v29  ;;  %v6629_v56 = vld [vmem:[#allocation76_spill] sm:$0xff] }
 0x3cd   : > { %3270 = vmatprep.subr.bf16.mxu0 %v4735_v52  ;;  %3311 = vmatprep.subr.bf16.mxu1 %v4736_v1 }
 0x3d0   : > { %3271 = vmatpush1.bf16.msra.mxu0 %v4737_v37  ;;  %3312 = vmatpush1.bf16.msra.mxu1 %v4738_v3 }
 0x3d1   : > { %3272 = vmatprep.subr.bf16.mxu0 %v4739_v45  ;;  %3313 = vmatprep.subr.bf16.mxu1 %v4740_v33 }
 0x3d2   : > { %v4646_v31 = vpop.eup %4645 }
 0x3d3   : > { %v6213_v15 = vmul.f32 %v4646_v31, %v4644_v38 }
 0x3d4   : > { %3273 = vmatpush1.bf16.msra.mxu0 %v4741_v55  ;;  %3314 = vmatpush1.bf16.msra.mxu1 %v4742_v47 }
 0x3d5   : > { %v3257_v42 = vpack.c.bf16 %v6213_v15, %v6213_v15  ;;  %3412 = vst [vmem:[%s4901_s21 + $0x8] sm:$0xff] %v6213_v15 }
 0x3d7   : > { %3291 = vmatmul.mubr.bf16.vlgmr.msra.gmra.mxu0 %v3257_v42  ;;  %3332 = vmatmul.mubr.bf16.vlgmr.msra.gmra.mxu1 %v3257_v42 }
 0x477   : > { %v3199_v20 = vpop.f32.mrf.mxu0  ;;  %v3240_v36 = vpop.f32.mrf.mxu1 }
 0x478   : > { %v3247_v19 = vadd.f32 %v3199_v20, %v6622_v7  ;;  %v3249_v59 = vadd.f32 %v3240_v36, %v6625_v40 }
 0x479   : > { %v3201_v12 = vpop.f32.mrf.mxu0  ;;  %v3242_v21 = vpop.f32.mrf.mxu1 }
 0x47a   : > { %v4100_v9 = vmul.f32 -1.442695, %v3247_v19  ;;  %v3248_v18 = vadd.f32 %v3201_v12, %v6623_v63  ;;  %v3250_v30 = vadd.f32 %v3242_v21, %v6624_v62 }
 0x47b   : > { %v3203_v61 = vpop.f32.mrf.mxu0  ;;  %v3244_v11 = vpop.f32.mrf.mxu1 }
 0x47c   : > { %4647 = vpow2.f32 %v4100_v9  ;;  %v4101_v26 = vmul.f32 -1.442695, %v3248_v18  ;;  %v4102_v6 = vmul.f32 -1.442695, %v3250_v30 }
 0x47d   : > { %v3204_v46 = vpop.f32.mrf.mxu0  ;;  %v3245_v14 = vpop.f32.mrf.mxu1 }
 0x47e   : > { %4649 = vpow2.f32 %v4101_v26 }
 0x47f   : > { %4651 = vtanh.f32 %v3249_v59 }
 0x480   : > { %4653 = vpow2.f32 %v4102_v6 }
 0x489   : > { %v4648_v17 = vpop.eup %4647 }
 0x48a   : > { %v3347_v16 = vadd.f32 1.0, %v4648_v17 }
 0x48b   : > { %v4650_v53 = vpop.eup %4649 }
 0x48c   : > { %4655 = vrcp.f32 %v3347_v16  ;;  %v3353_v43 = vadd.f32 1.0, %v4650_v53  ;;  %v4652_v2 = vpop.eup %4651 }
 0x48d   : > { %v4654_v4 = vpop.eup %4653 }
 0x48e   : > { %4657 = vrcp.f32 %v3353_v43  ;;  %v3360_v5 = vadd.f32 1.0, %v4654_v4 }
 0x497   : > { %v3292_v13 = vpop.f32.mrf.mxu0  ;;  %v3333_v41 = vpop.f32.mrf.mxu1 }
 0x498   : > { %v3340_v57 = vadd.f32 %v3292_v13, %v6626_v35  ;;  %v3342_v29 = vadd.f32 %v3333_v41, %v6629_v56 }
 0x499   : > { %v4656_v44 = vpop.eup %4655  ;;  %v3294_v39 = vpop.f32.mrf.mxu0 }
 0x49a   : > { %v3335_v27 = vpop.f32.mrf.mxu1  ;;  %v3364_v60 = vmul.f32 %v4656_v44, %v4652_v2  ;;  %v4103_v28 = vmul.f32 -1.442695, %v3340_v57  ;;  %v3341_v24 = vadd.f32 %v3294_v39, %v6627_v25 }
 0x49b   : > { %v4658_v34 = vpop.eup %4657  ;;  %v3296_v0 = vpop.f32.mrf.mxu0  ;;  %v3343_v51 = vadd.f32 %v3335_v27, %v6628_v50 }
 0x49c   : > { %v3337_v10 = vpop.f32.mrf.mxu1  ;;  %v3363_v22 = vmul.f32 %v4658_v34, %v6117_v54  ;;  %4659 = vpow2.f32 %v4103_v28  ;;  %v4104_v32 = vmul.f32 -1.442695, %v3341_v24 }
 0x49d   : > { %v3297_v48 = vpop.f32.mrf.mxu0  ;;  %v4105_v52 = vmul.f32 -1.442695, %v3343_v51 }
 0x49e   : > { %v3338_v49 = vpop.f32.mrf.mxu1  ;;  %v6230_v8 = vadd.f32 %v3364_v60, %v3363_v22  ;;  %4661 = vpow2.f32 %v4104_v32 }
 0x49f   : > { %4663 = vrcp.f32 %v3360_v5 }
 0x4a0   : > { %4665 = vtanh.f32 %v6230_v8  ;;  %3396 = vst [vmem:[#allocation3] sm:$0xff] %v6230_v8 }
 0x4a1   : > { %4667 = vtanh.f32 %v3342_v29 }
 0x4a2   : > { %4669 = vpow2.f32 %v4105_v52 }
 0x4a9   : > { %v4660_v1 = vpop.eup %4659 }
 0x4aa   : > { %v3371_v54 = vadd.f32 1.0, %v4660_v1 }
 0x4ab   : > { %v4662_v37 = vpop.eup %4661 }
 0x4ac   : > { %v4664_v3 = vpop.eup %4663  ;;  %4671 = vrcp.f32 %v3371_v54  ;;  %v3377_v38 = vadd.f32 1.0, %v4662_v37 }
 0x4ad   : > { %v4666_v45 = vpop.eup %4665 }
 0x4ae   : > { %v6236_v33 = vmul.f32 %v4666_v45, %v4664_v3  ;;  %4673 = vrcp.f32 %v3377_v38  ;;  %v4668_v31 = vpop.eup %4667 }
 0x4af   : > { %v4670_v55 = vpop.eup %4669 }
 0x4b0   : > { %3395 = vst [vmem:[#allocation2] sm:$0xff] %v6236_v33  ;;  %3406 = vst [vmem:[%s4886_s27 + $0x18] sm:$0xff] %v6236_v33  ;;  %v3384_v36 = vadd.f32 1.0, %v4670_v55 }
 0x4b2   : > { %4675 = vrcp.f32 %v3384_v36 }
 0x4b9   : > { %v4672_v47 = vpop.eup %4671 }
 0x4ba   : > { %v3388_v42 = vmul.f32 %v4672_v47, %v4668_v31 }
 0x4bb   : > { %v4674_v20 = vpop.eup %4673 }
 0x4bc   : > { %v3387_v7 = vmul.f32 %v4674_v20, %v6162_v23  ;;  %v6630_v23 = vld [vmem:[#allocation45_spill] sm:$0xff] }
 0x4bd   : > { %3414 = vst [vmem:[%s4901_s21 + $0x18] sm:$0xff] %v6630_v23 }
 0x4be   : > { %v6242_v19 = vadd.f32 %v3388_v42, %v3387_v7 }
 0x4bf   : > { %v4676_v12 = vpop.eup %4675 }
 0x4c0   : > { %4677 = vtanh.f32 %v6242_v19  ;;  %3398 = vst [vmem:[#allocation5] sm:$0xff] %v6242_v19 }
 0x4cc   : > { %3418 = sbr.rel (%p4106_p6) target bundleno = 1498 (0x5da), region = 88 }
 0x4cd   : > { %v4678_v21 = vpop.eup %4677 }
 0x4ce   : > { %v6246_v9 = vmul.f32 %v4678_v21, %v4676_v12 }
 0x4d0   : > { %3397 = vst [vmem:[#allocation4] sm:$0xff] %v6246_v9  ;;  %3411 = vst [vmem:[%s4901_s21] sm:$0xff] %v6246_v9 }
 0x4d1   : > { %v4743_v63 = vld [vmem:[%s6631_s26 + $0x38] sm:$0xff]   ;;  %v4769_v18 = vmov 0.0   ;;  %v4745_v58 = vld [vmem:[%s6631_s26 + $0x30] sm:$0xff]   ;;  %vm4770_vm0 = vmmov 0   ;;  %v4747_v11 = vld [vmem:[%s6631_s26 + $0x28] sm:$0xff]   ;;  %v3453_v43 = vpack.c.bf16 %v6246_v9, %v6246_v9  ;;  %v3452_v2 = vpack.c.bf16 %v6236_v33, %v6236_v33 }
 0x4d2   : > { %4163 = vmatprep.subr.bf16.mxu0 %v4769_v18  ;;  %4183 = vmatprep.subr.bf16.mxu1 %v4769_v18  ;;  %v4744_v15 = vld [vmem:[%s6632_s30 + $0x38] sm:$0xff]   ;;  %v4746_v61 = vld [vmem:[%s6632_s30 + $0x30] sm:$0xff]   ;;  %v4748_v26 = vld [vmem:[%s6632_s30 + $0x28] sm:$0xff]   ;;  %v3638_v13 = vpack.c.bf16 %v6242_v19, %v6242_v19  ;;  %v3637_v41 = vpack.c.bf16 %v6230_v8, %v6230_v8 }
 0x4d3   : > { %4164 = vmatpush3.bf16.msra.mxu0 %v4743_v63  ;;  %4179 = vmatprep.mubr.msk.bf16.mxu0 %vm4770_vm0, %v4769_v18  ;;  %v4749_v46 = vld [vmem:[%s6631_s26 + $0x20] sm:$0xff]   ;;  %v4751_v62 = vld [vmem:[%s6631_s26 + $0x18] sm:$0xff]   ;;  %v4753_v40 = vld [vmem:[%s6631_s26 + $0x10] sm:$0xff]  }
 0x4d4   : > { %4184 = vmatpush3.bf16.msra.mxu1 %v4744_v15  ;;  %4165 = vmatprep.subr.bf16.mxu0 %v4769_v18  ;;  %v4750_v14 = vld [vmem:[%s6632_s30 + $0x20] sm:$0xff]   ;;  %v4752_v30 = vld [vmem:[%s6632_s30 + $0x18] sm:$0xff]   ;;  %v4754_v59 = vld [vmem:[%s6632_s30 + $0x10] sm:$0xff]  }
 0x4d5   : > { %4185 = vmatprep.subr.bf16.mxu1 %v4769_v18  ;;  %4199 = vmatprep.mubr.msk.bf16.mxu1 %vm4770_vm0, %v4769_v18  ;;  %v4755_v6 = vld [vmem:[%s6631_s26 + $0x8] sm:$0xff]   ;;  %v4757_v16 = vld [vmem:[%s6631_s26] sm:$0xff]  }
 0x4d6   : > { %v4756_v17 = vld [vmem:[%s6632_s30 + $0x8] sm:$0xff]   ;;  %v4758_v53 = vld [vmem:[%s6632_s30] sm:$0xff]  }
 0x4d7   : > { %4166 = vmatpush3.bf16.msra.mxu0 %v4745_v58  ;;  %v4123_v35 = vld [vmem:[%s6633_s24] ss:$0 sm:$0xff] }
 0x4d8   : > { %4186 = vmatpush3.bf16.msra.mxu1 %v4746_v61  ;;  %4167 = vmatprep.subr.bf16.mxu0 %v4769_v18 }
 0x4d9   : > { %4187 = vmatprep.subr.bf16.mxu1 %v4769_v18 }
 0x4db   : > { %4168 = vmatpush3.bf16.msra.mxu0 %v4747_v11 }
 0x4dc   : > { %4188 = vmatpush3.bf16.msra.mxu1 %v4748_v26  ;;  %4169 = vmatprep.subr.bf16.mxu0 %v4769_v18 }
 0x4dd   : > { %4189 = vmatprep.subr.bf16.mxu1 %v4769_v18 }
 0x4df   : > { %4170 = vmatpush3.bf16.msra.mxu0 %v4749_v46 }
 0x4e0   : > { %4190 = vmatpush3.bf16.msra.mxu1 %v4750_v14  ;;  %4171 = vmatprep.subr.bf16.mxu0 %v4769_v18 }
 0x4e1   : > { %4191 = vmatprep.subr.bf16.mxu1 %v4769_v18 }
 0x4e3   : > { %4172 = vmatpush3.bf16.msra.mxu0 %v4751_v62 }
 0x4e4   : > { %4192 = vmatpush3.bf16.msra.mxu1 %v4752_v30  ;;  %4173 = vmatprep.subr.bf16.mxu0 %v4769_v18 }
 0x4e5   : > { %4193 = vmatprep.subr.bf16.mxu1 %v4769_v18 }
 0x4e7   : > { %4174 = vmatpush3.bf16.msra.mxu0 %v4753_v40 }
 0x4e8   : > { %4194 = vmatpush3.bf16.msra.mxu1 %v4754_v59  ;;  %4175 = vmatprep.subr.bf16.mxu0 %v4769_v18 }
 0x4e9   : > { %4195 = vmatprep.subr.bf16.mxu1 %v4769_v18 }
 0x4eb   : > { %4176 = vmatpush3.bf16.msra.mxu0 %v4755_v6 }
 0x4ec   : > { %4196 = vmatpush3.bf16.msra.mxu1 %v4756_v17  ;;  %4177 = vmatprep.subr.bf16.mxu0 %v4769_v18 }
 0x4ed   : > { %4197 = vmatprep.subr.bf16.mxu1 %v4769_v18 }
 0x4ef   : > { %4178 = vmatpush3.bf16.msra.mxu0 %v4757_v16 }
 0x4f0   : > { %4198 = vmatpush3.bf16.msra.mxu1 %v4758_v53  ;;  %4203 = vmatprep.subr.bf16.mxu0 %v4769_v18 }
 0x4f1   : > { %4223 = vmatprep.subr.bf16.mxu1 %v4769_v18 }
 0x4f2   : > { %4180 = vmatmul.mubr.bf16.vlgmr.msra.gmra.mxu0 %v3453_v43 }
 0x4f3   : > { %4200 = vmatmul.mubr.bf16.vlgmr.msra.gmra.mxu1 %v3452_v2  ;;  %4204 = vmatpush3.bf16.msra.mxu0 %v4743_v63 }
 0x4f4   : > { %4224 = vmatpush3.bf16.msra.mxu1 %v4744_v15  ;;  %4205 = vmatprep.subr.bf16.mxu0 %v4769_v18 }
 0x4f5   : > { %4225 = vmatprep.subr.bf16.mxu1 %v4769_v18  ;;  %4219 = vmatprep.mubr.msk.bf16.mxu0 %vm4770_vm0, %v4769_v18 }
 0x4f6   : > { %4239 = vmatprep.mubr.msk.bf16.mxu1 %vm4770_vm0, %v4769_v18 }
 0x4f7   : > { %4206 = vmatpush3.bf16.msra.mxu0 %v4745_v58 }
 0x4f8   : > { %4226 = vmatpush3.bf16.msra.mxu1 %v4746_v61  ;;  %4207 = vmatprep.subr.bf16.mxu0 %v4769_v18 }
 0x4f9   : > { %4227 = vmatprep.subr.bf16.mxu1 %v4769_v18 }
 0x4fb   : > { %4208 = vmatpush3.bf16.msra.mxu0 %v4747_v11 }
 0x4fc   : > { %4228 = vmatpush3.bf16.msra.mxu1 %v4748_v26  ;;  %4209 = vmatprep.subr.bf16.mxu0 %v4769_v18 }
 0x4fd   : > { %4229 = vmatprep.subr.bf16.mxu1 %v4769_v18 }
 0x4ff   : > { %4210 = vmatpush3.bf16.msra.mxu0 %v4749_v46 }
 0x500   : > { %4230 = vmatpush3.bf16.msra.mxu1 %v4750_v14  ;;  %4211 = vmatprep.subr.bf16.mxu0 %v4769_v18 }
 0x501   : > { %4231 = vmatprep.subr.bf16.mxu1 %v4769_v18 }
 0x503   : > { %4212 = vmatpush3.bf16.msra.mxu0 %v4751_v62 }
 0x504   : > { %4232 = vmatpush3.bf16.msra.mxu1 %v4752_v30  ;;  %4213 = vmatprep.subr.bf16.mxu0 %v4769_v18 }
 0x505   : > { %4233 = vmatprep.subr.bf16.mxu1 %v4769_v18 }
 0x507   : > { %4214 = vmatpush3.bf16.msra.mxu0 %v4753_v40 }
 0x508   : > { %4234 = vmatpush3.bf16.msra.mxu1 %v4754_v59  ;;  %4215 = vmatprep.subr.bf16.mxu0 %v4769_v18 }
 0x509   : > { %4235 = vmatprep.subr.bf16.mxu1 %v4769_v18 }
 0x50b   : > { %4216 = vmatpush3.bf16.msra.mxu0 %v4755_v6 }
 0x50c   : > { %4236 = vmatpush3.bf16.msra.mxu1 %v4756_v17  ;;  %4217 = vmatprep.subr.bf16.mxu0 %v4769_v18 }
 0x50d   : > { %4237 = vmatprep.subr.bf16.mxu1 %v4769_v18 }
 0x50f   : > { %4218 = vmatpush3.bf16.msra.mxu0 %v4757_v16 }
 0x510   : > { %4238 = vmatpush3.bf16.msra.mxu1 %v4758_v53 }
 0x512   : > { %4220 = vmatmul.mubr.bf16.vlgmr.msra.gmra.mxu0 %v3638_v13 }
 0x513   : > { %4240 = vmatmul.mubr.bf16.vlgmr.msra.gmra.mxu1 %v3637_v41 }
 0x5b2   : > { %v3536_v4 = vpop.f32.mrf.mxu0 }
 0x5b3   : > { %v3624_v57 = vpop.f32.mrf.mxu1 }
 0x5b4   : > { %v3625_v44 = vadd.f32 %v3624_v57, %v3536_v4  ;;  %v4181_v39 = vpop.f32.mrf.mxu0 }
 0x5b5   : > { %v4201_v27 = vpop.f32.mrf.mxu1 }
 0x5b6   : > { %v3636_v60 = vadd.f32 %v4123_v35, %v3625_v44  ;;  %v3539_v28 = vpop.f32.mrf.mxu0 }
 0x5b7   : > { %v3627_v25 = vpop.f32.mrf.mxu1 }
 0x5b8   : > { %3720 = vst [vmem:[%s6634_s0] sm:$0xff] %v3636_v60  ;;  %v4182_v24 = vpop.f32.mrf.mxu0 }
 0x5b9   : > { %v4202_v34 = vpop.f32.mrf.mxu1 }
 0x5d2   : > { %v3673_v5 = vpop.f32.mrf.mxu0 }
 0x5d3   : > { %v3713_v0 = vpop.f32.mrf.mxu1 }
 0x5d4   : > { %v3714_v10 = vadd.f32 %v3713_v0, %v3673_v5  ;;  %v4221_v22 = vpop.f32.mrf.mxu0 }
 0x5d5   : > { %v4241_v32 = vpop.f32.mrf.mxu1 }
 0x5d6   : > { %v3719_v48 = vadd.f32 %v4123_v35, %v3714_v10  ;;  %v3676_v49 = vpop.f32.mrf.mxu0 }
 0x5d7   : > { %v3716_v8 = vpop.f32.mrf.mxu1 }
 0x5d8   : > { %4124 = vst [vmem:[%s6634_s0 + $0x8] sm:$0xff] %v3719_v48  ;;  %v4222_v50 = vpop.f32.mrf.mxu0 }
 0x5d9   : > { %v4242_v51 = vpop.f32.mrf.mxu1 }
 0x5da PF: > { %s6635_s19 = sld [smem:[#allocation10_spill]] }
 0x5e0   : > { %s28_s24 = sadd.s32 1, %s6635_s19  }
 0x5e1   : > { %p25_p7 = scmp.ge.s32.totalorder %s28_s24, 4  }
 0x5e3   :  { %27 = sbr.rel (!%p25_p7) target bundleno = 8 (0x8), region = 162 }

</bundles_post_ra>
